<compile_context>
chip_gen: v7x
topology: tpu7x:2x2x1
jax: 0.10.0
libtpu: 0.0.40
codegen_flags: <defaults>
</compile_context>

<pallas_src>
import functools

import jax
import jax.numpy as jnp
from jax.experimental import pallas as pl
from jax.experimental.pallas import tpu as pltpu


# ----------------------------------------------------------------------------
# Kernel: one grid step == `block_t` timesteps of the multi-layer GRU.
# The final-hidden output block has a constant index_map, so it stays resident
# in VMEM across the (sequential) grid and acts as the recurrent carry.
# ----------------------------------------------------------------------------
def _gru_block_kernel(max_len_ref,                              # scalar prefetch (SMEM)
                      x_ref, lens_ref, h0_ref,                  # inputs
                      w0i_ref, b0i_ref, w0h_ref, b0hn_ref,
                      wf_ref, bf_ref,
                      out_ref, hT_ref,                          # outputs
                      gi0_ref, xh_ref):                         # VMEM scratch
    tb, bp, hp = out_ref.shape          # timesteps per block, padded batch, padded hidden
    n_layers = hT_ref.shape[0]
    cdtype = w0h_ref.dtype              # compute (MXU) dtype, e.g. bfloat16

    i = pl.program_id(0)
    blk_start = i * tb

    # Initialize the resident hidden-state carry from the provided initial hidden state.
    @pl.when(i == 0)
    def _():
        hT_ref[...] = h0_ref[...]

    active = blk_start < max_len_ref[0]

    # Whole time block is past the longest sequence: zero outputs, hidden stays frozen.
    @pl.when(jnp.logical_not(active))
    def _():
        out_ref[...] = jnp.zeros_like(out_ref)

    @pl.when(active)
    def _():
        lens = lens_ref[...]                                            # (bp, 1) int32

        # ---- hoisted layer-0 input projection for the whole block (one big MXU matmul) ----
        # x_ref is the (tb*bp, hp) time-major slab of embedded tokens for this block.
        gi0 = jnp.dot(x_ref[...], w0i_ref[...],
                      preferred_element_type=jnp.float32) + b0i_ref[...]
        gi0_ref[...] = gi0                                              # (tb*bp, 3hp) f32

        # ---- serial recurrence over the timesteps of this block ----
        h = [hT_ref[l] for l in range(n_layers)]                        # f32 carries
        for j in range(tb):                                             # static unroll
            t = blk_start + j
            keep = t < lens                                             # (bp, 1) bool

            # Layer 0: input part precomputed; only the hidden matmul is on the serial path.
            h_prev = h[0]
            gh = jnp.dot(h_prev.astype(cdtype), w0h_ref[...],
                         preferred_element_type=jnp.float32)            # (bp, 3hp)
            gi = gi0_ref[j * bp:(j + 1) * bp, :]                        # (bp, 3hp)
            r = jax.nn.sigmoid(gi[:, :hp] + gh[:, :hp])
            z = jax.nn.sigmoid(gi[:, hp:2 * hp] + gh[:, hp:2 * hp])
            n = jnp.tanh(gi[:, 2 * hp:] + r * (gh[:, 2 * hp:] + b0hn_ref[...]))
            h_cand = (1.0 - z) * n + z * h_prev
            h[0] = jnp.where(keep, h_cand, h_prev)                      # freeze when finished
            layer_in = h[0]

            # Layers >= 1: single fused [x, h] @ W_fused matmul per layer per timestep.
            for l in range(1, n_layers):
                h_prev = h[l]
                xh_ref[:, :hp] = layer_in.astype(cdtype)
                xh_ref[:, hp:] = h_prev.astype(cdtype)
                g = jnp.dot(xh_ref[...], wf_ref[l - 1],
                            preferred_element_type=jnp.float32) + bf_ref[l - 1]   # (bp, 4hp)
                r = jax.nn.sigmoid(g[:, :hp])
                z = jax.nn.sigmoid(g[:, hp:2 * hp])
                n = jnp.tanh(g[:, 2 * hp:3 * hp] + r * g[:, 3 * hp:])
                h_cand = (1.0 - z) * n + z * h_prev
                h[l] = jnp.where(keep, h_cand, h_prev)
                layer_in = h[l]

            # pad_packed_sequence pads finished positions with zeros.
            out_ref[j] = jnp.where(keep, layer_in, 0.0)

        for l in range(n_layers):
            hT_ref[l] = h[l]


# ----------------------------------------------------------------------------
# One-time parameter layout prep: per-gate H -> H_pad padding, layer>=1 weight
# fusion, bias folding, bf16 cast.
# ----------------------------------------------------------------------------
def _round_up(x, m):
    return ((x + m - 1) // m) * m


def _pad_gate_dim(a, H, Hp):
    """Pad the trailing 3H gate axis to 3*Hp, per gate (r|z|n), with zeros."""
    lead = a.shape[:-1]
    a = a.reshape(lead + (3, H))
    a = jnp.pad(a, [(0, 0)] * (a.ndim - 1) + [(0, Hp - H)])
    return a.reshape(lead + (3 * Hp,))


def _prepare_params(params, H, Hp, compute_dtype):
    L = params["wih"].shape[0]
    f32 = jnp.float32

    emb = jnp.pad(params["embedding"], ((0, 0), (0, Hp - H))).astype(compute_dtype)

    def pad_w(w):    # (H, 3H) -> (Hp, 3Hp)
        return _pad_gate_dim(jnp.pad(w, ((0, Hp - H), (0, 0))), H, Hp)

    def pad_b(b):    # (3H,) -> (3Hp,)
        return _pad_gate_dim(b, H, Hp)

    wih = [pad_w(params["wih"][l]) for l in range(L)]
    whh = [pad_w(params["whh"][l]) for l in range(L)]
    bih = [pad_b(params["bih"][l]) for l in range(L)]
    bhh = [pad_b(params["bhh"][l]) for l in range(L)]

    # Layer 0: input projection hoisted; fold b_ih (all gates) and the r/z parts of b_hh into
    # one bias added during the block projection; only the n-gate hidden bias stays separate.
    w0i = wih[0].astype(compute_dtype)
    b0i = jnp.concatenate([bih[0][:Hp] + bhh[0][:Hp],
                           bih[0][Hp:2 * Hp] + bhh[0][Hp:2 * Hp],
                           bih[0][2 * Hp:]]).reshape(1, 3 * Hp).astype(f32)
    w0h = whh[0].astype(compute_dtype)
    b0hn = bhh[0][2 * Hp:].reshape(1, Hp).astype(f32)

    # Layers >= 1: fused (2Hp, 4Hp) weight producing [r_pre | z_pre | gi_n | gh_n].
    wf_list, bf_list = [], []
    for l in range(1, L):
        wi, wh, bi, bh = wih[l], whh[l], bih[l], bhh[l]
        zeros = jnp.zeros((Hp, Hp), wi.dtype)
        top = jnp.concatenate([wi[:, :Hp], wi[:, Hp:2 * Hp], wi[:, 2 * Hp:], zeros], axis=1)
        bot = jnp.concatenate([wh[:, :Hp], wh[:, Hp:2 * Hp], zeros, wh[:, 2 * Hp:]], axis=1)
        wf_list.append(jnp.concatenate([top, bot], axis=0))
        bf_list.append(jnp.concatenate([bi[:Hp] + bh[:Hp],
                                        bi[Hp:2 * Hp] + bh[Hp:2 * Hp],
                                        bi[2 * Hp:], bh[2 * Hp:]]))
    if not wf_list:   # n_layers == 1: dummy (unused) fused weight keeps shapes static
        wf_list.append(jnp.zeros((2 * Hp, 4 * Hp), f32))
        bf_list.append(jnp.zeros((4 * Hp,), f32))
    wf = jnp.stack(wf_list).astype(compute_dtype)           # (max(L-1,1), 2Hp, 4Hp)
    bf = jnp.stack(bf_list).reshape(-1, 1, 4 * Hp).astype(f32)

    return emb, w0i, b0i, w0h, b0hn, wf, bf


# ----------------------------------------------------------------------------
# Wrapper (glue: embedding gather, padding, layout, pallas_call plumbing).
# ----------------------------------------------------------------------------
def encoder_rnn_forward(params, input_seq, len_inputs, hidden, *,
                        block_t=8, compute_dtype=jnp.bfloat16):
    """input_seq: (B, T) int32; len_inputs: (B,) int; hidden: (n_layers, B, H) f32.
    Returns (output (B, T, H) f32 batch_first, hidden (n_layers, B, H) f32)."""
    B, T = input_seq.shape
    L, _, H = hidden.shape
    Hp = _round_up(H, 128)              # lane alignment (e.g. 500 -> 512)
    Bp = _round_up(B, 8)                # f32 sublane alignment
    Tp = _round_up(T, block_t)

    emb_tbl, w0i, b0i, w0h, b0hn, wf, bf = _prepare_params(params, H, Hp, compute_dtype)

    # Embedding lookup (glue), time-major layout, padding, and a flat (Tp*Bp, Hp) slab so the
    # kernel's hoisted layer-0 projection is a single well-shaped 2-D matmul per block.
    x = jnp.transpose(emb_tbl[input_seq], (1, 0, 2))                    # (T, B, Hp)
    x = jnp.pad(x, ((0, Tp - T), (0, Bp - B), (0, 0)))                  # (Tp, Bp, Hp)
    x2d = x.reshape(Tp * Bp, Hp)

    lens = jnp.pad(len_inputs.astype(jnp.int32), (0, Bp - B)).reshape(Bp, 1)
    h0 = jnp.pad(hidden.astype(jnp.float32), ((0, 0), (0, Bp - B), (0, Hp - H)))
    max_len = jnp.reshape(jnp.max(len_inputs).astype(jnp.int32), (1,))  # scalar prefetch

    const2 = lambda i, ml: (0, 0)
    const3 = lambda i, ml: (0, 0, 0)

    out_tm, h_T = pl.pallas_call(
        _gru_block_kernel,
        out_shape=(
            jax.ShapeDtypeStruct((Tp, Bp, Hp), jnp.float32),    # GRU outputs (time-major)
            jax.ShapeDtypeStruct((L, Bp, Hp), jnp.float32),     # final hidden (resident carry)
        ),
        grid_spec=pltpu.PrefetchScalarGridSpec(
            num_scalar_prefetch=1,                  # max(len): skip blocks past all sequences
            grid=(Tp // block_t,),
            in_specs=[
                pl.BlockSpec((block_t * Bp, Hp), lambda i, ml: (i, 0)),   # embedded tokens
                pl.BlockSpec((Bp, 1), const2),                            # lengths
                pl.BlockSpec((L, Bp, Hp), const3),                        # h0
                pl.BlockSpec((Hp, 3 * Hp), const2),                       # W_ih layer 0
                pl.BlockSpec((1, 3 * Hp), const2),                        # folded bias layer 0
                pl.BlockSpec((Hp, 3 * Hp), const2),                       # W_hh layer 0
                pl.BlockSpec((1, Hp), const2),                            # b_hh n-gate layer 0
                pl.BlockSpec((wf.shape[0], 2 * Hp, 4 * Hp), const3),      # fused W layers>=1
                pl.BlockSpec((wf.shape[0], 1, 4 * Hp), const3),           # fused bias layers>=1
            ],
            out_specs=[
                pl.BlockSpec((block_t, Bp, Hp), lambda i, ml: (i, 0, 0)), # outputs per block
                pl.BlockSpec((L, Bp, Hp), const3),                        # resident hidden carry
            ],
            scratch_shapes=[
                pltpu.VMEM((block_t * Bp, 3 * Hp), jnp.float32),  # hoisted layer-0 projection
                pltpu.VMEM((Bp, 2 * Hp), compute_dtype),          # [x, h] staging (fused matmul)
            ],
        ),
        compiler_params=pltpu.CompilerParams(
            dimension_semantics=("arbitrary",),       # time axis is recurrent (sequential)
            vmem_limit_bytes=64 * 1024 * 1024,        # explicit budget (v7x has 64 MiB VMEM)
        ),
    )(max_len, x2d, lens, h0, w0i, b0i, w0h, b0hn, wf, bf)

    output = jnp.transpose(out_tm[:T, :B, :H], (1, 0, 2))     # (B, T, H) batch_first
    return output, h_T[:, :B, :H]


# ----------------------------------------------------------------------------
# Pure-JAX reference mirroring torch semantics (and the kernel's bf16 rounding
# of weights/activations, so the comparison is apples-to-apples).
# ----------------------------------------------------------------------------
def encoder_rnn_reference(params, input_seq, len_inputs, hidden, compute_dtype=jnp.float32):
    f32 = jnp.float32
    rd = lambda a: a.astype(compute_dtype).astype(f32)
    emb = rd(params["embedding"])[input_seq]
    B, T, H = emb.shape
    L = hidden.shape[0]
    wih, whh = rd(params["wih"]), rd(params["whh"])
    bih, bhh = params["bih"].astype(f32), params["bhh"].astype(f32)
    h = hidden.astype(f32)
    outs = []
    for t in range(T):
        mask = (t < len_inputs).reshape(B, 1)
        x = emb[:, t]
        new_h = []
        for l in range(L):
            gi = rd(x) @ wih[l] + bih[l]
            gh = rd(h[l]) @ whh[l] + bhh[l]
            r = jax.nn.sigmoid(gi[:, :H] + gh[:, :H])
            z = jax.nn.sigmoid(gi[:, H:2 * H] + gh[:, H:2 * H])
            n = jnp.tanh(gi[:, 2 * H:] + r * gh[:, 2 * H:])
            hn = (1.0 - z) * n + z * h[l]
            hn = jnp.where(mask, hn, h[l])
            new_h.append(hn)
            x = hn
        h = jnp.stack(new_h)
        outs.append(jnp.where(mask, x, 0.0))
    return jnp.stack(outs, axis=1), h


# ----------------------------------------------------------------------------
# Deterministic parameter init (shapes follow nn.Embedding + nn.GRU).
# ----------------------------------------------------------------------------
def init_params(key, input_size, hidden_size, n_layers):
    ks = jax.random.split(key, 5)
    H = hidden_size
    bound = 1.0 / jnp.sqrt(jnp.float32(H))
    uni = lambda k, shape: jax.random.uniform(k, shape, jnp.float32, -bound, bound)
    return {
        "embedding": jax.random.normal(ks[0], (input_size, H), jnp.float32),  # nn.Embedding N(0,1)
        # GRU weights stored transposed (H_in, 3H) so the kernel computes x @ W; gate order r,z,n.
        "wih": uni(ks[1], (n_layers, H, 3 * H)),
        "whh": uni(ks[2], (n_layers, H, 3 * H)),
        "bih": uni(ks[3], (n_layers, 3 * H)),
        "bhh": uni(ks[4], (n_layers, 3 * H)),
    }


if __name__ == "__main__":
    # Small shapes consistent with the module (module defaults hidden=500, n_layers=2; shrunk).
    B, T, H, L, VOCAB = 4, 20, 32, 2, 20

    key = jax.random.PRNGKey(0)
    k_par, k_tok = jax.random.split(key)
    params = init_params(k_par, VOCAB, H, L)

    input_seq = jax.random.randint(k_tok, (B, T), 0, VOCAB, dtype=jnp.int32)
    # Variable lengths < T: exercises the per-step mask AND the skipped-block fast path.
    len_inputs = jnp.array([12, 9, 5, 1], dtype=jnp.int32)
    hidden0 = jnp.zeros((L, B, H), jnp.float32)                 # init_hidden

    output, h_T = encoder_rnn_forward(params, input_seq, len_inputs, hidden0,
                                      block_t=8, compute_dtype=jnp.bfloat16)
    output = jax.block_until_ready(output)
    h_T = jax.block_until_ready(h_T)

    ref_out, ref_h = encoder_rnn_reference(params, input_seq, len_inputs, hidden0,
                                           compute_dtype=jnp.bfloat16)

    assert output.shape == (B, T, H) and h_T.shape == (L, B, H)
    err_o = float(jnp.max(jnp.abs(output - ref_out)))
    err_h = float(jnp.max(jnp.abs(h_T - ref_h)))
    assert err_o < 2e-2 and err_h < 2e-2, (err_o, err_h)

    print("KERNEL_OK")
</pallas_src>

<mosaic_0001>
module attributes {stable_mosaic.version = 11 : i64} {
  func.func @_gru_block_kernel(%arg0: i32, %arg1: memref<1xi32, #tpu.memory_space<smem>>, %arg2: memref<64x128xbf16, #tpu.memory_space<vmem>>, %arg3: memref<8x1xi32, #tpu.memory_space<vmem>>, %arg4: memref<2x8x128xf32, #tpu.memory_space<vmem>>, %arg5: memref<128x384xbf16, #tpu.memory_space<vmem>>, %arg6: memref<1x384xf32, #tpu.memory_space<vmem>>, %arg7: memref<128x384xbf16, #tpu.memory_space<vmem>>, %arg8: memref<1x128xf32, #tpu.memory_space<vmem>>, %arg9: memref<1x256x512xbf16, #tpu.memory_space<vmem>>, %arg10: memref<1x1x512xf32, #tpu.memory_space<vmem>>, %arg11: memref<8x8x128xf32, #tpu.memory_space<vmem>>, %arg12: memref<2x8x128xf32, #tpu.memory_space<vmem>>, %arg13: memref<64x384xf32, #tpu.memory_space<vmem>>, %arg14: memref<8x256xbf16, #tpu.memory_space<vmem>>) attributes {dimension_semantics = [#tpu.dimension_semantics<arbitrary>], iteration_bounds = array<i64: 3>, scalar_prefetch = 1 : i64, scratch_operands = 2 : i64, tpu.core_type = #tpu.core_type<tc>, window_params = [{transform_indices = @transform_0, window_bounds = array<i64: 64, 128>}, {pipeline_mode = #tpu.pipeline_mode<synchronous>, transform_indices = @transform_1, window_bounds = array<i64: 8, 1>}, {pipeline_mode = #tpu.pipeline_mode<synchronous>, transform_indices = @transform_2, window_bounds = array<i64: 2, 8, 128>}, {pipeline_mode = #tpu.pipeline_mode<synchronous>, transform_indices = @transform_3, window_bounds = array<i64: 128, 384>}, {pipeline_mode = #tpu.pipeline_mode<synchronous>, transform_indices = @transform_4, window_bounds = array<i64: 1, 384>}, {pipeline_mode = #tpu.pipeline_mode<synchronous>, transform_indices = @transform_5, window_bounds = array<i64: 128, 384>}, {pipeline_mode = #tpu.pipeline_mode<synchronous>, transform_indices = @transform_6, window_bounds = array<i64: 1, 128>}, {pipeline_mode = #tpu.pipeline_mode<synchronous>, transform_indices = @transform_7, window_bounds = array<i64: 1, 256, 512>}, {pipeline_mode = #tpu.pipeline_mode<synchronous>, transform_indices = @transform_8, window_bounds = array<i64: 1, 1, 512>}, {transform_indices = @transform_9, window_bounds = array<i64: 8, 8, 128>}, {pipeline_mode = #tpu.pipeline_mode<synchronous>, transform_indices = @transform_10, window_bounds = array<i64: 2, 8, 128>}]} {
    %c8_i32 = arith.constant 8 : i32
    %0 = arith.muli %arg0, %c8_i32 : i32
    %c0_i32 = arith.constant 0 : i32
    %1 = arith.cmpi eq, %arg0, %c0_i32 : i32
    %2 = arith.extui %1 : i1 to i32
    %c0_i32_0 = arith.constant 0 : i32
    %3 = arith.cmpi ne, %2, %c0_i32_0 : i32
    scf.if %3 {
      %c0_3 = arith.constant 0 : index
      %c0_4 = arith.constant 0 : index
      %c0_5 = arith.constant 0 : index
      %11 = vector.load %arg4[%c0_3, %c0_4, %c0_5] : memref<2x8x128xf32, #tpu.memory_space<vmem>>, vector<2x8x128xf32>
      %c0_6 = arith.constant 0 : index
      %c0_7 = arith.constant 0 : index
      %c0_8 = arith.constant 0 : index
      %12 = vector.load %arg12[%c0_6, %c0_7, %c0_8] : memref<2x8x128xf32, #tpu.memory_space<vmem>>, vector<2x8x128xf32>
      tpu.vector_store %arg12[%c0_6, %c0_7, %c0_8], %11 {strides = array<i32>} : memref<2x8x128xf32, #tpu.memory_space<vmem>>, vector<2x8x128xf32>,
    } else {
    }
    %c0 = arith.constant 0 : index
    %4 = memref.load %arg1[%c0] : memref<1xi32, #tpu.memory_space<smem>>
    %5 = arith.cmpi slt, %0, %4 : i32
    %true = arith.constant true
    %6 = arith.xori %5, %true : i1
    %7 = arith.extui %6 : i1 to i32
    %c0_i32_1 = arith.constant 0 : i32
    %8 = arith.cmpi ne, %7, %c0_i32_1 : i32
    scf.if %8 {
      %cst = arith.constant 0.000000e+00 : f32
      %11 = vector.broadcast %cst : f32 to vector<8x8x128xf32>
      %c0_3 = arith.constant 0 : index
      %c0_4 = arith.constant 0 : index
      %c0_5 = arith.constant 0 : index
      %12 = vector.load %arg11[%c0_3, %c0_4, %c0_5] : memref<8x8x128xf32, #tpu.memory_space<vmem>>, vector<8x8x128xf32>
      tpu.vector_store %arg11[%c0_3, %c0_4, %c0_5], %11 {strides = array<i32>} : memref<8x8x128xf32, #tpu.memory_space<vmem>>, vector<8x8x128xf32>,
    } else {
    }
    %9 = arith.extui %5 : i1 to i32
    %c0_i32_2 = arith.constant 0 : i32
    %10 = arith.cmpi ne, %9, %c0_i32_2 : i32
    scf.if %10 {
      %c0_3 = arith.constant 0 : index
      %c0_4 = arith.constant 0 : index
      %11 = vector.load %arg3[%c0_3, %c0_4] : memref<8x1xi32, #tpu.memory_space<vmem>>, vector<8x1xi32>
      %c0_5 = arith.constant 0 : index
      %c0_6 = arith.constant 0 : index
      %12 = vector.load %arg2[%c0_5, %c0_6] : memref<64x128xbf16, #tpu.memory_space<vmem>>, vector<64x128xbf16>
      %c0_7 = arith.constant 0 : index
      %c0_8 = arith.constant 0 : index
      %13 = vector.load %arg5[%c0_7, %c0_8] : memref<128x384xbf16, #tpu.memory_space<vmem>>, vector<128x384xbf16>
      %cst = arith.constant dense<0.000000e+00> : vector<64x384xf32>
      %14 = tpu.matmul %12, %13, %cst {dimension_numbers = #tpu.dot_dimension_numbers<[1], [0], [0], [1], [0, 0, 1, 1], [], []>} : vector<64x128xbf16>, vector<128x384xbf16>, vector<64x384xf32> -> vector<64x384xf32>
      %c0_9 = arith.constant 0 : index
      %c0_10 = arith.constant 0 : index
      %15 = vector.load %arg6[%c0_9, %c0_10] : memref<1x384xf32, #tpu.memory_space<vmem>>, vector<1x384xf32>
      %16 = vector.broadcast %15 : vector<1x384xf32> to vector<64x384xf32>
      %17 = arith.addf %14, %16 : vector<64x384xf32>
      %c0_11 = arith.constant 0 : index
      %c0_12 = arith.constant 0 : index
      %18 = vector.load %arg13[%c0_11, %c0_12] : memref<64x384xf32, #tpu.memory_space<vmem>>, vector<64x384xf32>
      tpu.vector_store %arg13[%c0_11, %c0_12], %17 {strides = array<i32>} : memref<64x384xf32, #tpu.memory_space<vmem>>, vector<64x384xf32>,
      %c0_13 = arith.constant 0 : index
      %c0_14 = arith.constant 0 : index
      %c0_15 = arith.constant 0 : index
      %19 = vector.load %arg12[%c0_13, %c0_14, %c0_15] : memref<2x8x128xf32, #tpu.memory_space<vmem>>, vector<1x8x128xf32>
      %20 = vector.shape_cast %19 : vector<1x8x128xf32> to vector<8x128xf32>
      %c1 = arith.constant 1 : index
      %c0_16 = arith.constant 0 : index
      %c0_17 = arith.constant 0 : index
      %21 = vector.load %arg12[%c1, %c0_16, %c0_17] : memref<2x8x128xf32, #tpu.memory_space<vmem>>, vector<1x8x128xf32>
      %22 = vector.shape_cast %21 : vector<1x8x128xf32> to vector<8x128xf32>
      %c0_i32_18 = arith.constant 0 : i32
      %23 = arith.addi %0, %c0_i32_18 : i32
      %24 = vector.broadcast %23 : i32 to vector<8x1xi32>
      %25 = arith.cmpi slt, %24, %11 : vector<8x1xi32>
      %26 = arith.truncf %20 : vector<8x128xf32> to vector<8x128xbf16>
      %c0_19 = arith.constant 0 : index
      %c0_20 = arith.constant 0 : index
      %27 = vector.load %arg7[%c0_19, %c0_20] : memref<128x384xbf16, #tpu.memory_space<vmem>>, vector<128x384xbf16>
      %cst_21 = arith.constant dense<0.000000e+00> : vector<8x384xf32>
      %28 = tpu.matmul %26, %27, %cst_21 {dimension_numbers = #tpu.dot_dimension_numbers<[1], [0], [0], [1], [0, 0, 1, 1], [], []>} : vector<8x128xbf16>, vector<128x384xbf16>, vector<8x384xf32> -> vector<8x384xf32>
      %c0_22 = arith.constant 0 : index
      %c0_23 = arith.constant 0 : index
      %29 = vector.load %arg13[%c0_22, %c0_23] : memref<64x384xf32, #tpu.memory_space<vmem>>, vector<8x384xf32>
      %30 = vector.extract_strided_slice %29 {offsets = [0, 0], sizes = [8, 128], strides = [1, 1]} : vector<8x384xf32> to vector<8x128xf32>
      %31 = vector.extract_strided_slice %28 {offsets = [0, 0], sizes = [8, 128], strides = [1, 1]} : vector<8x384xf32> to vector<8x128xf32>
      %32 = arith.addf %30, %31 : vector<8x128xf32>
      %33 = arith.negf %32 : vector<8x128xf32>
      %34 = math.exp %33 : vector<8x128xf32>
      %cst_24 = arith.constant 1.000000e+00 : f32
      %35 = vector.broadcast %cst_24 : f32 to vector<8x128xf32>
      %36 = arith.addf %35, %34 : vector<8x128xf32>
      %37 = arith.divf %35, %36 : vector<8x128xf32>
      %38 = vector.extract_strided_slice %29 {offsets = [0, 128], sizes = [8, 128], strides = [1, 1]} : vector<8x384xf32> to vector<8x128xf32>
      %39 = vector.extract_strided_slice %28 {offsets = [0, 128], sizes = [8, 128], strides = [1, 1]} : vector<8x384xf32> to vector<8x128xf32>
      %40 = arith.addf %38, %39 : vector<8x128xf32>
      %41 = arith.negf %40 : vector<8x128xf32>
      %42 = math.exp %41 : vector<8x128xf32>
      %cst_25 = arith.constant 1.000000e+00 : f32
      %43 = vector.broadcast %cst_25 : f32 to vector<8x128xf32>
      %44 = arith.addf %43, %42 : vector<8x128xf32>
      %45 = arith.divf %43, %44 : vector<8x128xf32>
      %46 = vector.extract_strided_slice %29 {offsets = [0, 256], sizes = [8, 128], strides = [1, 1]} : vector<8x384xf32> to vector<8x128xf32>
      %47 = vector.extract_strided_slice %28 {offsets = [0, 256], sizes = [8, 128], strides = [1, 1]} : vector<8x384xf32> to vector<8x128xf32>
      %c0_26 = arith.constant 0 : index
      %c0_27 = arith.constant 0 : index
      %48 = vector.load %arg8[%c0_26, %c0_27] : memref<1x128xf32, #tpu.memory_space<vmem>>, vector<1x128xf32>
      %49 = vector.broadcast %48 : vector<1x128xf32> to vector<8x128xf32>
      %50 = arith.addf %47, %49 : vector<8x128xf32>
      %51 = arith.mulf %37, %50 : vector<8x128xf32>
      %52 = arith.addf %46, %51 : vector<8x128xf32>
      %53 = math.tanh %52 : vector<8x128xf32>
      %cst_28 = arith.constant 1.000000e+00 : f32
      %54 = vector.broadcast %cst_28 : f32 to vector<8x128xf32>
      %55 = arith.subf %54, %45 : vector<8x128xf32>
      %56 = arith.mulf %55, %53 : vector<8x128xf32>
      %57 = arith.mulf %45, %20 : vector<8x128xf32>
      %58 = arith.addf %56, %57 : vector<8x128xf32>
      %59 = vector.shape_cast %25 : vector<8x1xi1> to vector<8x1xi1>
      %60 = vector.broadcast %59 : vector<8x1xi1> to vector<8x128xi1>
      %61 = arith.select %60, %58, %20 : vector<8x128xi1>, vector<8x128xf32>
      %62 = arith.truncf %61 : vector<8x128xf32> to vector<8x128xbf16>
      %c0_29 = arith.constant 0 : index
      %c0_30 = arith.constant 0 : index
      %63 = vector.load %arg14[%c0_29, %c0_30] : memref<8x256xbf16, #tpu.memory_space<vmem>>, vector<8x128xbf16>
      tpu.vector_store %arg14[%c0_29, %c0_30], %62 {strides = array<i32>} : memref<8x256xbf16, #tpu.memory_space<vmem>>, vector<8x128xbf16>,
      %64 = arith.truncf %22 : vector<8x128xf32> to vector<8x128xbf16>
      %c0_31 = arith.constant 0 : index
      %c128 = arith.constant 128 : index
      %65 = vector.load %arg14[%c0_31, %c128] : memref<8x256xbf16, #tpu.memory_space<vmem>>, vector<8x128xbf16>
      tpu.vector_store %arg14[%c0_31, %c128], %64 {strides = array<i32>} : memref<8x256xbf16, #tpu.memory_space<vmem>>, vector<8x128xbf16>,
      %c0_32 = arith.constant 0 : index
      %c0_33 = arith.constant 0 : index
      %66 = vector.load %arg14[%c0_32, %c0_33] : memref<8x256xbf16, #tpu.memory_space<vmem>>, vector<8x256xbf16>
      %c0_34 = arith.constant 0 : index
      %c0_35 = arith.constant 0 : index
      %c0_36 = arith.constant 0 : index
      %67 = vector.load %arg9[%c0_34, %c0_35, %c0_36] : memref<1x256x512xbf16, #tpu.memory_space<vmem>>, vector<1x256x512xbf16>
      %68 = vector.shape_cast %67 : vector<1x256x512xbf16> to vector<256x512xbf16>
      %cst_37 = arith.constant dense<0.000000e+00> : vector<8x512xf32>
      %69 = tpu.matmul %66, %68, %cst_37 {dimension_numbers = #tpu.dot_dimension_numbers<[1], [0], [0], [1], [0, 0, 1, 1], [], []>} : vector<8x256xbf16>, vector<256x512xbf16>, vector<8x512xf32> -> vector<8x512xf32>
      %c0_38 = arith.constant 0 : index
      %c0_39 = arith.constant 0 : index
      %c0_40 = arith.constant 0 : index
      %70 = vector.load %arg10[%c0_38, %c0_39, %c0_40] : memref<1x1x512xf32, #tpu.memory_space<vmem>>, vector<1x1x512xf32>
      %71 = vector.shape_cast %70 : vector<1x1x512xf32> to vector<1x512xf32>
      %72 = vector.broadcast %71 : vector<1x512xf32> to vector<8x512xf32>
      %73 = arith.addf %69, %72 : vector<8x512xf32>
      %74 = vector.extract_strided_slice %73 {offsets = [0, 0], sizes = [8, 128], strides = [1, 1]} : vector<8x512xf32> to vector<8x128xf32>
      %75 = arith.negf %74 : vector<8x128xf32>
      %76 = math.exp %75 : vector<8x128xf32>
      %cst_41 = arith.constant 1.000000e+00 : f32
      %77 = vector.broadcast %cst_41 : f32 to vector<8x128xf32>
      %78 = arith.addf %77, %76 : vector<8x128xf32>
      %79 = arith.divf %77, %78 : vector<8x128xf32>
      %80 = vector.extract_strided_slice %73 {offsets = [0, 128], sizes = [8, 128], strides = [1, 1]} : vector<8x512xf32> to vector<8x128xf32>
      %81 = arith.negf %80 : vector<8x128xf32>
      %82 = math.exp %81 : vector<8x128xf32>
      %cst_42 = arith.constant 1.000000e+00 : f32
      %83 = vector.broadcast %cst_42 : f32 to vector<8x128xf32>
      %84 = arith.addf %83, %82 : vector<8x128xf32>
      %85 = arith.divf %83, %84 : vector<8x128xf32>
      %86 = vector.extract_strided_slice %73 {offsets = [0, 256], sizes = [8, 128], strides = [1, 1]} : vector<8x512xf32> to vector<8x128xf32>
      %87 = vector.extract_strided_slice %73 {offsets = [0, 384], sizes = [8, 128], strides = [1, 1]} : vector<8x512xf32> to vector<8x128xf32>
      %88 = arith.mulf %79, %87 : vector<8x128xf32>
      %89 = arith.addf %86, %88 : vector<8x128xf32>
      %90 = math.tanh %89 : vector<8x128xf32>
      %cst_43 = arith.constant 1.000000e+00 : f32
      %91 = vector.broadcast %cst_43 : f32 to vector<8x128xf32>
      %92 = arith.subf %91, %85 : vector<8x128xf32>
      %93 = arith.mulf %92, %90 : vector<8x128xf32>
      %94 = arith.mulf %85, %22 : vector<8x128xf32>
      %95 = arith.addf %93, %94 : vector<8x128xf32>
      %96 = vector.shape_cast %25 : vector<8x1xi1> to vector<8x1xi1>
      %97 = vector.broadcast %96 : vector<8x1xi1> to vector<8x128xi1>
      %98 = arith.select %97, %95, %22 : vector<8x128xi1>, vector<8x128xf32>
      %cst_44 = arith.constant 0.000000e+00 : f32
      %99 = vector.shape_cast %25 : vector<8x1xi1> to vector<8x1xi1>
      %100 = vector.broadcast %99 : vector<8x1xi1> to vector<8x128xi1>
      %101 = vector.broadcast %cst_44 : f32 to vector<8x128xf32>
      %102 = arith.select %100, %98, %101 : vector<8x128xi1>, vector<8x128xf32>
      %c0_45 = arith.constant 0 : index
      %c0_46 = arith.constant 0 : index
      %c0_47 = arith.constant 0 : index
      %103 = vector.load %arg11[%c0_45, %c0_46, %c0_47] : memref<8x8x128xf32, #tpu.memory_space<vmem>>, vector<1x8x128xf32>
      %104 = vector.shape_cast %103 : vector<1x8x128xf32> to vector<8x128xf32>
      %105 = vector.shape_cast %102 : vector<8x128xf32> to vector<1x8x128xf32>
      tpu.vector_store %arg11[%c0_45, %c0_46, %c0_47], %105 {strides = array<i32>} : memref<8x8x128xf32, #tpu.memory_space<vmem>>, vector<1x8x128xf32>,
      %c1_i32 = arith.constant 1 : i32
      %106 = arith.addi %0, %c1_i32 : i32
      %107 = vector.broadcast %106 : i32 to vector<8x1xi32>
      %108 = arith.cmpi slt, %107, %11 : vector<8x1xi32>
      %109 = arith.truncf %61 : vector<8x128xf32> to vector<8x128xbf16>
      %c0_48 = arith.constant 0 : index
      %c0_49 = arith.constant 0 : index
      %110 = vector.load %arg7[%c0_48, %c0_49] : memref<128x384xbf16, #tpu.memory_space<vmem>>, vector<128x384xbf16>
      %cst_50 = arith.constant dense<0.000000e+00> : vector<8x384xf32>
      %111 = tpu.matmul %109, %110, %cst_50 {dimension_numbers = #tpu.dot_dimension_numbers<[1], [0], [0], [1], [0, 0, 1, 1], [], []>} : vector<8x128xbf16>, vector<128x384xbf16>, vector<8x384xf32> -> vector<8x384xf32>
      %c8 = arith.constant 8 : index
      %c0_51 = arith.constant 0 : index
      %112 = vector.load %arg13[%c8, %c0_51] : memref<64x384xf32, #tpu.memory_space<vmem>>, vector<8x384xf32>
      %113 = vector.extract_strided_slice %112 {offsets = [0, 0], sizes = [8, 128], strides = [1, 1]} : vector<8x384xf32> to vector<8x128xf32>
      %114 = vector.extract_strided_slice %111 {offsets = [0, 0], sizes = [8, 128], strides = [1, 1]} : vector<8x384xf32> to vector<8x128xf32>
      %115 = arith.addf %113, %114 : vector<8x128xf32>
      %116 = arith.negf %115 : vector<8x128xf32>
      %117 = math.exp %116 : vector<8x128xf32>
      %cst_52 = arith.constant 1.000000e+00 : f32
      %118 = vector.broadcast %cst_52 : f32 to vector<8x128xf32>
      %119 = arith.addf %118, %117 : vector<8x128xf32>
      %120 = arith.divf %118, %119 : vector<8x128xf32>
      %121 = vector.extract_strided_slice %112 {offsets = [0, 128], sizes = [8, 128], strides = [1, 1]} : vector<8x384xf32> to vector<8x128xf32>
      %122 = vector.extract_strided_slice %111 {offsets = [0, 128], sizes = [8, 128], strides = [1, 1]} : vector<8x384xf32> to vector<8x128xf32>
      %123 = arith.addf %121, %122 : vector<8x128xf32>
      %124 = arith.negf %123 : vector<8x128xf32>
      %125 = math.exp %124 : vector<8x128xf32>
      %cst_53 = arith.constant 1.000000e+00 : f32
      %126 = vector.broadcast %cst_53 : f32 to vector<8x128xf32>
      %127 = arith.addf %126, %125 : vector<8x128xf32>
      %128 = arith.divf %126, %127 : vector<8x128xf32>
      %129 = vector.extract_strided_slice %112 {offsets = [0, 256], sizes = [8, 128], strides = [1, 1]} : vector<8x384xf32> to vector<8x128xf32>
      %130 = vector.extract_strided_slice %111 {offsets = [0, 256], sizes = [8, 128], strides = [1, 1]} : vector<8x384xf32> to vector<8x128xf32>
      %c0_54 = arith.constant 0 : index
      %c0_55 = arith.constant 0 : index
      %131 = vector.load %arg8[%c0_54, %c0_55] : memref<1x128xf32, #tpu.memory_space<vmem>>, vector<1x128xf32>
      %132 = vector.broadcast %131 : vector<1x128xf32> to vector<8x128xf32>
      %133 = arith.addf %130, %132 : vector<8x128xf32>
      %134 = arith.mulf %120, %133 : vector<8x128xf32>
      %135 = arith.addf %129, %134 : vector<8x128xf32>
      %136 = math.tanh %135 : vector<8x128xf32>
      %cst_56 = arith.constant 1.000000e+00 : f32
      %137 = vector.broadcast %cst_56 : f32 to vector<8x128xf32>
      %138 = arith.subf %137, %128 : vector<8x128xf32>
      %139 = arith.mulf %138, %136 : vector<8x128xf32>
      %140 = arith.mulf %128, %61 : vector<8x128xf32>
      %141 = arith.addf %139, %140 : vector<8x128xf32>
      %142 = vector.shape_cast %108 : vector<8x1xi1> to vector<8x1xi1>
      %143 = vector.broadcast %142 : vector<8x1xi1> to vector<8x128xi1>
      %144 = arith.select %143, %141, %61 : vector<8x128xi1>, vector<8x128xf32>
      %145 = arith.truncf %144 : vector<8x128xf32> to vector<8x128xbf16>
      %c0_57 = arith.constant 0 : index
      %c0_58 = arith.constant 0 : index
      %146 = vector.load %arg14[%c0_57, %c0_58] : memref<8x256xbf16, #tpu.memory_space<vmem>>, vector<8x128xbf16>
      tpu.vector_store %arg14[%c0_57, %c0_58], %145 {strides = array<i32>} : memref<8x256xbf16, #tpu.memory_space<vmem>>, vector<8x128xbf16>,
      %147 = arith.truncf %98 : vector<8x128xf32> to vector<8x128xbf16>
      %c0_59 = arith.constant 0 : index
      %c128_60 = arith.constant 128 : index
      %148 = vector.load %arg14[%c0_59, %c128_60] : memref<8x256xbf16, #tpu.memory_space<vmem>>, vector<8x128xbf16>
      tpu.vector_store %arg14[%c0_59, %c128_60], %147 {strides = array<i32>} : memref<8x256xbf16, #tpu.memory_space<vmem>>, vector<8x128xbf16>,
      %c0_61 = arith.constant 0 : index
      %c0_62 = arith.constant 0 : index
      %149 = vector.load %arg14[%c0_61, %c0_62] : memref<8x256xbf16, #tpu.memory_space<vmem>>, vector<8x256xbf16>
      %c0_63 = arith.constant 0 : index
      %c0_64 = arith.constant 0 : index
      %c0_65 = arith.constant 0 : index
      %150 = vector.load %arg9[%c0_63, %c0_64, %c0_65] : memref<1x256x512xbf16, #tpu.memory_space<vmem>>, vector<1x256x512xbf16>
      %151 = vector.shape_cast %150 : vector<1x256x512xbf16> to vector<256x512xbf16>
      %cst_66 = arith.constant dense<0.000000e+00> : vector<8x512xf32>
      %152 = tpu.matmul %149, %151, %cst_66 {dimension_numbers = #tpu.dot_dimension_numbers<[1], [0], [0], [1], [0, 0, 1, 1], [], []>} : vector<8x256xbf16>, vector<256x512xbf16>, vector<8x512xf32> -> vector<8x512xf32>
      %c0_67 = arith.constant 0 : index
      %c0_68 = arith.constant 0 : index
      %c0_69 = arith.constant 0 : index
      %153 = vector.load %arg10[%c0_67, %c0_68, %c0_69] : memref<1x1x512xf32, #tpu.memory_space<vmem>>, vector<1x1x512xf32>
      %154 = vector.shape_cast %153 : vector<1x1x512xf32> to vector<1x512xf32>
      %155 = vector.broadcast %154 : vector<1x512xf32> to vector<8x512xf32>
      %156 = arith.addf %152, %155 : vector<8x512xf32>
      %157 = vector.extract_strided_slice %156 {offsets = [0, 0], sizes = [8, 128], strides = [1, 1]} : vector<8x512xf32> to vector<8x128xf32>
      %158 = arith.negf %157 : vector<8x128xf32>
      %159 = math.exp %158 : vector<8x128xf32>
      %cst_70 = arith.constant 1.000000e+00 : f32
      %160 = vector.broadcast %cst_70 : f32 to vector<8x128xf32>
      %161 = arith.addf %160, %159 : vector<8x128xf32>
      %162 = arith.divf %160, %161 : vector<8x128xf32>
      %163 = vector.extract_strided_slice %156 {offsets = [0, 128], sizes = [8, 128], strides = [1, 1]} : vector<8x512xf32> to vector<8x128xf32>
      %164 = arith.negf %163 : vector<8x128xf32>
      %165 = math.exp %164 : vector<8x128xf32>
      %cst_71 = arith.constant 1.000000e+00 : f32
      %166 = vector.broadcast %cst_71 : f32 to vector<8x128xf32>
      %167 = arith.addf %166, %165 : vector<8x128xf32>
      %168 = arith.divf %166, %167 : vector<8x128xf32>
      %169 = vector.extract_strided_slice %156 {offsets = [0, 256], sizes = [8, 128], strides = [1, 1]} : vector<8x512xf32> to vector<8x128xf32>
      %170 = vector.extract_strided_slice %156 {offsets = [0, 384], sizes = [8, 128], strides = [1, 1]} : vector<8x512xf32> to vector<8x128xf32>
      %171 = arith.mulf %162, %170 : vector<8x128xf32>
      %172 = arith.addf %169, %171 : vector<8x128xf32>
      %173 = math.tanh %172 : vector<8x128xf32>
      %cst_72 = arith.constant 1.000000e+00 : f32
      %174 = vector.broadcast %cst_72 : f32 to vector<8x128xf32>
      %175 = arith.subf %174, %168 : vector<8x128xf32>
      %176 = arith.mulf %175, %173 : vector<8x128xf32>
      %177 = arith.mulf %168, %98 : vector<8x128xf32>
      %178 = arith.addf %176, %177 : vector<8x128xf32>
      %179 = vector.shape_cast %108 : vector<8x1xi1> to vector<8x1xi1>
      %180 = vector.broadcast %179 : vector<8x1xi1> to vector<8x128xi1>
      %181 = arith.select %180, %178, %98 : vector<8x128xi1>, vector<8x128xf32>
      %cst_73 = arith.constant 0.000000e+00 : f32
      %182 = vector.shape_cast %108 : vector<8x1xi1> to vector<8x1xi1>
      %183 = vector.broadcast %182 : vector<8x1xi1> to vector<8x128xi1>
      %184 = vector.broadcast %cst_73 : f32 to vector<8x128xf32>
      %185 = arith.select %183, %181, %184 : vector<8x128xi1>, vector<8x128xf32>
      %c1_74 = arith.constant 1 : index
      %c0_75 = arith.constant 0 : index
      %c0_76 = arith.constant 0 : index
      %186 = vector.load %arg11[%c1_74, %c0_75, %c0_76] : memref<8x8x128xf32, #tpu.memory_space<vmem>>, vector<1x8x128xf32>
      %187 = vector.shape_cast %186 : vector<1x8x128xf32> to vector<8x128xf32>
      %188 = vector.shape_cast %185 : vector<8x128xf32> to vector<1x8x128xf32>
      tpu.vector_store %arg11[%c1_74, %c0_75, %c0_76], %188 {strides = array<i32>} : memref<8x8x128xf32, #tpu.memory_space<vmem>>, vector<1x8x128xf32>,
      %c2_i32 = arith.constant 2 : i32
      %189 = arith.addi %0, %c2_i32 : i32
      %190 = vector.broadcast %189 : i32 to vector<8x1xi32>
      %191 = arith.cmpi slt, %190, %11 : vector<8x1xi32>
      %192 = arith.truncf %144 : vector<8x128xf32> to vector<8x128xbf16>
      %c0_77 = arith.constant 0 : index
      %c0_78 = arith.constant 0 : index
      %193 = vector.load %arg7[%c0_77, %c0_78] : memref<128x384xbf16, #tpu.memory_space<vmem>>, vector<128x384xbf16>
      %cst_79 = arith.constant dense<0.000000e+00> : vector<8x384xf32>
      %194 = tpu.matmul %192, %193, %cst_79 {dimension_numbers = #tpu.dot_dimension_numbers<[1], [0], [0], [1], [0, 0, 1, 1], [], []>} : vector<8x128xbf16>, vector<128x384xbf16>, vector<8x384xf32> -> vector<8x384xf32>
      %c16 = arith.constant 16 : index
      %c0_80 = arith.constant 0 : index
      %195 = vector.load %arg13[%c16, %c0_80] : memref<64x384xf32, #tpu.memory_space<vmem>>, vector<8x384xf32>
      %196 = vector.extract_strided_slice %195 {offsets = [0, 0], sizes = [8, 128], strides = [1, 1]} : vector<8x384xf32> to vector<8x128xf32>
      %197 = vector.extract_strided_slice %194 {offsets = [0, 0], sizes = [8, 128], strides = [1, 1]} : vector<8x384xf32> to vector<8x128xf32>
      %198 = arith.addf %196, %197 : vector<8x128xf32>
      %199 = arith.negf %198 : vector<8x128xf32>
      %200 = math.exp %199 : vector<8x128xf32>
      %cst_81 = arith.constant 1.000000e+00 : f32
      %201 = vector.broadcast %cst_81 : f32 to vector<8x128xf32>
      %202 = arith.addf %201, %200 : vector<8x128xf32>
      %203 = arith.divf %201, %202 : vector<8x128xf32>
      %204 = vector.extract_strided_slice %195 {offsets = [0, 128], sizes = [8, 128], strides = [1, 1]} : vector<8x384xf32> to vector<8x128xf32>
      %205 = vector.extract_strided_slice %194 {offsets = [0, 128], sizes = [8, 128], strides = [1, 1]} : vector<8x384xf32> to vector<8x128xf32>
      %206 = arith.addf %204, %205 : vector<8x128xf32>
      %207 = arith.negf %206 : vector<8x128xf32>
      %208 = math.exp %207 : vector<8x128xf32>
      %cst_82 = arith.constant 1.000000e+00 : f32
      %209 = vector.broadcast %cst_82 : f32 to vector<8x128xf32>
      %210 = arith.addf %209, %208 : vector<8x128xf32>
      %211 = arith.divf %209, %210 : vector<8x128xf32>
      %212 = vector.extract_strided_slice %195 {offsets = [0, 256], sizes = [8, 128], strides = [1, 1]} : vector<8x384xf32> to vector<8x128xf32>
      %213 = vector.extract_strided_slice %194 {offsets = [0, 256], sizes = [8, 128], strides = [1, 1]} : vector<8x384xf32> to vector<8x128xf32>
      %c0_83 = arith.constant 0 : index
      %c0_84 = arith.constant 0 : index
      %214 = vector.load %arg8[%c0_83, %c0_84] : memref<1x128xf32, #tpu.memory_space<vmem>>, vector<1x128xf32>
      %215 = vector.broadcast %214 : vector<1x128xf32> to vector<8x128xf32>
      %216 = arith.addf %213, %215 : vector<8x128xf32>
      %217 = arith.mulf %203, %216 : vector<8x128xf32>
      %218 = arith.addf %212, %217 : vector<8x128xf32>
      %219 = math.tanh %218 : vector<8x128xf32>
      %cst_85 = arith.constant 1.000000e+00 : f32
      %220 = vector.broadcast %cst_85 : f32 to vector<8x128xf32>
      %221 = arith.subf %220, %211 : vector<8x128xf32>
      %222 = arith.mulf %221, %219 : vector<8x128xf32>
      %223 = arith.mulf %211, %144 : vector<8x128xf32>
      %224 = arith.addf %222, %223 : vector<8x128xf32>
      %225 = vector.shape_cast %191 : vector<8x1xi1> to vector<8x1xi1>
      %226 = vector.broadcast %225 : vector<8x1xi1> to vector<8x128xi1>
      %227 = arith.select %226, %224, %144 : vector<8x128xi1>, vector<8x128xf32>
      %228 = arith.truncf %227 : vector<8x128xf32> to vector<8x128xbf16>
      %c0_86 = arith.constant 0 : index
      %c0_87 = arith.constant 0 : index
      %229 = vector.load %arg14[%c0_86, %c0_87] : memref<8x256xbf16, #tpu.memory_space<vmem>>, vector<8x128xbf16>
      tpu.vector_store %arg14[%c0_86, %c0_87], %228 {strides = array<i32>} : memref<8x256xbf16, #tpu.memory_space<vmem>>, vector<8x128xbf16>,
      %230 = arith.truncf %181 : vector<8x128xf32> to vector<8x128xbf16>
      %c0_88 = arith.constant 0 : index
      %c128_89 = arith.constant 128 : index
      %231 = vector.load %arg14[%c0_88, %c128_89] : memref<8x256xbf16, #tpu.memory_space<vmem>>, vector<8x128xbf16>
      tpu.vector_store %arg14[%c0_88, %c128_89], %230 {strides = array<i32>} : memref<8x256xbf16, #tpu.memory_space<vmem>>, vector<8x128xbf16>,
      %c0_90 = arith.constant 0 : index
      %c0_91 = arith.constant 0 : index
      %232 = vector.load %arg14[%c0_90, %c0_91] : memref<8x256xbf16, #tpu.memory_space<vmem>>, vector<8x256xbf16>
      %c0_92 = arith.constant 0 : index
      %c0_93 = arith.constant 0 : index
      %c0_94 = arith.constant 0 : index
      %233 = vector.load %arg9[%c0_92, %c0_93, %c0_94] : memref<1x256x512xbf16, #tpu.memory_space<vmem>>, vector<1x256x512xbf16>
      %234 = vector.shape_cast %233 : vector<1x256x512xbf16> to vector<256x512xbf16>
      %cst_95 = arith.constant dense<0.000000e+00> : vector<8x512xf32>
      %235 = tpu.matmul %232, %234, %cst_95 {dimension_numbers = #tpu.dot_dimension_numbers<[1], [0], [0], [1], [0, 0, 1, 1], [], []>} : vector<8x256xbf16>, vector<256x512xbf16>, vector<8x512xf32> -> vector<8x512xf32>
      %c0_96 = arith.constant 0 : index
      %c0_97 = arith.constant 0 : index
      %c0_98 = arith.constant 0 : index
      %236 = vector.load %arg10[%c0_96, %c0_97, %c0_98] : memref<1x1x512xf32, #tpu.memory_space<vmem>>, vector<1x1x512xf32>
      %237 = vector.shape_cast %236 : vector<1x1x512xf32> to vector<1x512xf32>
      %238 = vector.broadcast %237 : vector<1x512xf32> to vector<8x512xf32>
      %239 = arith.addf %235, %238 : vector<8x512xf32>
      %240 = vector.extract_strided_slice %239 {offsets = [0, 0], sizes = [8, 128], strides = [1, 1]} : vector<8x512xf32> to vector<8x128xf32>
      %241 = arith.negf %240 : vector<8x128xf32>
      %242 = math.exp %241 : vector<8x128xf32>
      %cst_99 = arith.constant 1.000000e+00 : f32
      %243 = vector.broadcast %cst_99 : f32 to vector<8x128xf32>
      %244 = arith.addf %243, %242 : vector<8x128xf32>
      %245 = arith.divf %243, %244 : vector<8x128xf32>
      %246 = vector.extract_strided_slice %239 {offsets = [0, 128], sizes = [8, 128], strides = [1, 1]} : vector<8x512xf32> to vector<8x128xf32>
      %247 = arith.negf %246 : vector<8x128xf32>
      %248 = math.exp %247 : vector<8x128xf32>
      %cst_100 = arith.constant 1.000000e+00 : f32
      %249 = vector.broadcast %cst_100 : f32 to vector<8x128xf32>
      %250 = arith.addf %249, %248 : vector<8x128xf32>
      %251 = arith.divf %249, %250 : vector<8x128xf32>
      %252 = vector.extract_strided_slice %239 {offsets = [0, 256], sizes = [8, 128], strides = [1, 1]} : vector<8x512xf32> to vector<8x128xf32>
      %253 = vector.extract_strided_slice %239 {offsets = [0, 384], sizes = [8, 128], strides = [1, 1]} : vector<8x512xf32> to vector<8x128xf32>
      %254 = arith.mulf %245, %253 : vector<8x128xf32>
      %255 = arith.addf %252, %254 : vector<8x128xf32>
      %256 = math.tanh %255 : vector<8x128xf32>
      %cst_101 = arith.constant 1.000000e+00 : f32
      %257 = vector.broadcast %cst_101 : f32 to vector<8x128xf32>
      %258 = arith.subf %257, %251 : vector<8x128xf32>
      %259 = arith.mulf %258, %256 : vector<8x128xf32>
      %260 = arith.mulf %251, %181 : vector<8x128xf32>
      %261 = arith.addf %259, %260 : vector<8x128xf32>
      %262 = vector.shape_cast %191 : vector<8x1xi1> to vector<8x1xi1>
      %263 = vector.broadcast %262 : vector<8x1xi1> to vector<8x128xi1>
      %264 = arith.select %263, %261, %181 : vector<8x128xi1>, vector<8x128xf32>
      %cst_102 = arith.constant 0.000000e+00 : f32
      %265 = vector.shape_cast %191 : vector<8x1xi1> to vector<8x1xi1>
      %266 = vector.broadcast %265 : vector<8x1xi1> to vector<8x128xi1>
      %267 = vector.broadcast %cst_102 : f32 to vector<8x128xf32>
      %268 = arith.select %266, %264, %267 : vector<8x128xi1>, vector<8x128xf32>
      %c2 = arith.constant 2 : index
      %c0_103 = arith.constant 0 : index
      %c0_104 = arith.constant 0 : index
      %269 = vector.load %arg11[%c2, %c0_103, %c0_104] : memref<8x8x128xf32, #tpu.memory_space<vmem>>, vector<1x8x128xf32>
      %270 = vector.shape_cast %269 : vector<1x8x128xf32> to vector<8x128xf32>
      %271 = vector.shape_cast %268 : vector<8x128xf32> to vector<1x8x128xf32>
      tpu.vector_store %arg11[%c2, %c0_103, %c0_104], %271 {strides = array<i32>} : memref<8x8x128xf32, #tpu.memory_space<vmem>>, vector<1x8x128xf32>,
      %c3_i32 = arith.constant 3 : i32
      %272 = arith.addi %0, %c3_i32 : i32
      %273 = vector.broadcast %272 : i32 to vector<8x1xi32>
      %274 = arith.cmpi slt, %273, %11 : vector<8x1xi32>
      %275 = arith.truncf %227 : vector<8x128xf32> to vector<8x128xbf16>
      %c0_105 = arith.constant 0 : index
      %c0_106 = arith.constant 0 : index
      %276 = vector.load %arg7[%c0_105, %c0_106] : memref<128x384xbf16, #tpu.memory_space<vmem>>, vector<128x384xbf16>
      %cst_107 = arith.constant dense<0.000000e+00> : vector<8x384xf32>
      %277 = tpu.matmul %275, %276, %cst_107 {dimension_numbers = #tpu.dot_dimension_numbers<[1], [0], [0], [1], [0, 0, 1, 1], [], []>} : vector<8x128xbf16>, vector<128x384xbf16>, vector<8x384xf32> -> vector<8x384xf32>
      %c24 = arith.constant 24 : index
      %c0_108 = arith.constant 0 : index
      %278 = vector.load %arg13[%c24, %c0_108] : memref<64x384xf32, #tpu.memory_space<vmem>>, vector<8x384xf32>
      %279 = vector.extract_strided_slice %278 {offsets = [0, 0], sizes = [8, 128], strides = [1, 1]} : vector<8x384xf32> to vector<8x128xf32>
      %280 = vector.extract_strided_slice %277 {offsets = [0, 0], sizes = [8, 128], strides = [1, 1]} : vector<8x384xf32> to vector<8x128xf32>
      %281 = arith.addf %279, %280 : vector<8x128xf32>
      %282 = arith.negf %281 : vector<8x128xf32>
      %283 = math.exp %282 : vector<8x128xf32>
      %cst_109 = arith.constant 1.000000e+00 : f32
      %284 = vector.broadcast %cst_109 : f32 to vector<8x128xf32>
      %285 = arith.addf %284, %283 : vector<8x128xf32>
      %286 = arith.divf %284, %285 : vector<8x128xf32>
      %287 = vector.extract_strided_slice %278 {offsets = [0, 128], sizes = [8, 128], strides = [1, 1]} : vector<8x384xf32> to vector<8x128xf32>
      %288 = vector.extract_strided_slice %277 {offsets = [0, 128], sizes = [8, 128], strides = [1, 1]} : vector<8x384xf32> to vector<8x128xf32>
      %289 = arith.addf %287, %288 : vector<8x128xf32>
      %290 = arith.negf %289 : vector<8x128xf32>
      %291 = math.exp %290 : vector<8x128xf32>
      %cst_110 = arith.constant 1.000000e+00 : f32
      %292 = vector.broadcast %cst_110 : f32 to vector<8x128xf32>
      %293 = arith.addf %292, %291 : vector<8x128xf32>
      %294 = arith.divf %292, %293 : vector<8x128xf32>
      %295 = vector.extract_strided_slice %278 {offsets = [0, 256], sizes = [8, 128], strides = [1, 1]} : vector<8x384xf32> to vector<8x128xf32>
      %296 = vector.extract_strided_slice %277 {offsets = [0, 256], sizes = [8, 128], strides = [1, 1]} : vector<8x384xf32> to vector<8x128xf32>
      %c0_111 = arith.constant 0 : index
      %c0_112 = arith.constant 0 : index
      %297 = vector.load %arg8[%c0_111, %c0_112] : memref<1x128xf32, #tpu.memory_space<vmem>>, vector<1x128xf32>
      %298 = vector.broadcast %297 : vector<1x128xf32> to vector<8x128xf32>
      %299 = arith.addf %296, %298 : vector<8x128xf32>
      %300 = arith.mulf %286, %299 : vector<8x128xf32>
      %301 = arith.addf %295, %300 : vector<8x128xf32>
      %302 = math.tanh %301 : vector<8x128xf32>
      %cst_113 = arith.constant 1.000000e+00 : f32
      %303 = vector.broadcast %cst_113 : f32 to vector<8x128xf32>
      %304 = arith.subf %303, %294 : vector<8x128xf32>
      %305 = arith.mulf %304, %302 : vector<8x128xf32>
      %306 = arith.mulf %294, %227 : vector<8x128xf32>
      %307 = arith.addf %305, %306 : vector<8x128xf32>
      %308 = vector.shape_cast %274 : vector<8x1xi1> to vector<8x1xi1>
      %309 = vector.broadcast %308 : vector<8x1xi1> to vector<8x128xi1>
      %310 = arith.select %309, %307, %227 : vector<8x128xi1>, vector<8x128xf32>
      %311 = arith.truncf %310 : vector<8x128xf32> to vector<8x128xbf16>
      %c0_114 = arith.constant 0 : index
      %c0_115 = arith.constant 0 : index
      %312 = vector.load %arg14[%c0_114, %c0_115] : memref<8x256xbf16, #tpu.memory_space<vmem>>, vector<8x128xbf16>
      tpu.vector_store %arg14[%c0_114, %c0_115], %311 {strides = array<i32>} : memref<8x256xbf16, #tpu.memory_space<vmem>>, vector<8x128xbf16>,
      %313 = arith.truncf %264 : vector<8x128xf32> to vector<8x128xbf16>
      %c0_116 = arith.constant 0 : index
      %c128_117 = arith.constant 128 : index
      %314 = vector.load %arg14[%c0_116, %c128_117] : memref<8x256xbf16, #tpu.memory_space<vmem>>, vector<8x128xbf16>
      tpu.vector_store %arg14[%c0_116, %c128_117], %313 {strides = array<i32>} : memref<8x256xbf16, #tpu.memory_space<vmem>>, vector<8x128xbf16>,
      %c0_118 = arith.constant 0 : index
      %c0_119 = arith.constant 0 : index
      %315 = vector.load %arg14[%c0_118, %c0_119] : memref<8x256xbf16, #tpu.memory_space<vmem>>, vector<8x256xbf16>
      %c0_120 = arith.constant 0 : index
      %c0_121 = arith.constant 0 : index
      %c0_122 = arith.constant 0 : index
      %316 = vector.load %arg9[%c0_120, %c0_121, %c0_122] : memref<1x256x512xbf16, #tpu.memory_space<vmem>>, vector<1x256x512xbf16>
      %317 = vector.shape_cast %316 : vector<1x256x512xbf16> to vector<256x512xbf16>
      %cst_123 = arith.constant dense<0.000000e+00> : vector<8x512xf32>
      %318 = tpu.matmul %315, %317, %cst_123 {dimension_numbers = #tpu.dot_dimension_numbers<[1], [0], [0], [1], [0, 0, 1, 1], [], []>} : vector<8x256xbf16>, vector<256x512xbf16>, vector<8x512xf32> -> vector<8x512xf32>
      %c0_124 = arith.constant 0 : index
      %c0_125 = arith.constant 0 : index
      %c0_126 = arith.constant 0 : index
      %319 = vector.load %arg10[%c0_124, %c0_125, %c0_126] : memref<1x1x512xf32, #tpu.memory_space<vmem>>, vector<1x1x512xf32>
      %320 = vector.shape_cast %319 : vector<1x1x512xf32> to vector<1x512xf32>
      %321 = vector.broadcast %320 : vector<1x512xf32> to vector<8x512xf32>
      %322 = arith.addf %318, %321 : vector<8x512xf32>
      %323 = vector.extract_strided_slice %322 {offsets = [0, 0], sizes = [8, 128], strides = [1, 1]} : vector<8x512xf32> to vector<8x128xf32>
      %324 = arith.negf %323 : vector<8x128xf32>
      %325 = math.exp %324 : vector<8x128xf32>
      %cst_127 = arith.constant 1.000000e+00 : f32
      %326 = vector.broadcast %cst_127 : f32 to vector<8x128xf32>
      %327 = arith.addf %326, %325 : vector<8x128xf32>
      %328 = arith.divf %326, %327 : vector<8x128xf32>
      %329 = vector.extract_strided_slice %322 {offsets = [0, 128], sizes = [8, 128], strides = [1, 1]} : vector<8x512xf32> to vector<8x128xf32>
      %330 = arith.negf %329 : vector<8x128xf32>
      %331 = math.exp %330 : vector<8x128xf32>
      %cst_128 = arith.constant 1.000000e+00 : f32
      %332 = vector.broadcast %cst_128 : f32 to vector<8x128xf32>
      %333 = arith.addf %332, %331 : vector<8x128xf32>
      %334 = arith.divf %332, %333 : vector<8x128xf32>
      %335 = vector.extract_strided_slice %322 {offsets = [0, 256], sizes = [8, 128], strides = [1, 1]} : vector<8x512xf32> to vector<8x128xf32>
      %336 = vector.extract_strided_slice %322 {offsets = [0, 384], sizes = [8, 128], strides = [1, 1]} : vector<8x512xf32> to vector<8x128xf32>
      %337 = arith.mulf %328, %336 : vector<8x128xf32>
      %338 = arith.addf %335, %337 : vector<8x128xf32>
      %339 = math.tanh %338 : vector<8x128xf32>
      %cst_129 = arith.constant 1.000000e+00 : f32
      %340 = vector.broadcast %cst_129 : f32 to vector<8x128xf32>
      %341 = arith.subf %340, %334 : vector<8x128xf32>
      %342 = arith.mulf %341, %339 : vector<8x128xf32>
      %343 = arith.mulf %334, %264 : vector<8x128xf32>
      %344 = arith.addf %342, %343 : vector<8x128xf32>
      %345 = vector.shape_cast %274 : vector<8x1xi1> to vector<8x1xi1>
      %346 = vector.broadcast %345 : vector<8x1xi1> to vector<8x128xi1>
      %347 = arith.select %346, %344, %264 : vector<8x128xi1>, vector<8x128xf32>
      %cst_130 = arith.constant 0.000000e+00 : f32
      %348 = vector.shape_cast %274 : vector<8x1xi1> to vector<8x1xi1>
      %349 = vector.broadcast %348 : vector<8x1xi1> to vector<8x128xi1>
      %350 = vector.broadcast %cst_130 : f32 to vector<8x128xf32>
      %351 = arith.select %349, %347, %350 : vector<8x128xi1>, vector<8x128xf32>
      %c3 = arith.constant 3 : index
      %c0_131 = arith.constant 0 : index
      %c0_132 = arith.constant 0 : index
      %352 = vector.load %arg11[%c3, %c0_131, %c0_132] : memref<8x8x128xf32, #tpu.memory_space<vmem>>, vector<1x8x128xf32>
      %353 = vector.shape_cast %352 : vector<1x8x128xf32> to vector<8x128xf32>
      %354 = vector.shape_cast %351 : vector<8x128xf32> to vector<1x8x128xf32>
      tpu.vector_store %arg11[%c3, %c0_131, %c0_132], %354 {strides = array<i32>} : memref<8x8x128xf32, #tpu.memory_space<vmem>>, vector<1x8x128xf32>,
      %c4_i32 = arith.constant 4 : i32
      %355 = arith.addi %0, %c4_i32 : i32
      %356 = vector.broadcast %355 : i32 to vector<8x1xi32>
      %357 = arith.cmpi slt, %356, %11 : vector<8x1xi32>
      %358 = arith.truncf %310 : vector<8x128xf32> to vector<8x128xbf16>
      %c0_133 = arith.constant 0 : index
      %c0_134 = arith.constant 0 : index
      %359 = vector.load %arg7[%c0_133, %c0_134] : memref<128x384xbf16, #tpu.memory_space<vmem>>, vector<128x384xbf16>
      %cst_135 = arith.constant dense<0.000000e+00> : vector<8x384xf32>
      %360 = tpu.matmul %358, %359, %cst_135 {dimension_numbers = #tpu.dot_dimension_numbers<[1], [0], [0], [1], [0, 0, 1, 1], [], []>} : vector<8x128xbf16>, vector<128x384xbf16>, vector<8x384xf32> -> vector<8x384xf32>
      %c32 = arith.constant 32 : index
      %c0_136 = arith.constant 0 : index
      %361 = vector.load %arg13[%c32, %c0_136] : memref<64x384xf32, #tpu.memory_space<vmem>>, vector<8x384xf32>
      %362 = vector.extract_strided_slice %361 {offsets = [0, 0], sizes = [8, 128], strides = [1, 1]} : vector<8x384xf32> to vector<8x128xf32>
      %363 = vector.extract_strided_slice %360 {offsets = [0, 0], sizes = [8, 128], strides = [1, 1]} : vector<8x384xf32> to vector<8x128xf32>
      %364 = arith.addf %362, %363 : vector<8x128xf32>
      %365 = arith.negf %364 : vector<8x128xf32>
      %366 = math.exp %365 : vector<8x128xf32>
      %cst_137 = arith.constant 1.000000e+00 : f32
      %367 = vector.broadcast %cst_137 : f32 to vector<8x128xf32>
      %368 = arith.addf %367, %366 : vector<8x128xf32>
      %369 = arith.divf %367, %368 : vector<8x128xf32>
      %370 = vector.extract_strided_slice %361 {offsets = [0, 128], sizes = [8, 128], strides = [1, 1]} : vector<8x384xf32> to vector<8x128xf32>
      %371 = vector.extract_strided_slice %360 {offsets = [0, 128], sizes = [8, 128], strides = [1, 1]} : vector<8x384xf32> to vector<8x128xf32>
      %372 = arith.addf %370, %371 : vector<8x128xf32>
      %373 = arith.negf %372 : vector<8x128xf32>
      %374 = math.exp %373 : vector<8x128xf32>
      %cst_138 = arith.constant 1.000000e+00 : f32
      %375 = vector.broadcast %cst_138 : f32 to vector<8x128xf32>
      %376 = arith.addf %375, %374 : vector<8x128xf32>
      %377 = arith.divf %375, %376 : vector<8x128xf32>
      %378 = vector.extract_strided_slice %361 {offsets = [0, 256], sizes = [8, 128], strides = [1, 1]} : vector<8x384xf32> to vector<8x128xf32>
      %379 = vector.extract_strided_slice %360 {offsets = [0, 256], sizes = [8, 128], strides = [1, 1]} : vector<8x384xf32> to vector<8x128xf32>
      %c0_139 = arith.constant 0 : index
      %c0_140 = arith.constant 0 : index
      %380 = vector.load %arg8[%c0_139, %c0_140] : memref<1x128xf32, #tpu.memory_space<vmem>>, vector<1x128xf32>
      %381 = vector.broadcast %380 : vector<1x128xf32> to vector<8x128xf32>
      %382 = arith.addf %379, %381 : vector<8x128xf32>
      %383 = arith.mulf %369, %382 : vector<8x128xf32>
      %384 = arith.addf %378, %383 : vector<8x128xf32>
      %385 = math.tanh %384 : vector<8x128xf32>
      %cst_141 = arith.constant 1.000000e+00 : f32
      %386 = vector.broadcast %cst_141 : f32 to vector<8x128xf32>
      %387 = arith.subf %386, %377 : vector<8x128xf32>
      %388 = arith.mulf %387, %385 : vector<8x128xf32>
      %389 = arith.mulf %377, %310 : vector<8x128xf32>
      %390 = arith.addf %388, %389 : vector<8x128xf32>
      %391 = vector.shape_cast %357 : vector<8x1xi1> to vector<8x1xi1>
      %392 = vector.broadcast %391 : vector<8x1xi1> to vector<8x128xi1>
      %393 = arith.select %392, %390, %310 : vector<8x128xi1>, vector<8x128xf32>
      %394 = arith.truncf %393 : vector<8x128xf32> to vector<8x128xbf16>
      %c0_142 = arith.constant 0 : index
      %c0_143 = arith.constant 0 : index
      %395 = vector.load %arg14[%c0_142, %c0_143] : memref<8x256xbf16, #tpu.memory_space<vmem>>, vector<8x128xbf16>
      tpu.vector_store %arg14[%c0_142, %c0_143], %394 {strides = array<i32>} : memref<8x256xbf16, #tpu.memory_space<vmem>>, vector<8x128xbf16>,
      %396 = arith.truncf %347 : vector<8x128xf32> to vector<8x128xbf16>
      %c0_144 = arith.constant 0 : index
      %c128_145 = arith.constant 128 : index
      %397 = vector.load %arg14[%c0_144, %c128_145] : memref<8x256xbf16, #tpu.memory_space<vmem>>, vector<8x128xbf16>
      tpu.vector_store %arg14[%c0_144, %c128_145], %396 {strides = array<i32>} : memref<8x256xbf16, #tpu.memory_space<vmem>>, vector<8x128xbf16>,
      %c0_146 = arith.constant 0 : index
      %c0_147 = arith.constant 0 : index
      %398 = vector.load %arg14[%c0_146, %c0_147] : memref<8x256xbf16, #tpu.memory_space<vmem>>, vector<8x256xbf16>
      %c0_148 = arith.constant 0 : index
      %c0_149 = arith.constant 0 : index
      %c0_150 = arith.constant 0 : index
      %399 = vector.load %arg9[%c0_148, %c0_149, %c0_150] : memref<1x256x512xbf16, #tpu.memory_space<vmem>>, vector<1x256x512xbf16>
      %400 = vector.shape_cast %399 : vector<1x256x512xbf16> to vector<256x512xbf16>
      %cst_151 = arith.constant dense<0.000000e+00> : vector<8x512xf32>
      %401 = tpu.matmul %398, %400, %cst_151 {dimension_numbers = #tpu.dot_dimension_numbers<[1], [0], [0], [1], [0, 0, 1, 1], [], []>} : vector<8x256xbf16>, vector<256x512xbf16>, vector<8x512xf32> -> vector<8x512xf32>
      %c0_152 = arith.constant 0 : index
      %c0_153 = arith.constant 0 : index
      %c0_154 = arith.constant 0 : index
      %402 = vector.load %arg10[%c0_152, %c0_153, %c0_154] : memref<1x1x512xf32, #tpu.memory_space<vmem>>, vector<1x1x512xf32>
      %403 = vector.shape_cast %402 : vector<1x1x512xf32> to vector<1x512xf32>
      %404 = vector.broadcast %403 : vector<1x512xf32> to vector<8x512xf32>
      %405 = arith.addf %401, %404 : vector<8x512xf32>
      %406 = vector.extract_strided_slice %405 {offsets = [0, 0], sizes = [8, 128], strides = [1, 1]} : vector<8x512xf32> to vector<8x128xf32>
      %407 = arith.negf %406 : vector<8x128xf32>
      %408 = math.exp %407 : vector<8x128xf32>
      %cst_155 = arith.constant 1.000000e+00 : f32
      %409 = vector.broadcast %cst_155 : f32 to vector<8x128xf32>
      %410 = arith.addf %409, %408 : vector<8x128xf32>
      %411 = arith.divf %409, %410 : vector<8x128xf32>
      %412 = vector.extract_strided_slice %405 {offsets = [0, 128], sizes = [8, 128], strides = [1, 1]} : vector<8x512xf32> to vector<8x128xf32>
      %413 = arith.negf %412 : vector<8x128xf32>
      %414 = math.exp %413 : vector<8x128xf32>
      %cst_156 = arith.constant 1.000000e+00 : f32
      %415 = vector.broadcast %cst_156 : f32 to vector<8x128xf32>
      %416 = arith.addf %415, %414 : vector<8x128xf32>
      %417 = arith.divf %415, %416 : vector<8x128xf32>
      %418 = vector.extract_strided_slice %405 {offsets = [0, 256], sizes = [8, 128], strides = [1, 1]} : vector<8x512xf32> to vector<8x128xf32>
      %419 = vector.extract_strided_slice %405 {offsets = [0, 384], sizes = [8, 128], strides = [1, 1]} : vector<8x512xf32> to vector<8x128xf32>
      %420 = arith.mulf %411, %419 : vector<8x128xf32>
      %421 = arith.addf %418, %420 : vector<8x128xf32>
      %422 = math.tanh %421 : vector<8x128xf32>
      %cst_157 = arith.constant 1.000000e+00 : f32
      %423 = vector.broadcast %cst_157 : f32 to vector<8x128xf32>
      %424 = arith.subf %423, %417 : vector<8x128xf32>
      %425 = arith.mulf %424, %422 : vector<8x128xf32>
      %426 = arith.mulf %417, %347 : vector<8x128xf32>
      %427 = arith.addf %425, %426 : vector<8x128xf32>
      %428 = vector.shape_cast %357 : vector<8x1xi1> to vector<8x1xi1>
      %429 = vector.broadcast %428 : vector<8x1xi1> to vector<8x128xi1>
      %430 = arith.select %429, %427, %347 : vector<8x128xi1>, vector<8x128xf32>
      %cst_158 = arith.constant 0.000000e+00 : f32
      %431 = vector.shape_cast %357 : vector<8x1xi1> to vector<8x1xi1>
      %432 = vector.broadcast %431 : vector<8x1xi1> to vector<8x128xi1>
      %433 = vector.broadcast %cst_158 : f32 to vector<8x128xf32>
      %434 = arith.select %432, %430, %433 : vector<8x128xi1>, vector<8x128xf32>
      %c4 = arith.constant 4 : index
      %c0_159 = arith.constant 0 : index
      %c0_160 = arith.constant 0 : index
      %435 = vector.load %arg11[%c4, %c0_159, %c0_160] : memref<8x8x128xf32, #tpu.memory_space<vmem>>, vector<1x8x128xf32>
      %436 = vector.shape_cast %435 : vector<1x8x128xf32> to vector<8x128xf32>
      %437 = vector.shape_cast %434 : vector<8x128xf32> to vector<1x8x128xf32>
      tpu.vector_store %arg11[%c4, %c0_159, %c0_160], %437 {strides = array<i32>} : memref<8x8x128xf32, #tpu.memory_space<vmem>>, vector<1x8x128xf32>,
      %c5_i32 = arith.constant 5 : i32
      %438 = arith.addi %0, %c5_i32 : i32
      %439 = vector.broadcast %438 : i32 to vector<8x1xi32>
      %440 = arith.cmpi slt, %439, %11 : vector<8x1xi32>
      %441 = arith.truncf %393 : vector<8x128xf32> to vector<8x128xbf16>
      %c0_161 = arith.constant 0 : index
      %c0_162 = arith.constant 0 : index
      %442 = vector.load %arg7[%c0_161, %c0_162] : memref<128x384xbf16, #tpu.memory_space<vmem>>, vector<128x384xbf16>
      %cst_163 = arith.constant dense<0.000000e+00> : vector<8x384xf32>
      %443 = tpu.matmul %441, %442, %cst_163 {dimension_numbers = #tpu.dot_dimension_numbers<[1], [0], [0], [1], [0, 0, 1, 1], [], []>} : vector<8x128xbf16>, vector<128x384xbf16>, vector<8x384xf32> -> vector<8x384xf32>
      %c40 = arith.constant 40 : index
      %c0_164 = arith.constant 0 : index
      %444 = vector.load %arg13[%c40, %c0_164] : memref<64x384xf32, #tpu.memory_space<vmem>>, vector<8x384xf32>
      %445 = vector.extract_strided_slice %444 {offsets = [0, 0], sizes = [8, 128], strides = [1, 1]} : vector<8x384xf32> to vector<8x128xf32>
      %446 = vector.extract_strided_slice %443 {offsets = [0, 0], sizes = [8, 128], strides = [1, 1]} : vector<8x384xf32> to vector<8x128xf32>
      %447 = arith.addf %445, %446 : vector<8x128xf32>
      %448 = arith.negf %447 : vector<8x128xf32>
      %449 = math.exp %448 : vector<8x128xf32>
      %cst_165 = arith.constant 1.000000e+00 : f32
      %450 = vector.broadcast %cst_165 : f32 to vector<8x128xf32>
      %451 = arith.addf %450, %449 : vector<8x128xf32>
      %452 = arith.divf %450, %451 : vector<8x128xf32>
      %453 = vector.extract_strided_slice %444 {offsets = [0, 128], sizes = [8, 128], strides = [1, 1]} : vector<8x384xf32> to vector<8x128xf32>
      %454 = vector.extract_strided_slice %443 {offsets = [0, 128], sizes = [8, 128], strides = [1, 1]} : vector<8x384xf32> to vector<8x128xf32>
      %455 = arith.addf %453, %454 : vector<8x128xf32>
      %456 = arith.negf %455 : vector<8x128xf32>
      %457 = math.exp %456 : vector<8x128xf32>
      %cst_166 = arith.constant 1.000000e+00 : f32
      %458 = vector.broadcast %cst_166 : f32 to vector<8x128xf32>
      %459 = arith.addf %458, %457 : vector<8x128xf32>
      %460 = arith.divf %458, %459 : vector<8x128xf32>
      %461 = vector.extract_strided_slice %444 {offsets = [0, 256], sizes = [8, 128], strides = [1, 1]} : vector<8x384xf32> to vector<8x128xf32>
      %462 = vector.extract_strided_slice %443 {offsets = [0, 256], sizes = [8, 128], strides = [1, 1]} : vector<8x384xf32> to vector<8x128xf32>
      %c0_167 = arith.constant 0 : index
      %c0_168 = arith.constant 0 : index
      %463 = vector.load %arg8[%c0_167, %c0_168] : memref<1x128xf32, #tpu.memory_space<vmem>>, vector<1x128xf32>
      %464 = vector.broadcast %463 : vector<1x128xf32> to vector<8x128xf32>
      %465 = arith.addf %462, %464 : vector<8x128xf32>
      %466 = arith.mulf %452, %465 : vector<8x128xf32>
      %467 = arith.addf %461, %466 : vector<8x128xf32>
      %468 = math.tanh %467 : vector<8x128xf32>
      %cst_169 = arith.constant 1.000000e+00 : f32
      %469 = vector.broadcast %cst_169 : f32 to vector<8x128xf32>
      %470 = arith.subf %469, %460 : vector<8x128xf32>
      %471 = arith.mulf %470, %468 : vector<8x128xf32>
      %472 = arith.mulf %460, %393 : vector<8x128xf32>
      %473 = arith.addf %471, %472 : vector<8x128xf32>
      %474 = vector.shape_cast %440 : vector<8x1xi1> to vector<8x1xi1>
      %475 = vector.broadcast %474 : vector<8x1xi1> to vector<8x128xi1>
      %476 = arith.select %475, %473, %393 : vector<8x128xi1>, vector<8x128xf32>
      %477 = arith.truncf %476 : vector<8x128xf32> to vector<8x128xbf16>
      %c0_170 = arith.constant 0 : index
      %c0_171 = arith.constant 0 : index
      %478 = vector.load %arg14[%c0_170, %c0_171] : memref<8x256xbf16, #tpu.memory_space<vmem>>, vector<8x128xbf16>
      tpu.vector_store %arg14[%c0_170, %c0_171], %477 {strides = array<i32>} : memref<8x256xbf16, #tpu.memory_space<vmem>>, vector<8x128xbf16>,
      %479 = arith.truncf %430 : vector<8x128xf32> to vector<8x128xbf16>
      %c0_172 = arith.constant 0 : index
      %c128_173 = arith.constant 128 : index
      %480 = vector.load %arg14[%c0_172, %c128_173] : memref<8x256xbf16, #tpu.memory_space<vmem>>, vector<8x128xbf16>
      tpu.vector_store %arg14[%c0_172, %c128_173], %479 {strides = array<i32>} : memref<8x256xbf16, #tpu.memory_space<vmem>>, vector<8x128xbf16>,
      %c0_174 = arith.constant 0 : index
      %c0_175 = arith.constant 0 : index
      %481 = vector.load %arg14[%c0_174, %c0_175] : memref<8x256xbf16, #tpu.memory_space<vmem>>, vector<8x256xbf16>
      %c0_176 = arith.constant 0 : index
      %c0_177 = arith.constant 0 : index
      %c0_178 = arith.constant 0 : index
      %482 = vector.load %arg9[%c0_176, %c0_177, %c0_178] : memref<1x256x512xbf16, #tpu.memory_space<vmem>>, vector<1x256x512xbf16>
      %483 = vector.shape_cast %482 : vector<1x256x512xbf16> to vector<256x512xbf16>
      %cst_179 = arith.constant dense<0.000000e+00> : vector<8x512xf32>
      %484 = tpu.matmul %481, %483, %cst_179 {dimension_numbers = #tpu.dot_dimension_numbers<[1], [0], [0], [1], [0, 0, 1, 1], [], []>} : vector<8x256xbf16>, vector<256x512xbf16>, vector<8x512xf32> -> vector<8x512xf32>
      %c0_180 = arith.constant 0 : index
      %c0_181 = arith.constant 0 : index
      %c0_182 = arith.constant 0 : index
      %485 = vector.load %arg10[%c0_180, %c0_181, %c0_182] : memref<1x1x512xf32, #tpu.memory_space<vmem>>, vector<1x1x512xf32>
      %486 = vector.shape_cast %485 : vector<1x1x512xf32> to vector<1x512xf32>
      %487 = vector.broadcast %486 : vector<1x512xf32> to vector<8x512xf32>
      %488 = arith.addf %484, %487 : vector<8x512xf32>
      %489 = vector.extract_strided_slice %488 {offsets = [0, 0], sizes = [8, 128], strides = [1, 1]} : vector<8x512xf32> to vector<8x128xf32>
      %490 = arith.negf %489 : vector<8x128xf32>
      %491 = math.exp %490 : vector<8x128xf32>
      %cst_183 = arith.constant 1.000000e+00 : f32
      %492 = vector.broadcast %cst_183 : f32 to vector<8x128xf32>
      %493 = arith.addf %492, %491 : vector<8x128xf32>
      %494 = arith.divf %492, %493 : vector<8x128xf32>
      %495 = vector.extract_strided_slice %488 {offsets = [0, 128], sizes = [8, 128], strides = [1, 1]} : vector<8x512xf32> to vector<8x128xf32>
      %496 = arith.negf %495 : vector<8x128xf32>
      %497 = math.exp %496 : vector<8x128xf32>
      %cst_184 = arith.constant 1.000000e+00 : f32
      %498 = vector.broadcast %cst_184 : f32 to vector<8x128xf32>
      %499 = arith.addf %498, %497 : vector<8x128xf32>
      %500 = arith.divf %498, %499 : vector<8x128xf32>
      %501 = vector.extract_strided_slice %488 {offsets = [0, 256], sizes = [8, 128], strides = [1, 1]} : vector<8x512xf32> to vector<8x128xf32>
      %502 = vector.extract_strided_slice %488 {offsets = [0, 384], sizes = [8, 128], strides = [1, 1]} : vector<8x512xf32> to vector<8x128xf32>
      %503 = arith.mulf %494, %502 : vector<8x128xf32>
      %504 = arith.addf %501, %503 : vector<8x128xf32>
      %505 = math.tanh %504 : vector<8x128xf32>
      %cst_185 = arith.constant 1.000000e+00 : f32
      %506 = vector.broadcast %cst_185 : f32 to vector<8x128xf32>
      %507 = arith.subf %506, %500 : vector<8x128xf32>
      %508 = arith.mulf %507, %505 : vector<8x128xf32>
      %509 = arith.mulf %500, %430 : vector<8x128xf32>
      %510 = arith.addf %508, %509 : vector<8x128xf32>
      %511 = vector.shape_cast %440 : vector<8x1xi1> to vector<8x1xi1>
      %512 = vector.broadcast %511 : vector<8x1xi1> to vector<8x128xi1>
      %513 = arith.select %512, %510, %430 : vector<8x128xi1>, vector<8x128xf32>
      %cst_186 = arith.constant 0.000000e+00 : f32
      %514 = vector.shape_cast %440 : vector<8x1xi1> to vector<8x1xi1>
      %515 = vector.broadcast %514 : vector<8x1xi1> to vector<8x128xi1>
      %516 = vector.broadcast %cst_186 : f32 to vector<8x128xf32>
      %517 = arith.select %515, %513, %516 : vector<8x128xi1>, vector<8x128xf32>
      %c5 = arith.constant 5 : index
      %c0_187 = arith.constant 0 : index
      %c0_188 = arith.constant 0 : index
      %518 = vector.load %arg11[%c5, %c0_187, %c0_188] : memref<8x8x128xf32, #tpu.memory_space<vmem>>, vector<1x8x128xf32>
      %519 = vector.shape_cast %518 : vector<1x8x128xf32> to vector<8x128xf32>
      %520 = vector.shape_cast %517 : vector<8x128xf32> to vector<1x8x128xf32>
      tpu.vector_store %arg11[%c5, %c0_187, %c0_188], %520 {strides = array<i32>} : memref<8x8x128xf32, #tpu.memory_space<vmem>>, vector<1x8x128xf32>,
      %c6_i32 = arith.constant 6 : i32
      %521 = arith.addi %0, %c6_i32 : i32
      %522 = vector.broadcast %521 : i32 to vector<8x1xi32>
      %523 = arith.cmpi slt, %522, %11 : vector<8x1xi32>
      %524 = arith.truncf %476 : vector<8x128xf32> to vector<8x128xbf16>
      %c0_189 = arith.constant 0 : index
      %c0_190 = arith.constant 0 : index
      %525 = vector.load %arg7[%c0_189, %c0_190] : memref<128x384xbf16, #tpu.memory_space<vmem>>, vector<128x384xbf16>
      %cst_191 = arith.constant dense<0.000000e+00> : vector<8x384xf32>
      %526 = tpu.matmul %524, %525, %cst_191 {dimension_numbers = #tpu.dot_dimension_numbers<[1], [0], [0], [1], [0, 0, 1, 1], [], []>} : vector<8x128xbf16>, vector<128x384xbf16>, vector<8x384xf32> -> vector<8x384xf32>
      %c48 = arith.constant 48 : index
      %c0_192 = arith.constant 0 : index
      %527 = vector.load %arg13[%c48, %c0_192] : memref<64x384xf32, #tpu.memory_space<vmem>>, vector<8x384xf32>
      %528 = vector.extract_strided_slice %527 {offsets = [0, 0], sizes = [8, 128], strides = [1, 1]} : vector<8x384xf32> to vector<8x128xf32>
      %529 = vector.extract_strided_slice %526 {offsets = [0, 0], sizes = [8, 128], strides = [1, 1]} : vector<8x384xf32> to vector<8x128xf32>
      %530 = arith.addf %528, %529 : vector<8x128xf32>
      %531 = arith.negf %530 : vector<8x128xf32>
      %532 = math.exp %531 : vector<8x128xf32>
      %cst_193 = arith.constant 1.000000e+00 : f32
      %533 = vector.broadcast %cst_193 : f32 to vector<8x128xf32>
      %534 = arith.addf %533, %532 : vector<8x128xf32>
      %535 = arith.divf %533, %534 : vector<8x128xf32>
      %536 = vector.extract_strided_slice %527 {offsets = [0, 128], sizes = [8, 128], strides = [1, 1]} : vector<8x384xf32> to vector<8x128xf32>
      %537 = vector.extract_strided_slice %526 {offsets = [0, 128], sizes = [8, 128], strides = [1, 1]} : vector<8x384xf32> to vector<8x128xf32>
      %538 = arith.addf %536, %537 : vector<8x128xf32>
      %539 = arith.negf %538 : vector<8x128xf32>
      %540 = math.exp %539 : vector<8x128xf32>
      %cst_194 = arith.constant 1.000000e+00 : f32
      %541 = vector.broadcast %cst_194 : f32 to vector<8x128xf32>
      %542 = arith.addf %541, %540 : vector<8x128xf32>
      %543 = arith.divf %541, %542 : vector<8x128xf32>
      %544 = vector.extract_strided_slice %527 {offsets = [0, 256], sizes = [8, 128], strides = [1, 1]} : vector<8x384xf32> to vector<8x128xf32>
      %545 = vector.extract_strided_slice %526 {offsets = [0, 256], sizes = [8, 128], strides = [1, 1]} : vector<8x384xf32> to vector<8x128xf32>
      %c0_195 = arith.constant 0 : index
      %c0_196 = arith.constant 0 : index
      %546 = vector.load %arg8[%c0_195, %c0_196] : memref<1x128xf32, #tpu.memory_space<vmem>>, vector<1x128xf32>
      %547 = vector.broadcast %546 : vector<1x128xf32> to vector<8x128xf32>
      %548 = arith.addf %545, %547 : vector<8x128xf32>
      %549 = arith.mulf %535, %548 : vector<8x128xf32>
      %550 = arith.addf %544, %549 : vector<8x128xf32>
      %551 = math.tanh %550 : vector<8x128xf32>
      %cst_197 = arith.constant 1.000000e+00 : f32
      %552 = vector.broadcast %cst_197 : f32 to vector<8x128xf32>
      %553 = arith.subf %552, %543 : vector<8x128xf32>
      %554 = arith.mulf %553, %551 : vector<8x128xf32>
      %555 = arith.mulf %543, %476 : vector<8x128xf32>
      %556 = arith.addf %554, %555 : vector<8x128xf32>
      %557 = vector.shape_cast %523 : vector<8x1xi1> to vector<8x1xi1>
      %558 = vector.broadcast %557 : vector<8x1xi1> to vector<8x128xi1>
      %559 = arith.select %558, %556, %476 : vector<8x128xi1>, vector<8x128xf32>
      %560 = arith.truncf %559 : vector<8x128xf32> to vector<8x128xbf16>
      %c0_198 = arith.constant 0 : index
      %c0_199 = arith.constant 0 : index
      %561 = vector.load %arg14[%c0_198, %c0_199] : memref<8x256xbf16, #tpu.memory_space<vmem>>, vector<8x128xbf16>
      tpu.vector_store %arg14[%c0_198, %c0_199], %560 {strides = array<i32>} : memref<8x256xbf16, #tpu.memory_space<vmem>>, vector<8x128xbf16>,
      %562 = arith.truncf %513 : vector<8x128xf32> to vector<8x128xbf16>
      %c0_200 = arith.constant 0 : index
      %c128_201 = arith.constant 128 : index
      %563 = vector.load %arg14[%c0_200, %c128_201] : memref<8x256xbf16, #tpu.memory_space<vmem>>, vector<8x128xbf16>
      tpu.vector_store %arg14[%c0_200, %c128_201], %562 {strides = array<i32>} : memref<8x256xbf16, #tpu.memory_space<vmem>>, vector<8x128xbf16>,
      %c0_202 = arith.constant 0 : index
      %c0_203 = arith.constant 0 : index
      %564 = vector.load %arg14[%c0_202, %c0_203] : memref<8x256xbf16, #tpu.memory_space<vmem>>, vector<8x256xbf16>
      %c0_204 = arith.constant 0 : index
      %c0_205 = arith.constant 0 : index
      %c0_206 = arith.constant 0 : index
      %565 = vector.load %arg9[%c0_204, %c0_205, %c0_206] : memref<1x256x512xbf16, #tpu.memory_space<vmem>>, vector<1x256x512xbf16>
      %566 = vector.shape_cast %565 : vector<1x256x512xbf16> to vector<256x512xbf16>
      %cst_207 = arith.constant dense<0.000000e+00> : vector<8x512xf32>
      %567 = tpu.matmul %564, %566, %cst_207 {dimension_numbers = #tpu.dot_dimension_numbers<[1], [0], [0], [1], [0, 0, 1, 1], [], []>} : vector<8x256xbf16>, vector<256x512xbf16>, vector<8x512xf32> -> vector<8x512xf32>
      %c0_208 = arith.constant 0 : index
      %c0_209 = arith.constant 0 : index
      %c0_210 = arith.constant 0 : index
      %568 = vector.load %arg10[%c0_208, %c0_209, %c0_210] : memref<1x1x512xf32, #tpu.memory_space<vmem>>, vector<1x1x512xf32>
      %569 = vector.shape_cast %568 : vector<1x1x512xf32> to vector<1x512xf32>
      %570 = vector.broadcast %569 : vector<1x512xf32> to vector<8x512xf32>
      %571 = arith.addf %567, %570 : vector<8x512xf32>
      %572 = vector.extract_strided_slice %571 {offsets = [0, 0], sizes = [8, 128], strides = [1, 1]} : vector<8x512xf32> to vector<8x128xf32>
      %573 = arith.negf %572 : vector<8x128xf32>
      %574 = math.exp %573 : vector<8x128xf32>
      %cst_211 = arith.constant 1.000000e+00 : f32
      %575 = vector.broadcast %cst_211 : f32 to vector<8x128xf32>
      %576 = arith.addf %575, %574 : vector<8x128xf32>
      %577 = arith.divf %575, %576 : vector<8x128xf32>
      %578 = vector.extract_strided_slice %571 {offsets = [0, 128], sizes = [8, 128], strides = [1, 1]} : vector<8x512xf32> to vector<8x128xf32>
      %579 = arith.negf %578 : vector<8x128xf32>
      %580 = math.exp %579 : vector<8x128xf32>
      %cst_212 = arith.constant 1.000000e+00 : f32
      %581 = vector.broadcast %cst_212 : f32 to vector<8x128xf32>
      %582 = arith.addf %581, %580 : vector<8x128xf32>
      %583 = arith.divf %581, %582 : vector<8x128xf32>
      %584 = vector.extract_strided_slice %571 {offsets = [0, 256], sizes = [8, 128], strides = [1, 1]} : vector<8x512xf32> to vector<8x128xf32>
      %585 = vector.extract_strided_slice %571 {offsets = [0, 384], sizes = [8, 128], strides = [1, 1]} : vector<8x512xf32> to vector<8x128xf32>
      %586 = arith.mulf %577, %585 : vector<8x128xf32>
      %587 = arith.addf %584, %586 : vector<8x128xf32>
      %588 = math.tanh %587 : vector<8x128xf32>
      %cst_213 = arith.constant 1.000000e+00 : f32
      %589 = vector.broadcast %cst_213 : f32 to vector<8x128xf32>
      %590 = arith.subf %589, %583 : vector<8x128xf32>
      %591 = arith.mulf %590, %588 : vector<8x128xf32>
      %592 = arith.mulf %583, %513 : vector<8x128xf32>
      %593 = arith.addf %591, %592 : vector<8x128xf32>
      %594 = vector.shape_cast %523 : vector<8x1xi1> to vector<8x1xi1>
      %595 = vector.broadcast %594 : vector<8x1xi1> to vector<8x128xi1>
      %596 = arith.select %595, %593, %513 : vector<8x128xi1>, vector<8x128xf32>
      %cst_214 = arith.constant 0.000000e+00 : f32
      %597 = vector.shape_cast %523 : vector<8x1xi1> to vector<8x1xi1>
      %598 = vector.broadcast %597 : vector<8x1xi1> to vector<8x128xi1>
      %599 = vector.broadcast %cst_214 : f32 to vector<8x128xf32>
      %600 = arith.select %598, %596, %599 : vector<8x128xi1>, vector<8x128xf32>
      %c6 = arith.constant 6 : index
      %c0_215 = arith.constant 0 : index
      %c0_216 = arith.constant 0 : index
      %601 = vector.load %arg11[%c6, %c0_215, %c0_216] : memref<8x8x128xf32, #tpu.memory_space<vmem>>, vector<1x8x128xf32>
      %602 = vector.shape_cast %601 : vector<1x8x128xf32> to vector<8x128xf32>
      %603 = vector.shape_cast %600 : vector<8x128xf32> to vector<1x8x128xf32>
      tpu.vector_store %arg11[%c6, %c0_215, %c0_216], %603 {strides = array<i32>} : memref<8x8x128xf32, #tpu.memory_space<vmem>>, vector<1x8x128xf32>,
      %c7_i32 = arith.constant 7 : i32
      %604 = arith.addi %0, %c7_i32 : i32
      %605 = vector.broadcast %604 : i32 to vector<8x1xi32>
      %606 = arith.cmpi slt, %605, %11 : vector<8x1xi32>
      %607 = arith.truncf %559 : vector<8x128xf32> to vector<8x128xbf16>
      %c0_217 = arith.constant 0 : index
      %c0_218 = arith.constant 0 : index
      %608 = vector.load %arg7[%c0_217, %c0_218] : memref<128x384xbf16, #tpu.memory_space<vmem>>, vector<128x384xbf16>
      %cst_219 = arith.constant dense<0.000000e+00> : vector<8x384xf32>
      %609 = tpu.matmul %607, %608, %cst_219 {dimension_numbers = #tpu.dot_dimension_numbers<[1], [0], [0], [1], [0, 0, 1, 1], [], []>} : vector<8x128xbf16>, vector<128x384xbf16>, vector<8x384xf32> -> vector<8x384xf32>
      %c56 = arith.constant 56 : index
      %c0_220 = arith.constant 0 : index
      %610 = vector.load %arg13[%c56, %c0_220] : memref<64x384xf32, #tpu.memory_space<vmem>>, vector<8x384xf32>
      %611 = vector.extract_strided_slice %610 {offsets = [0, 0], sizes = [8, 128], strides = [1, 1]} : vector<8x384xf32> to vector<8x128xf32>
      %612 = vector.extract_strided_slice %609 {offsets = [0, 0], sizes = [8, 128], strides = [1, 1]} : vector<8x384xf32> to vector<8x128xf32>
      %613 = arith.addf %611, %612 : vector<8x128xf32>
      %614 = arith.negf %613 : vector<8x128xf32>
      %615 = math.exp %614 : vector<8x128xf32>
      %cst_221 = arith.constant 1.000000e+00 : f32
      %616 = vector.broadcast %cst_221 : f32 to vector<8x128xf32>
      %617 = arith.addf %616, %615 : vector<8x128xf32>
      %618 = arith.divf %616, %617 : vector<8x128xf32>
      %619 = vector.extract_strided_slice %610 {offsets = [0, 128], sizes = [8, 128], strides = [1, 1]} : vector<8x384xf32> to vector<8x128xf32>
      %620 = vector.extract_strided_slice %609 {offsets = [0, 128], sizes = [8, 128], strides = [1, 1]} : vector<8x384xf32> to vector<8x128xf32>
      %621 = arith.addf %619, %620 : vector<8x128xf32>
      %622 = arith.negf %621 : vector<8x128xf32>
      %623 = math.exp %622 : vector<8x128xf32>
      %cst_222 = arith.constant 1.000000e+00 : f32
      %624 = vector.broadcast %cst_222 : f32 to vector<8x128xf32>
      %625 = arith.addf %624, %623 : vector<8x128xf32>
      %626 = arith.divf %624, %625 : vector<8x128xf32>
      %627 = vector.extract_strided_slice %610 {offsets = [0, 256], sizes = [8, 128], strides = [1, 1]} : vector<8x384xf32> to vector<8x128xf32>
      %628 = vector.extract_strided_slice %609 {offsets = [0, 256], sizes = [8, 128], strides = [1, 1]} : vector<8x384xf32> to vector<8x128xf32>
      %c0_223 = arith.constant 0 : index
      %c0_224 = arith.constant 0 : index
      %629 = vector.load %arg8[%c0_223, %c0_224] : memref<1x128xf32, #tpu.memory_space<vmem>>, vector<1x128xf32>
      %630 = vector.broadcast %629 : vector<1x128xf32> to vector<8x128xf32>
      %631 = arith.addf %628, %630 : vector<8x128xf32>
      %632 = arith.mulf %618, %631 : vector<8x128xf32>
      %633 = arith.addf %627, %632 : vector<8x128xf32>
      %634 = math.tanh %633 : vector<8x128xf32>
      %cst_225 = arith.constant 1.000000e+00 : f32
      %635 = vector.broadcast %cst_225 : f32 to vector<8x128xf32>
      %636 = arith.subf %635, %626 : vector<8x128xf32>
      %637 = arith.mulf %636, %634 : vector<8x128xf32>
      %638 = arith.mulf %626, %559 : vector<8x128xf32>
      %639 = arith.addf %637, %638 : vector<8x128xf32>
      %640 = vector.shape_cast %606 : vector<8x1xi1> to vector<8x1xi1>
      %641 = vector.broadcast %640 : vector<8x1xi1> to vector<8x128xi1>
      %642 = arith.select %641, %639, %559 : vector<8x128xi1>, vector<8x128xf32>
      %643 = arith.truncf %642 : vector<8x128xf32> to vector<8x128xbf16>
      %c0_226 = arith.constant 0 : index
      %c0_227 = arith.constant 0 : index
      %644 = vector.load %arg14[%c0_226, %c0_227] : memref<8x256xbf16, #tpu.memory_space<vmem>>, vector<8x128xbf16>
      tpu.vector_store %arg14[%c0_226, %c0_227], %643 {strides = array<i32>} : memref<8x256xbf16, #tpu.memory_space<vmem>>, vector<8x128xbf16>,
      %645 = arith.truncf %596 : vector<8x128xf32> to vector<8x128xbf16>
      %c0_228 = arith.constant 0 : index
      %c128_229 = arith.constant 128 : index
      %646 = vector.load %arg14[%c0_228, %c128_229] : memref<8x256xbf16, #tpu.memory_space<vmem>>, vector<8x128xbf16>
      tpu.vector_store %arg14[%c0_228, %c128_229], %645 {strides = array<i32>} : memref<8x256xbf16, #tpu.memory_space<vmem>>, vector<8x128xbf16>,
      %c0_230 = arith.constant 0 : index
      %c0_231 = arith.constant 0 : index
      %647 = vector.load %arg14[%c0_230, %c0_231] : memref<8x256xbf16, #tpu.memory_space<vmem>>, vector<8x256xbf16>
      %c0_232 = arith.constant 0 : index
      %c0_233 = arith.constant 0 : index
      %c0_234 = arith.constant 0 : index
      %648 = vector.load %arg9[%c0_232, %c0_233, %c0_234] : memref<1x256x512xbf16, #tpu.memory_space<vmem>>, vector<1x256x512xbf16>
      %649 = vector.shape_cast %648 : vector<1x256x512xbf16> to vector<256x512xbf16>
      %cst_235 = arith.constant dense<0.000000e+00> : vector<8x512xf32>
      %650 = tpu.matmul %647, %649, %cst_235 {dimension_numbers = #tpu.dot_dimension_numbers<[1], [0], [0], [1], [0, 0, 1, 1], [], []>} : vector<8x256xbf16>, vector<256x512xbf16>, vector<8x512xf32> -> vector<8x512xf32>
      %c0_236 = arith.constant 0 : index
      %c0_237 = arith.constant 0 : index
      %c0_238 = arith.constant 0 : index
      %651 = vector.load %arg10[%c0_236, %c0_237, %c0_238] : memref<1x1x512xf32, #tpu.memory_space<vmem>>, vector<1x1x512xf32>
      %652 = vector.shape_cast %651 : vector<1x1x512xf32> to vector<1x512xf32>
      %653 = vector.broadcast %652 : vector<1x512xf32> to vector<8x512xf32>
      %654 = arith.addf %650, %653 : vector<8x512xf32>
      %655 = vector.extract_strided_slice %654 {offsets = [0, 0], sizes = [8, 128], strides = [1, 1]} : vector<8x512xf32> to vector<8x128xf32>
      %656 = arith.negf %655 : vector<8x128xf32>
      %657 = math.exp %656 : vector<8x128xf32>
      %cst_239 = arith.constant 1.000000e+00 : f32
      %658 = vector.broadcast %cst_239 : f32 to vector<8x128xf32>
      %659 = arith.addf %658, %657 : vector<8x128xf32>
      %660 = arith.divf %658, %659 : vector<8x128xf32>
      %661 = vector.extract_strided_slice %654 {offsets = [0, 128], sizes = [8, 128], strides = [1, 1]} : vector<8x512xf32> to vector<8x128xf32>
      %662 = arith.negf %661 : vector<8x128xf32>
      %663 = math.exp %662 : vector<8x128xf32>
      %cst_240 = arith.constant 1.000000e+00 : f32
      %664 = vector.broadcast %cst_240 : f32 to vector<8x128xf32>
      %665 = arith.addf %664, %663 : vector<8x128xf32>
      %666 = arith.divf %664, %665 : vector<8x128xf32>
      %667 = vector.extract_strided_slice %654 {offsets = [0, 256], sizes = [8, 128], strides = [1, 1]} : vector<8x512xf32> to vector<8x128xf32>
      %668 = vector.extract_strided_slice %654 {offsets = [0, 384], sizes = [8, 128], strides = [1, 1]} : vector<8x512xf32> to vector<8x128xf32>
      %669 = arith.mulf %660, %668 : vector<8x128xf32>
      %670 = arith.addf %667, %669 : vector<8x128xf32>
      %671 = math.tanh %670 : vector<8x128xf32>
      %cst_241 = arith.constant 1.000000e+00 : f32
      %672 = vector.broadcast %cst_241 : f32 to vector<8x128xf32>
      %673 = arith.subf %672, %666 : vector<8x128xf32>
      %674 = arith.mulf %673, %671 : vector<8x128xf32>
      %675 = arith.mulf %666, %596 : vector<8x128xf32>
      %676 = arith.addf %674, %675 : vector<8x128xf32>
      %677 = vector.shape_cast %606 : vector<8x1xi1> to vector<8x1xi1>
      %678 = vector.broadcast %677 : vector<8x1xi1> to vector<8x128xi1>
      %679 = arith.select %678, %676, %596 : vector<8x128xi1>, vector<8x128xf32>
      %cst_242 = arith.constant 0.000000e+00 : f32
      %680 = vector.shape_cast %606 : vector<8x1xi1> to vector<8x1xi1>
      %681 = vector.broadcast %680 : vector<8x1xi1> to vector<8x128xi1>
      %682 = vector.broadcast %cst_242 : f32 to vector<8x128xf32>
      %683 = arith.select %681, %679, %682 : vector<8x128xi1>, vector<8x128xf32>
      %c7 = arith.constant 7 : index
      %c0_243 = arith.constant 0 : index
      %c0_244 = arith.constant 0 : index
      %684 = vector.load %arg11[%c7, %c0_243, %c0_244] : memref<8x8x128xf32, #tpu.memory_space<vmem>>, vector<1x8x128xf32>
      %685 = vector.shape_cast %684 : vector<1x8x128xf32> to vector<8x128xf32>
      %686 = vector.shape_cast %683 : vector<8x128xf32> to vector<1x8x128xf32>
      tpu.vector_store %arg11[%c7, %c0_243, %c0_244], %686 {strides = array<i32>} : memref<8x8x128xf32, #tpu.memory_space<vmem>>, vector<1x8x128xf32>,
      %c0_245 = arith.constant 0 : index
      %c0_246 = arith.constant 0 : index
      %c0_247 = arith.constant 0 : index
      %687 = vector.load %arg12[%c0_245, %c0_246, %c0_247] : memref<2x8x128xf32, #tpu.memory_space<vmem>>, vector<1x8x128xf32>
      %688 = vector.shape_cast %687 : vector<1x8x128xf32> to vector<8x128xf32>
      %689 = vector.shape_cast %642 : vector<8x128xf32> to vector<1x8x128xf32>
      tpu.vector_store %arg12[%c0_245, %c0_246, %c0_247], %689 {strides = array<i32>} : memref<2x8x128xf32, #tpu.memory_space<vmem>>, vector<1x8x128xf32>,
      %c1_248 = arith.constant 1 : index
      %c0_249 = arith.constant 0 : index
      %c0_250 = arith.constant 0 : index
      %690 = vector.load %arg12[%c1_248, %c0_249, %c0_250] : memref<2x8x128xf32, #tpu.memory_space<vmem>>, vector<1x8x128xf32>
      %691 = vector.shape_cast %690 : vector<1x8x128xf32> to vector<8x128xf32>
      %692 = vector.shape_cast %679 : vector<8x128xf32> to vector<1x8x128xf32>
      tpu.vector_store %arg12[%c1_248, %c0_249, %c0_250], %692 {strides = array<i32>} : memref<2x8x128xf32, #tpu.memory_space<vmem>>, vector<1x8x128xf32>,
    } else {
    }
    return
  }
  func.func @transform_0(%arg0: i32, %arg1: memref<1xi32, #tpu.memory_space<smem>>) -> (i32, i32) {
    %c0_i32 = arith.constant 0 : i32
    %c0_i32_0 = arith.constant 0 : i32
    return %arg0, %c0_i32 : i32, i32
  }
  func.func @transform_1(%arg0: i32, %arg1: memref<1xi32, #tpu.memory_space<smem>>) -> (i32, i32) {
    %c0_i32 = arith.constant 0 : i32
    %c0_i32_0 = arith.constant 0 : i32
    %c0_i32_1 = arith.constant 0 : i32
    return %c0_i32, %c0_i32_0 : i32, i32
  }
  func.func @transform_2(%arg0: i32, %arg1: memref<1xi32, #tpu.memory_space<smem>>) -> (i32, i32, i32) {
    %c0_i32 = arith.constant 0 : i32
    %c0_i32_0 = arith.constant 0 : i32
    %c0_i32_1 = arith.constant 0 : i32
    %c0_i32_2 = arith.constant 0 : i32
    return %c0_i32, %c0_i32_0, %c0_i32_1 : i32, i32, i32
  }
  func.func @transform_3(%arg0: i32, %arg1: memref<1xi32, #tpu.memory_space<smem>>) -> (i32, i32) {
    %c0_i32 = arith.constant 0 : i32
    %c0_i32_0 = arith.constant 0 : i32
    %c0_i32_1 = arith.constant 0 : i32
    return %c0_i32, %c0_i32_0 : i32, i32
  }
  func.func @transform_4(%arg0: i32, %arg1: memref<1xi32, #tpu.memory_space<smem>>) -> (i32, i32) {
    %c0_i32 = arith.constant 0 : i32
    %c0_i32_0 = arith.constant 0 : i32
    %c0_i32_1 = arith.constant 0 : i32
    return %c0_i32, %c0_i32_0 : i32, i32
  }
  func.func @transform_5(%arg0: i32, %arg1: memref<1xi32, #tpu.memory_space<smem>>) -> (i32, i32) {
    %c0_i32 = arith.constant 0 : i32
    %c0_i32_0 = arith.constant 0 : i32
    %c0_i32_1 = arith.constant 0 : i32
    return %c0_i32, %c0_i32_0 : i32, i32
  }
  func.func @transform_6(%arg0: i32, %arg1: memref<1xi32, #tpu.memory_space<smem>>) -> (i32, i32) {
    %c0_i32 = arith.constant 0 : i32
    %c0_i32_0 = arith.constant 0 : i32
    %c0_i32_1 = arith.constant 0 : i32
    return %c0_i32, %c0_i32_0 : i32, i32
  }
  func.func @transform_7(%arg0: i32, %arg1: memref<1xi32, #tpu.memory_space<smem>>) -> (i32, i32, i32) {
    %c0_i32 = arith.constant 0 : i32
    %c0_i32_0 = arith.constant 0 : i32
    %c0_i32_1 = arith.constant 0 : i32
    %c0_i32_2 = arith.constant 0 : i32
    return %c0_i32, %c0_i32_0, %c0_i32_1 : i32, i32, i32
  }
  func.func @transform_8(%arg0: i32, %arg1: memref<1xi32, #tpu.memory_space<smem>>) -> (i32, i32, i32) {
    %c0_i32 = arith.constant 0 : i32
    %c0_i32_0 = arith.constant 0 : i32
    %c0_i32_1 = arith.constant 0 : i32
    %c0_i32_2 = arith.constant 0 : i32
    return %c0_i32, %c0_i32_0, %c0_i32_1 : i32, i32, i32
  }
  func.func @transform_9(%arg0: i32, %arg1: memref<1xi32, #tpu.memory_space<smem>>) -> (i32, i32, i32) {
    %c0_i32 = arith.constant 0 : i32
    %c0_i32_0 = arith.constant 0 : i32
    %c0_i32_1 = arith.constant 0 : i32
    return %arg0, %c0_i32, %c0_i32_0 : i32, i32, i32
  }
  func.func @transform_10(%arg0: i32, %arg1: memref<1xi32, #tpu.memory_space<smem>>) -> (i32, i32, i32) {
    %c0_i32 = arith.constant 0 : i32
    %c0_i32_0 = arith.constant 0 : i32
    %c0_i32_1 = arith.constant 0 : i32
    %c0_i32_2 = arith.constant 0 : i32
    return %c0_i32, %c0_i32_0, %c0_i32_1 : i32, i32, i32
  }
}

</mosaic_0001>

<bundles_post_ra>
// kernel: tpu_custom_call.1
= control target key start
LH: loop header
LB: loop body
LE: loop exit
PB: predicated region body
PF: predicated region fallthrough
CT: control target
= control target key end

     0   :  { %s12080_s0 = inlined_call_operand.<no memory space> [shape: s32[1], index: 0, kind: input, shape index: {}]   ;;  %s12081_s1 = inlined_call_operand.hbm [shape: bf16[192,128], index: 1, kind: input, shape index: {}]   ;;  %s12082_s2 = inlined_call_operand.hbm [shape: s32[8,1], index: 2, kind: input, shape index: {}]   ;;  %s12083_s3 = inlined_call_operand.hbm [shape: f32[2,8,128], index: 3, kind: input, shape index: {}]   ;;  %s12084_s4 = inlined_call_operand.hbm [shape: bf16[128,384], index: 4, kind: input, shape index: {}]   ;;  %s12085_s5 = inlined_call_operand.hbm [shape: f32[1,384], index: 5, kind: input, shape index: {}]   ;;  %s12086_s6 = inlined_call_operand.hbm [shape: bf16[128,384], index: 6, kind: input, shape index: {}]   ;;  %s12087_s7 = inlined_call_operand.hbm [shape: f32[1,128], index: 7, kind: input, shape index: {}]   ;;  %s12088_s8 = inlined_call_operand.hbm [shape: bf16[1,256,512], index: 8, kind: input, shape index: {}]   ;;  %s12089_s9 = inlined_call_operand.hbm [shape: f32[1,1,512], index: 9, kind: input, shape index: {}]   ;;  %s12090_s10 = inlined_call_operand.hbm [shape: f32[24,8,128], index: 10, kind: output, shape index: {0}]   ;;  %s12091_s11 = inlined_call_operand.hbm [shape: f32[2,8,128], index: 11, kind: output, shape index: {1}]  }
   0x1   :  { %12276 = sst [smem:[#allocation96_spill]] %s12082_s2 }
   0x2   :  { %12277 = sst [smem:[#allocation97_spill]] %s12084_s4 }
   0x3   :  { %12278 = sst [smem:[#allocation98_spill]] %s12086_s6 }
   0x4   :  { %12279 = sst [smem:[#allocation99_spill]] %s12088_s8 }
   0x5   :  { %17 = sst [smem:[#allocation5]] %s12080_s0 }
   0x6   :  { %18 = vsyncpa [#allocation7], 0 }
   0x7   :  { %20 = vsyncpa [#allocation7 + $0x1], 0 }
   0x8   :  { %21 = vsyncpa [#allocation10], 0 }
   0x9   :  { %22 = vsyncpa [#allocation13], 0 }
   0xa   :  { %23 = vsyncpa [#allocation16], 0 }
   0xb   :  { %24 = vsyncpa [#allocation19], 0 }
   0xc   :  { %25 = vsyncpa [#allocation8], 0 }
   0xd   :  { %27 = vsyncpa [#allocation8 + $0x1], 0 }
   0xe   :  { %28 = vsyncpa [#allocation23], 0  ;;  %s10040_s19 = smov 0   ;;  %s10042_s20 = smov 0  }
   0xf   :  { %s10044_s21 = smov 0   ;;  %s10046_s22 = smov 0  }
  0x10 LB: > { %s9952_s0 = smov [#allocation9]   ;;  %s10061_s24 = sadd.s32 4294967295, %s9950_s22   ;;  %s9950_s22 = sphi %s10046_s22, %s12691_s22   ;;  %s9946_s21 = sphi %s10044_s21, %s12690_s21   ;;  %s9942_s20 = sphi %s10042_s20, %s12689_s20   ;;  %s9938_s19 = sphi %s10040_s19, %s12688_s19  }
  0x11   : > { %s293_s23 = sshll.u32 %s9952_s0, 4  ;;  %p7520_p0 = scmp.ge.s32.totalorder %s9950_s22, 1  ;;  %s294_s23 = int_to_ptr.vmem [resolvable:$true] %s293_s23 }
  0x12   : > { %p12092_p1 = scmp.eq.s32.totalorder %s10061_s24, 0  ;;  %p280_p2 = scmp.lt.s32.totalorder %s9950_s22, 4 }
  0x13   : > { %s9953_s26 = smov [#allocation12]   ;;  %s9954_s29 = smov [#allocation15]  }
  0x14   : > { %p10067_p4 = pnand %p7520_p0, %p280_p2  ;;  %s316_s27 = sshll.u32 %s9953_s26, 4  ;;  %s10073_s27 = int_to_ptr.vmem [resolvable:$true] %s316_s27 }
  0x15   : > { %s340_s30 = sshll.u32 %s9954_s29, 4  ;;  %s12282_s2 = sld [smem:[#allocation96_spill]]  ;;  %s10081_s30 = int_to_ptr.vmem [resolvable:$true] %s340_s30 }
  0x16   : > { %s12280_s25 = scalar_select %p10067_p4, 1, 0 }
  0x17   : > { %p8716_p5 = pneg %p10067_p4 }
  0x19   : > { %p10077_p6 = pnand %p8716_p5, %p12092_p1 }
  0x1b   : > { %s9584_s14 = scalar_lea.hbm %s12282_s2, 128  ;;  %p10091_p8 = pneg %p10077_p6 }
  0x1c   : > { %p9585_p7 = scmp.ne.s32.totalorder %s12282_s2, %s9584_s14  ;;  %p9591_p11 = scmp.lt.u32.totalorder %s9584_s14, %s12282_s2 }
  0x1e   : > { %p9587_p9 = pnand %p10091_p8, %p9585_p7 }
  0x20   : > { %p9588_p10 = pneg %p9587_p9 }
  0x22   : > { %p9593_p12 = pnand %p9591_p11, %p9588_p10 }
  0x24   : > { %9596 = shalt.err (!%p9593_p12)
}
  0x25   : > { %s9597_s26 = scalar_lea.vmem %s294_s23, 128  ;;  %p9605_p5 = scmp.lt.s32.totalorder %s294_s23, %s294_s23 }
  0x26   : > { %p9598_p13 = scmp.ne.s32.totalorder %s294_s23, %s9597_s26  ;;  %p9606_p3 = scmp.lt.s32.totalorder %s9597_s26, %s9597_s26 }
  0x28   : > { %p9600_p0 = pnand %p9598_p13, %p10091_p8  ;;  %p9607_p1 = por %p9606_p3, %p9605_p5 }
  0x2a   : > { %p9601_p2 = pneg %p9600_p0 }
  0x2c   : > { %p9608_p4 = pnand %p9607_p1, %p9601_p2 }
  0x2e   : > { %9611 = shalt.err (!%p9608_p4)
}
  0x2f   : > { %8719 = dma.hbm_to_vmem [thread:$0]  (!%p10077_p6), %s12282_s2, 128, %s294_s23, [#allocation10]  }
  0x30   : > { %s12284_s4 = sld [smem:[#allocation97_spill]] }
  0x36   : > { %s9612_s15 = scalar_lea.hbm %s12284_s4, 3072 }
  0x37   : > { %p9613_p7 = scmp.ne.s32.totalorder %s12284_s4, %s9612_s15  ;;  %p9619_p1 = scmp.lt.u32.totalorder %s9612_s15, %s12284_s4 }
  0x39   : > { %p9615_p9 = pnand %p9613_p7, %p10091_p8 }
  0x3b   : > { %p9616_p3 = pneg %p9615_p9 }
  0x3d   : > { %p9621_p4 = pnand %p9619_p1, %p9616_p3 }
  0x3f   : > { %9624 = shalt.err (!%p9621_p4)
}
  0x40   : > { %s9625_s23 = scalar_lea.vmem %s10073_s27, 3072  ;;  %p9633_p13 = scmp.lt.s32.totalorder %s10073_s27, %s10073_s27 }
  0x41   : > { %p9626_p10 = scmp.ne.s32.totalorder %s10073_s27, %s9625_s23  ;;  %p9634_p0 = scmp.lt.s32.totalorder %s9625_s23, %s9625_s23 }
  0x43   : > { %p9628_p11 = pnand %p9626_p10, %p10091_p8  ;;  %p9635_p2 = por %p9634_p0, %p9633_p13 }
  0x45   : > { %p9629_p12 = pneg %p9628_p11 }
  0x47   : > { %p9636_p5 = pnand %p9635_p2, %p9629_p12 }
  0x49   : > { %9639 = shalt.err (!%p9636_p5)
}
  0x4a   : > { %s9955_s29 = smov 192   ;;  %s9956_s12 = smov 12  }
  0x4b   : > { %8725 = dma.hbm_to_vmem [thread:$0]  (!%p10077_p6), %s12284_s4, 3072, %s10073_s27, [#allocation13], %s9955_s29, %s9955_s29, %s9956_s12  }
  0x4c   : > { %s12285_s6 = sld [smem:[#allocation98_spill]] }
  0x52   : > { %s9640_s18 = scalar_lea.hbm %s12285_s6, 3072 }
  0x53   : > { %p9641_p7 = scmp.ne.s32.totalorder %s12285_s6, %s9640_s18  ;;  %p9647_p1 = scmp.lt.u32.totalorder %s9640_s18, %s12285_s6 }
  0x55   : > { %p9643_p9 = pnand %p9641_p7, %p10091_p8 }
  0x57   : > { %p9644_p3 = pneg %p9643_p9 }
  0x59   : > { %p9649_p4 = pnand %p9647_p1, %p9644_p3 }
  0x5b   : > { %9652 = shalt.err (!%p9649_p4)
}
  0x5c   : > { %s9653_s27 = scalar_lea.vmem %s10081_s30, 3072  ;;  %p9661_p13 = scmp.lt.s32.totalorder %s10081_s30, %s10081_s30 }
  0x5d   : > { %p9654_p10 = scmp.ne.s32.totalorder %s10081_s30, %s9653_s27  ;;  %p9662_p0 = scmp.lt.s32.totalorder %s9653_s27, %s9653_s27 }
  0x5f   : > { %p9656_p11 = pnand %p9654_p10, %p10091_p8  ;;  %p9663_p2 = por %p9662_p0, %p9661_p13 }
  0x61   : > { %p9657_p12 = pneg %p9656_p11 }
  0x63   : > { %p9664_p5 = pnand %p9663_p2, %p9657_p12 }
  0x65   : > { %9667 = shalt.err (!%p9664_p5)
}
  0x66   : > { %8731 = dma.hbm_to_vmem [thread:$0]  (!%p10077_p6), %s12285_s6, 3072, %s10081_s30, [#allocation16], %s9955_s29, %s9955_s29, %s9956_s12  }
  0x67   : > { %s9957_s14 = smov [#allocation18]   ;;  %s12286_s8 = sld [smem:[#allocation99_spill]] }
  0x68   : > { %s364_s15 = sshll.u32 %s9957_s14, 4  ;;  %s365_s15 = int_to_ptr.vmem [resolvable:$true] %s364_s15 }
  0x6d   : > { %s9668_s0 = scalar_lea.hbm %s12286_s8, 8192 }
  0x6e   : > { %p9669_p7 = scmp.ne.s32.totalorder %s12286_s8, %s9668_s0  ;;  %p9675_p1 = scmp.lt.u32.totalorder %s9668_s0, %s12286_s8 }
  0x70   : > { %p9671_p9 = pnand %p9669_p7, %p10091_p8 }
  0x72   : > { %p9672_p3 = pneg %p9671_p9 }
  0x74   : > { %p9677_p4 = pnand %p9675_p1, %p9672_p3 }
  0x76   : > { %9680 = shalt.err (!%p9677_p4)
}
  0x77   : > { %s9681_s30 = scalar_lea.vmem %s365_s15, 8192  ;;  %p9689_p13 = scmp.lt.s32.totalorder %s365_s15, %s365_s15 }
  0x78   : > { %p9682_p10 = scmp.ne.s32.totalorder %s365_s15, %s9681_s30  ;;  %p9690_p0 = scmp.lt.s32.totalorder %s9681_s30, %s9681_s30 }
  0x7a   : > { %p9684_p11 = pnand %p9682_p10, %p10091_p8  ;;  %p9691_p2 = por %p9690_p0, %p9689_p13 }
  0x7c   : > { %p9685_p12 = pneg %p9684_p11 }
  0x7e   : > { %p9692_p5 = pnand %p9691_p2, %p9685_p12 }
  0x80   : > { %9695 = shalt.err (!%p9692_p5)
}
  0x81   : > { %s9958_s29 = smov 256   ;;  %s9959_s12 = smov 16  }
  0x82   : > { %8737 = dma.hbm_to_vmem [thread:$0]  (!%p10077_p6), %s12286_s8, 8192, %s365_s15, [#allocation19], %s9958_s29, %s9958_s29, %s9959_s12  }
  0x83   : > { %s9960_s13 = smov [#allocation11]   ;;  %s9696_s0 = scalar_lea.hbm %s12083_s3, 256 }
  0x84   : > { %s303_s14 = sshll.u32 %s9960_s13, 4  ;;  %p9697_p7 = scmp.ne.s32.totalorder %s12083_s3, %s9696_s0  ;;  %s304_s14 = int_to_ptr.vmem [resolvable:$true] %s303_s14 }
  0x85   : > { %p9703_p1 = scmp.lt.u32.totalorder %s9696_s0, %s12083_s3 }
  0x86   : > { %p9699_p9 = pnand %p9697_p7, %p10091_p8 }
  0x88   : > { %p9700_p3 = pneg %p9699_p9 }
  0x8a   : > { %p9705_p4 = pnand %p9703_p1, %p9700_p3 }
  0x8c   : > { %9708 = shalt.err (!%p9705_p4)
}
  0x8d   : > { %s9709_s15 = scalar_lea.vmem %s304_s14, 256  ;;  %p9717_p13 = scmp.lt.s32.totalorder %s304_s14, %s304_s14 }
  0x8e   : > { %p9710_p10 = scmp.ne.s32.totalorder %s304_s14, %s9709_s15  ;;  %p9718_p0 = scmp.lt.s32.totalorder %s9709_s15, %s9709_s15 }
  0x90   : > { %p9712_p11 = pnand %p9710_p10, %p10091_p8  ;;  %p9719_p2 = por %p9718_p0, %p9717_p13 }
  0x92   : > { %p9713_p12 = pneg %p9712_p11 }
  0x94   : > { %p9720_p5 = pnand %p9719_p2, %p9713_p12 }
  0x96   : > { %9723 = shalt.err (!%p9720_p5)
}
  0x97   : > { %s9961_s29 = smov 128   ;;  %s9962_s12 = smov 8  }
  0x98   : > { %8722 = dma.hbm_to_vmem [thread:$0]  (!%p10077_p6), %s12083_s3, 256, %s304_s14, [#allocation10], %s9961_s29, %s9961_s29, %s9962_s12  }
  0x99   : > { %s9963_s13 = smov [#allocation14]   ;;  %s9964_s18 = smov [#allocation17]  }
  0x9a   : > { %s330_s16 = sshll.u32 %s9963_s13, 4  ;;  %s354_s0 = sshll.u32 %s9964_s18, 4  ;;  %s331_s16 = int_to_ptr.vmem [resolvable:$true] %s330_s16  ;;  %s355_s0 = int_to_ptr.vmem [resolvable:$true] %s354_s0 }
  0x9b   : > { %s9724_s27 = scalar_lea.hbm %s12085_s5, 48 }
  0x9c   : > { %p9725_p7 = scmp.ne.s32.totalorder %s12085_s5, %s9724_s27  ;;  %p9731_p1 = scmp.lt.u32.totalorder %s9724_s27, %s12085_s5 }
  0x9e   : > { %p9727_p9 = pnand %p9725_p7, %p10091_p8 }
  0xa0   : > { %p9728_p3 = pneg %p9727_p9 }
  0xa2   : > { %p9733_p4 = pnand %p9731_p1, %p9728_p3 }
  0xa4   : > { %9736 = shalt.err (!%p9733_p4)
}
  0xa5   : > { %s9737_s14 = scalar_lea.vmem %s331_s16, 48  ;;  %s9744_s29 = scalar_lea.vmem %s331_s16, 64 }
  0xa6   : > { %p9738_p10 = scmp.ne.s32.totalorder %s331_s16, %s9737_s14  ;;  %p9745_p13 = scmp.lt.s32.totalorder %s331_s16, %s331_s16 }
  0xa7   : > { %p9746_p0 = scmp.lt.s32.totalorder %s9744_s29, %s9737_s14 }
  0xa8   : > { %p9740_p11 = pnand %p9738_p10, %p10091_p8 }
  0xa9   : > { %p9747_p2 = por %p9746_p0, %p9745_p13 }
  0xaa   : > { %p9741_p12 = pneg %p9740_p11 }
  0xac   : > { %p9748_p5 = pnand %p9747_p2, %p9741_p12 }
  0xae   : > { %9751 = shalt.err (!%p9748_p5)
}
  0xaf   : > { %8728 = dma.hbm_to_vmem [thread:$0]  (!%p10077_p6), %s12085_s5, 48, %s331_s16, [#allocation13]  }
  0xb0   : > { %s9752_s2 = scalar_lea.hbm %s12087_s7, 16 }
  0xb1   : > { %p9753_p7 = scmp.ne.s32.totalorder %s12087_s7, %s9752_s2  ;;  %p9759_p1 = scmp.lt.u32.totalorder %s9752_s2, %s12087_s7 }
  0xb3   : > { %p9755_p9 = pnand %p9753_p7, %p10091_p8 }
  0xb5   : > { %p9756_p3 = pneg %p9755_p9 }
  0xb7   : > { %p9761_p4 = pnand %p9759_p1, %p9756_p3 }
  0xb9   : > { %9764 = shalt.err (!%p9761_p4)
}
  0xba   : > { %s9765_s27 = scalar_lea.vmem %s355_s0, 16  ;;  %s9772_s16 = scalar_lea.vmem %s355_s0, 32 }
  0xbb   : > { %p9766_p10 = scmp.ne.s32.totalorder %s355_s0, %s9765_s27  ;;  %p9773_p13 = scmp.lt.s32.totalorder %s355_s0, %s355_s0 }
  0xbc   : > { %p9774_p0 = scmp.lt.s32.totalorder %s9772_s16, %s9765_s27 }
  0xbd   : > { %p9768_p11 = pnand %p9766_p10, %p10091_p8 }
  0xbe   : > { %p9775_p2 = por %p9774_p0, %p9773_p13 }
  0xbf   : > { %p9769_p12 = pneg %p9768_p11 }
  0xc1   : > { %p9776_p5 = pnand %p9775_p2, %p9769_p12 }
  0xc3   : > { %9779 = shalt.err (!%p9776_p5)
}
  0xc4   : > { %8734 = dma.hbm_to_vmem [thread:$0]  (!%p10077_p6), %s12087_s7, 16, %s355_s0, [#allocation16]  }
  0xc5   : > { %s9965_s14 = smov [#allocation20]   ;;  %s9780_s6 = scalar_lea.hbm %s12089_s9, 64 }
  0xc6   : > { %s378_s29 = sshll.u32 %s9965_s14, 4  ;;  %p9781_p7 = scmp.ne.s32.totalorder %s12089_s9, %s9780_s6  ;;  %s379_s29 = int_to_ptr.vmem [resolvable:$true] %s378_s29 }
  0xc7   : > { %p9787_p1 = scmp.lt.u32.totalorder %s9780_s6, %s12089_s9 }
  0xc8   : > { %p9783_p9 = pnand %p9781_p7, %p10091_p8 }
  0xca   : > { %p9784_p3 = pneg %p9783_p9 }
  0xcc   : > { %p9789_p4 = pnand %p9787_p1, %p9784_p3 }
  0xce   : > { %9792 = shalt.err (!%p9789_p4)
}
  0xcf   : > { %s9793_s0 = scalar_lea.vmem %s379_s29, 64  ;;  %p9801_p13 = scmp.lt.s32.totalorder %s379_s29, %s379_s29 }
  0xd0   : > { %p9794_p10 = scmp.ne.s32.totalorder %s379_s29, %s9793_s0  ;;  %p9802_p0 = scmp.lt.s32.totalorder %s9793_s0, %s9793_s0 }
  0xd2   : > { %p9796_p11 = pnand %p9794_p10, %p10091_p8  ;;  %p9803_p2 = por %p9802_p0, %p9801_p13 }
  0xd4   : > { %p9797_p12 = pneg %p9796_p11 }
  0xd6   : > { %p9804_p5 = pnand %p9803_p2, %p9797_p12 }
  0xd8   : > { %9807 = shalt.err (!%p9804_p5)
}
  0xd9   : > { %8740 = dma.hbm_to_vmem [thread:$0]  (!%p10077_p6), %s12089_s9, 64, %s379_s29, [#allocation19]  }
  0xda   : > { %s7519_s28 = sadd.s32 4294967294, %s9950_s22   ;;  %s10245_s17 = sadd.s32 1, %s9950_s22  }
  0xdb   : > { %s38_s27 = ssub.s32 %s9950_s22, %s10245_s17  ;;  %s41_s16 = sadd.s32 1, %s9946_s21 }
  0xdc   : > { %p39_p8 = scmp.eq.s32.totalorder %s38_s27, 0  ;;  %p48_p7 = scmp.ne.s32.totalorder %s9946_s21, %s9942_s20 }
  0xdd   : > { %p49_p9 = scmp.eq.s32.totalorder %s9950_s22, 0  ;;  %p54_p3 = scmp.ne.s32.totalorder %s9942_s20, %s9938_s19 }
  0xde   : > { %s10256_s30 = scalar_select %p39_p8, %s9946_s21, %s41_s16  }
  0xdf   : > { %p10258_p1 = por %p49_p9, %p48_p7  ;;  %p12288_p4 = scmp.eq.s32.totalorder %s10061_s24, 0 }
  0xe0   : > { %p12094_p10 = scmp.eq.s32.totalorder %s10061_s24, 2  ;;  %p252_p11 = scmp.eq.s32.totalorder %s7519_s28, 2 }
  0xe1   : > { %p10264_p6 = por %p12288_p4, %p54_p3  ;;  %p8757_p12 = scmp.lt.s32.totalorder %s9950_s22, 3 }
  0xe2   : > { %s389_s29 = sand.u32 1, %s9946_s21   ;;  %p10273_p13 = por %p12094_p10, %p48_p7 }
  0xe3   : > { %p10277_p0 = por %p252_p11, %p54_p3  ;;  %s7530_s6 = sshll.u32 %s389_s29, 5 }
  0xe4   : > { %s12290_s12 = scalar_select %p10273_p13, 1, 0 }
  0xe5   : > { %s12291_s4 = scalar_select %p10277_p0, 1, 0 }
  0xe6   : > { %s8350_s8 = sshll.u32 %s9950_s22, 9  ;;  %s393_s0 = scalar_lea.vmem [#allocation6], %s7530_s6 }
  0xe7   : > { %s10285_s18 = scalar_lea.hbm %s12081_s1, %s8350_s8  ;;  %s400_s26 = sshll.u32 %s393_s0, 4  ;;  %s10287_s26 = int_to_ptr.vmem [resolvable:$true] %s400_s26 }
  0xe8   : > { %p10291_p2 = pnand %p8757_p12, %p10258_p1  ;;  %s10295_s28 = scalar_lea.sflag [#allocation7], %s389_s29 }
  0xe9   : > { %s9808_s27 = scalar_lea.hbm %s10285_s18, 512  ;;  %s9813_s15 = scalar_lea.hbm %s12081_s1, 1536 }
  0xea   : > { %p9809_p5 = scmp.ne.s32.totalorder %s10285_s18, %s9808_s27  ;;  %p9810_p8 = pneg %p10291_p2 }
  0xeb   : > { %p9814_p3 = scmp.lt.u32.totalorder %s10285_s18, %s12081_s1  ;;  %p9815_p1 = scmp.lt.u32.totalorder %s9813_s15, %s9808_s27 }
  0xec   : > { %p9811_p7 = pnand %p9810_p8, %p9809_p5  ;;  %p9817_p11 = scmp.lt.u32.totalorder %s9808_s27, %s10285_s18 }
  0xed   : > { %p9816_p4 = por %p9815_p1, %p9814_p3 }
  0xee   : > { %p9812_p9 = pneg %p9811_p7 }
  0xef   : > { %p9818_p12 = por %p9817_p11, %p9816_p4 }
  0xf1   : > { %p9819_p10 = pnand %p9818_p12, %p9812_p9 }
  0xf3   : > { %9822 = shalt.err (!%p9819_p10)
}
  0xf4   : > { %s9823_s29 = scalar_lea.vmem %s10287_s26, 512  ;;  %s9966_s13 = smov [#allocation6]  }
  0xf5   : > { %p9824_p5 = scmp.ne.s32.totalorder %s10287_s26, %s9823_s29  ;;  %s9828_s0 = sshll.u32 %s9966_s13, 4  ;;  %s9829_s0 = int_to_ptr.vmem [resolvable:$false] %s9828_s0 }
  0xf6   : > { %s9830_s16 = scalar_lea.vmem %s9829_s0, 1024  ;;  %p9831_p13 = scmp.lt.s32.totalorder %s10287_s26, %s9829_s0 }
  0xf7   : > { %p9826_p7 = pnand %p9824_p5, %p9810_p8  ;;  %p9832_p3 = scmp.lt.s32.totalorder %s9830_s16, %s9823_s29 }
  0xf9   : > { %p9827_p0 = pneg %p9826_p7  ;;  %p9833_p1 = por %p9832_p3, %p9831_p13 }
  0xfb   : > { %p9834_p4 = pnand %p9833_p1, %p9827_p0 }
  0xfd   : > { %9837 = shalt.err (!%p9834_p4)
}
  0xfe   : > { %s9967_s27 = smov 64   ;;  %s9968_s6 = smov 4  }
  0xff   : > { %8744 = dma.hbm_to_vmem [thread:$0]  (!%p10291_p2), %s10285_s18, 512, %s10287_s26, %s10295_s28, %s9967_s27, %s9967_s27, %s9968_s6  }
 0x100   : > { %p12293_p10 = scmp.ne.s32.totalorder %s12280_s25, 0 }
 0x101   : > { %s10326_s15 = sand.u32 (!%p12293_p10), 1, %s9942_s20  }
 0x102   : > { %412 = sbr.rel (%p12293_p10) target bundleno = 3015 (0xbc7), region = 56  ;;  %s7534_s8 = sshll.u32 (!%p12293_p10), %s10326_s15, 5 }
 0x103   : > { %s415_s2 = scalar_lea.sflag (!%p12293_p10), [#allocation7], %s10326_s15  ;;  %s10330_s29 = scalar_lea.vmem (!%p12293_p10), [#allocation6], %s7534_s8 }
 0x109   : > { %9909 = dma.done.wait (%p10264_p6), %s415_s2, 512  }
 0x10a   : > { %9911 = vsyncadd (%p10264_p6), %s415_s2, 4294966784  ;;  %p12294_p13 = scmp.eq.s32.totalorder %s10061_s24, 0 }
 0x10c   : > { %9913 = dma.done.wait (%p12294_p13), [#allocation10], 384   ;;  %p12295_p0 = pmov %p12294_p13 }
 0x10e   : > { %9915 = vsyncadd (%p12295_p0), [#allocation10], 4294966912  ;;  %p12296_p2 = pmov %p12295_p0 }
 0x10f   : > { %p12297_p8 = pmov %p12295_p0 }
 0x110   : > { %9917 = dma.done.wait (%p12296_p2), [#allocation13], 3120  }
 0x111   : > { %9919 = vsyncadd (%p12297_p8), [#allocation13], 4294964176  ;;  %p12298_p9 = pmov %p12295_p0 }
 0x112   : > { %p12299_p11 = pmov %p12295_p0 }
 0x113   : > { %9921 = dma.done.wait (%p12298_p9), [#allocation16], 3088  }
 0x114   : > { %9923 = vsyncadd (%p12299_p11), [#allocation16], 4294964208  ;;  %p12300_p6 = pmov %p12295_p0 }
 0x115   : > { %p12301_p12 = pmov %p12295_p0 }
 0x116   : > { %9925 = dma.done.wait (%p12300_p6), [#allocation19], 8256  }
 0x117   : > { %9927 = vsyncadd (%p12301_p12), [#allocation19], 4294959040  ;;  %s7543_s25 = sshll.u32 %s10326_s15, 6  ;;  %s10354_s14 = sshll.u32 %s10061_s24, 3 }
 0x118   : > { %s10356_s18 = scalar_lea.vmem [#allocation21], %s7543_s25  ;;  %p12302_p5 = scmp.ne.s32.totalorder %s10061_s24, 0 }
 0x119   : > { %v495_v0 = vld [vmem:[#allocation11] sm:$0xff] (!%p12302_p5)  ;;  %v496_v1 = vld [vmem:[#allocation11 + $0x8] sm:$0xff] (!%p12302_p5) }
 0x11a   : > { %494 = sbr.rel (%p12302_p5) target bundleno = 289 (0x121), region = 96  ;;  %497 = vst [vmem:[#allocation22] sm:$0xff] (!%p12302_p5), %v495_v0  ;;  %498 = vst [vmem:[#allocation22 + $0x8] sm:$0xff] (!%p12302_p5), %v496_v1 }
 0x121 PF: > { %s499_s26 = sld [smem:[#allocation5]] }
 0x127   : > { %p7546_p7 = scmp.lt.s32.totalorder %s10354_s14, %s499_s26 }
 0x128   : > { %v9969_v2 = vmov (!%p7546_p7), 0.0  }
 0x129   : > { %504 = sbr.rel (%p7546_p7) target bundleno = 304 (0x130), region = 100  ;;  %505 = vst [vmem:[%s10356_s18] sm:$0xff] (!%p7546_p7), %v9969_v2  ;;  %506 = vst [vmem:[%s10356_s18 + $0x8] sm:$0xff] (!%p7546_p7), %v9969_v2 }
 0x12a   : > { %507 = vst [vmem:[%s10356_s18 + $0x10] sm:$0xff] (!%p7546_p7), %v9969_v2  ;;  %508 = vst [vmem:[%s10356_s18 + $0x18] sm:$0xff] (!%p7546_p7), %v9969_v2 }
 0x12b   : > { %509 = vst [vmem:[%s10356_s18 + $0x20] sm:$0xff] (!%p7546_p7), %v9969_v2  ;;  %510 = vst [vmem:[%s10356_s18 + $0x28] sm:$0xff] (!%p7546_p7), %v9969_v2 }
 0x12c   : > { %511 = vst [vmem:[%s10356_s18 + $0x30] sm:$0xff] (!%p7546_p7), %v9969_v2  ;;  %512 = vst [vmem:[%s10356_s18 + $0x38] sm:$0xff] (!%p7546_p7), %v9969_v2 }
 0x130 PF: > { %p7547_p3 = scmp.ge.s32.totalorder %s10354_s14, %s499_s26 }
 0x132   : > { %515 = sbr.rel (%p7547_p3) target bundleno = 2960 (0xb90), region = 104 }
 0x139   : > { %v8826_v3 = vld [vmem:[#allocation12 + $0x4] ss:$12 sps:$4 sm:$0xff]   ;;  %v8828_v4 = vld [vmem:[#allocation12] ss:$12 sps:$4 sm:$0xff]   ;;  %v12096_v5 = vmov 0   ;;  %v891_v36 = vstv %s10354_s14  ;;  %v8870_v39 = vld [vmem:[%s10330_s29 + $0x10] sm:$0xff]  }
 0x13a   : > { %758 = vmatprep.mubr.bf16.mxu0 %v12096_v5  ;;  %8824 = vset.pattern.permute.xlu0 %v12096_v5  ;;  %v8829_v6 = vld [vmem:[#allocation12 + $0x1c] ss:$12 sps:$4 sm:$0xff]   ;;  %v8831_v7 = vld [vmem:[#allocation12 + $0x18] ss:$12 sps:$4 sm:$0xff]   ;;  %v8832_v8 = vld [vmem:[#allocation12 + $0x34] ss:$12 sps:$4 sm:$0xff]  }
 0x13b   : > { %726 = vmatprep.subr.bf16.mxu0 %v8826_v3  ;;  %8825 = vset.pattern.permute.xlu1 %v12096_v5  ;;  %v8834_v9 = vld [vmem:[#allocation12 + $0x30] ss:$12 sps:$4 sm:$0xff]   ;;  %v8835_v10 = vld [vmem:[#allocation12 + $0x4c] ss:$12 sps:$4 sm:$0xff]   ;;  %v8846_v11 = vld [vmem:[#allocation12 + $0x8] ss:$12 sps:$4 sm:$0xff]  }
 0x13c   : > { %727 = vmatpush1.bf16.msra.mxu0 %v8828_v4  ;;  %v8837_v12 = vld [vmem:[#allocation12 + $0x48] ss:$12 sps:$4 sm:$0xff]   ;;  %8492 = vmatprep.subr.bf16.mxu1 %v8846_v11  ;;  %v8838_v13 = vld [vmem:[#allocation12 + $0x64] ss:$12 sps:$4 sm:$0xff]   ;;  %v8850_v14 = vld [vmem:[#allocation12 + $0x20] ss:$12 sps:$4 sm:$0xff]  }
 0x13d   : > { %728 = vmatprep.subr.bf16.mxu0 %v8829_v6  ;;  %8493 = vmatpush3.bf16.msra.mxu1 %v8846_v11  ;;  %v8852_v15 = vld [vmem:[%s10330_s29] sm:$0xff]   ;;  %v8853_v16 = vld [vmem:[#allocation12 + $0x38] ss:$12 sps:$4 sm:$0xff]   ;;  %v8857_v19 = vld [vmem:[#allocation12 + $0x50] ss:$12 sps:$4 sm:$0xff]   ;;  %v12098_v40 = vmov 0.0  }
 0x13e   : > { %8494 = vmatprep.subr.bf16.mxu1 %v8850_v14  ;;  %v8840_v17 = vld [vmem:[#allocation12 + $0x60] ss:$12 sps:$4 sm:$0xff]   ;;  %8508 = vmatprep.mubr.bf16.mxu1 %v8852_v15  ;;  %v8841_v18 = vld [vmem:[#allocation12 + $0x7c] ss:$12 sps:$4 sm:$0xff]   ;;  %v8843_v20 = vld [vmem:[#allocation12 + $0x78] ss:$12 sps:$4 sm:$0xff]  }
 0x13f   : > { %v8844_v21 = vld [vmem:[#allocation12 + $0x94] ss:$12 sps:$4 sm:$0xff]   ;;  %v8847_v23 = vld [vmem:[#allocation12 + $0x90] ss:$12 sps:$4 sm:$0xff]   ;;  %v8848_v24 = vld [vmem:[#allocation12 + $0xac] ss:$12 sps:$4 sm:$0xff]  }
 0x140   : > { %729 = vmatpush1.bf16.msra.mxu0 %v8831_v7  ;;  %v8862_v22 = vld [vmem:[#allocation12 + $0x68] ss:$12 sps:$4 sm:$0xff]   ;;  %v8866_v25 = vld [vmem:[#allocation12 + $0x80] ss:$12 sps:$4 sm:$0xff]   ;;  %v8871_v28 = vld [vmem:[#allocation12 + $0x98] ss:$12 sps:$4 sm:$0xff]  }
 0x141   : > { %730 = vmatprep.subr.bf16.mxu0 %v8832_v8  ;;  %8495 = vmatpush3.bf16.msra.mxu1 %v8850_v14  ;;  %v8851_v26 = vld [vmem:[#allocation12 + $0xa8] ss:$12 sps:$4 sm:$0xff]   ;;  %v8854_v29 = vld [vmem:[#allocation15] ss:$12 sps:$4 sm:$0xff]   ;;  %v8860_v30 = vld [vmem:[#allocation15 + $0x1c] ss:$12 sps:$4 sm:$0xff]  }
 0x142   : > { %8496 = vmatprep.subr.bf16.mxu1 %v8853_v16  ;;  %v8856_v27 = vld [vmem:[#allocation15 + $0x4] ss:$12 sps:$4 sm:$0xff]   ;;  %v8875_v31 = vld [vmem:[#allocation12 + $0xb0] ss:$12 sps:$4 sm:$0xff]   ;;  %v8865_v33 = vld [vmem:[#allocation15 + $0x34] ss:$12 sps:$4 sm:$0xff]  }
 0x143   : > { %v8858_v32 = vld [vmem:[#allocation15 + $0x18] ss:$12 sps:$4 sm:$0xff]   ;;  %v8861_v34 = vld [vmem:[%s10330_s29 + $0x8] sm:$0xff]   ;;  %v8867_v38 = vld [vmem:[#allocation15 + $0x48] ss:$12 sps:$4 sm:$0xff]   ;;  %s1695_s23 = sadd.s32 1, %s10354_s14 }
 0x144   : > { %731 = vmatpush1.bf16.msra.mxu0 %v8834_v9  ;;  %v8863_v35 = vld [vmem:[#allocation15 + $0x30] ss:$12 sps:$4 sm:$0xff]   ;;  %v8869_v37 = vld [vmem:[#allocation15 + $0x4c] ss:$12 sps:$4 sm:$0xff]   ;;  %v8883_v41 = vld [vmem:[#allocation15 + $0x8] ss:$12 sps:$4 sm:$0xff]   ;;  %v1696_v47 = vstv %s1695_s23 }
 0x145   : > { %732 = vmatprep.subr.bf16.mxu0 %v8835_v10  ;;  %8497 = vmatpush3.bf16.msra.mxu1 %v8853_v16  ;;  %v10379_v42 = vld [vmem:[#allocation9] sm:$0xff]  ;;  %v8887_v44 = vld [vmem:[#allocation15 + $0x20] ss:$12 sps:$4 sm:$0xff]   ;;  %s4110_s28 = sadd.s32 4, %s10354_s14  ;;  %v8889_v53 = vld [vmem:[#allocation15 + $0x50] ss:$12 sps:$4 sm:$0xff]  }
 0x146   : > { %8498 = vmatprep.subr.bf16.mxu1 %v8857_v19  ;;  %v8874_v43 = vld [vmem:[#allocation15 + $0x64] ss:$12 sps:$4 sm:$0xff]   ;;  %vm892_vm0 = vcmp.lt.s32.totalorder %v891_v36, %v10379_v42  ;;  %v8872_v46 = vld [vmem:[#allocation15 + $0x60] ss:$12 sps:$4 sm:$0xff]   ;;  %v8878_v48 = vld [vmem:[#allocation15 + $0x7c] ss:$12 sps:$4 sm:$0xff]   ;;  %vm1697_vm1 = vcmp.lt.s32.totalorder %v1696_v47, %v10379_v42  ;;  %v4111_v55 = vstv %s4110_s28 }
 0x147   : > { %v1167_v45 = vsel %vm892_vm0, 1, %v12096_v5  ;;  %v8888_v49 = vld [vmem:[#allocation15 + $0x38] ss:$12 sps:$4 sm:$0xff]   ;;  %v8879_v50 = vld [vmem:[%s10330_s29 + $0x18] sm:$0xff]   ;;  %v1971_v54 = vsel %vm1697_vm1, 1, %v12096_v5  ;;  %s5720_s13 = sadd.s32 6, %s10354_s14  ;;  %vm4112_vm3 = vcmp.lt.s32.totalorder %v4111_v55, %v10379_v42 }
 0x148   : > { %733 = vmatpush1.bf16.msra.mxu0 %v8837_v12  ;;  %1169 = vperm.xlu0 %8824, %v1167_v45   ;;  %v8876_v51 = vld [vmem:[#allocation15 + $0x78] ss:$12 sps:$4 sm:$0xff]   ;;  %v8882_v52 = vld [vmem:[#allocation15 + $0x94] ss:$12 sps:$4 sm:$0xff]   ;;  %v8880_v56 = vld [vmem:[#allocation15 + $0x90] ss:$12 sps:$4 sm:$0xff]   ;;  %v5721_v59 = vstv %s5720_s13 }
 0x149   : > { %734 = vmatprep.subr.bf16.mxu0 %v8838_v13  ;;  %8499 = vmatpush3.bf16.msra.mxu1 %v8857_v19  ;;  %vm9972_vm2 = vmmov 0   ;;  %v8886_v57 = vld [vmem:[#allocation15 + $0xac] ss:$12 sps:$4 sm:$0xff]   ;;  %v8890_v58 = vld [vmem:[#allocation15 + $0x68] ss:$12 sps:$4 sm:$0xff]   ;;  %v4386_v62 = vsel %vm4112_vm3, 1, %v12096_v5  ;;  %vm5722_vm4 = vcmp.lt.s32.totalorder %v5721_v59, %v10379_v42 }
 0x14a   : > { %8500 = vmatprep.subr.bf16.mxu1 %v8862_v22  ;;  %v8884_v60 = vld [vmem:[#allocation15 + $0xa8] ss:$12 sps:$4 sm:$0xff]   ;;  %v8891_v63 = vld [vmem:[#allocation15 + $0x80] ss:$12 sps:$4 sm:$0xff]   ;;  %v5996_v0 = vsel %vm5722_vm4, 1, %v12096_v5  ;;  %s2500_s0 = sadd.s32 2, %s10354_s14 }
 0x14b   : > { %v888_v61 = vld [vmem:[#allocation22] sm:$0xff]  ;;  %v8893_v3 = vld [vmem:[#allocation15 + $0xb0] ss:$12 sps:$4 sm:$0xff]   ;;  %s3305_s16 = sadd.s32 3, %s10354_s14  ;;  %s4915_s27 = sadd.s32 5, %s10354_s14 }
 0x14c   : > { %735 = vmatpush1.bf16.msra.mxu0 %v8840_v17  ;;  %1973 = vperm.xlu0 %8824, %v1971_v54   ;;  %v893_v1 = vpack.c.bf16 %v888_v61, %v888_v61  ;;  %v8892_v2 = vld [vmem:[#allocation15 + $0x98] ss:$12 sps:$4 sm:$0xff]   ;;  %v10407_v6 = vld [vmem:[#allocation18 + $0xc] ss:$16 sps:$4 sm:$0xff]   ;;  %s6525_s6 = sadd.s32 7, %s10354_s14 }
 0x14d   : > { %736 = vmatprep.subr.bf16.mxu0 %v8841_v18  ;;  %8501 = vmatpush3.bf16.msra.mxu1 %v8862_v22  ;;  %v10405_v4 = vld [vmem:[#allocation18 + $0x4] ss:$16 sps:$4 sm:$0xff]   ;;  %v10409_v7 = vld [vmem:[#allocation18] ss:$16 sps:$4 sm:$0xff]   ;;  %v10411_v8 = vld [vmem:[#allocation18 + $0x8] ss:$16 sps:$4 sm:$0xff]  }
 0x14e   : > { %8502 = vmatprep.subr.bf16.mxu1 %v8866_v25  ;;  %v10417_v9 = vld [vmem:[#allocation18 + $0x20] ss:$16 sps:$4 sm:$0xff]   ;;  %v10419_v10 = vld [vmem:[#allocation18 + $0x24] ss:$16 sps:$4 sm:$0xff]   ;;  %v10421_v11 = vld [vmem:[#allocation18 + $0x28] ss:$16 sps:$4 sm:$0xff]  }
 0x14f   : > { %v10423_v12 = vld [vmem:[#allocation18 + $0x2c] ss:$16 sps:$4 sm:$0xff]   ;;  %v10429_v13 = vld [vmem:[#allocation18 + $0x44] ss:$16 sps:$4 sm:$0xff]   ;;  %v10435_v16 = vld [vmem:[#allocation18 + $0x48] ss:$16 sps:$4 sm:$0xff]  }
 0x150   : > { %737 = vmatpush1.bf16.msra.mxu0 %v8843_v20  ;;  %4388 = vperm.xlu0 %8824, %v4386_v62   ;;  %v10431_v14 = vld [vmem:[#allocation18 + $0x4c] ss:$16 sps:$4 sm:$0xff]   ;;  %v10441_v17 = vld [vmem:[#allocation18 + $0x60] ss:$16 sps:$4 sm:$0xff]   ;;  %v10443_v18 = vld [vmem:[#allocation18 + $0x64] ss:$16 sps:$4 sm:$0xff]  }
 0x151   : > { %738 = vmatprep.subr.bf16.mxu0 %v8844_v21  ;;  %8503 = vmatpush3.bf16.msra.mxu1 %v8866_v25  ;;  %v10445_v19 = vld [vmem:[#allocation18 + $0x68] ss:$16 sps:$4 sm:$0xff]   ;;  %v10447_v20 = vld [vmem:[#allocation18 + $0x6c] ss:$16 sps:$4 sm:$0xff]   ;;  %v10453_v21 = vld [vmem:[#allocation18 + $0x84] ss:$16 sps:$4 sm:$0xff]  }
 0x152   : > { %8504 = vmatprep.subr.bf16.mxu1 %v8871_v28  ;;  %v10455_v22 = vld [vmem:[#allocation18 + $0x8c] ss:$16 sps:$4 sm:$0xff]   ;;  %v10465_v25 = vld [vmem:[#allocation18 + $0xa4] ss:$16 sps:$4 sm:$0xff]   ;;  %v10495_v36 = vld [vmem:[#allocation18 + $0xe8] ss:$16 sps:$4 sm:$0xff]  }
 0x153   : > { %v10512_v42 = vld [vmem:[#allocation18 + $0x120] ss:$16 sps:$4 sm:$0xff]   ;;  %v10519_v45 = vld [vmem:[#allocation18 + $0x12c] ss:$16 sps:$4 sm:$0xff]   ;;  %v10549_v54 = vld [vmem:[#allocation18 + $0x184] ss:$16 sps:$4 sm:$0xff]  }
 0x154   : > { %739 = vmatpush1.bf16.msra.mxu0 %v8847_v23  ;;  %5998 = vperm.xlu0 %8824, %v5996_v0   ;;  %v10457_v23 = vld [vmem:[#allocation18 + $0x80] ss:$16 sps:$4 sm:$0xff]   ;;  %v10527_v47 = vld [vmem:[#allocation18 + $0x14c] ss:$16 sps:$4 sm:$0xff]   ;;  %12312 = vst [vmem:[#allocation40_spill] sm:$0xff] %v10549_v54 }
 0x155   : > { %740 = vmatprep.subr.bf16.mxu0 %v8848_v24  ;;  %8505 = vmatpush3.bf16.msra.mxu1 %v8871_v28  ;;  %v10459_v24 = vld [vmem:[#allocation18 + $0x88] ss:$16 sps:$4 sm:$0xff]   ;;  %12305 = vst [vmem:[#allocation33_spill] sm:$0xff] %v10527_v47  ;;  %v10551_v55 = vld [vmem:[#allocation18 + $0x18c] ss:$16 sps:$4 sm:$0xff]  }
 0x156   : > { %8506 = vmatprep.subr.bf16.mxu1 %v8875_v31  ;;  %v10471_v28 = vld [vmem:[#allocation18 + $0xa8] ss:$16 sps:$4 sm:$0xff]   ;;  %12313 = vst [vmem:[#allocation41_spill] sm:$0xff] %v10551_v55  ;;  %v10563_v59 = vld [vmem:[#allocation18 + $0x1ac] ss:$16 sps:$4 sm:$0xff]  }
 0x157   : > { %12317 = vst [vmem:[#allocation45_spill] sm:$0xff] %v10563_v59  ;;  %v10567_v61 = vld [vmem:[#allocation18 + $0x1a8] ss:$16 sps:$4 sm:$0xff]   ;;  %v10573_v62 = vld [vmem:[#allocation18 + $0x1c4] ss:$16 sps:$4 sm:$0xff]  }
 0x158   : > { %741 = vmatpush1.bf16.msra.mxu0 %v8851_v26  ;;  %v10467_v26 = vld [vmem:[#allocation18 + $0xac] ss:$16 sps:$4 sm:$0xff]   ;;  %12319 = vst [vmem:[#allocation47_spill] sm:$0xff] %v10567_v61  ;;  %12320 = vst [vmem:[#allocation48_spill] sm:$0xff] %v10573_v62  ;;  %v10577_v0 = vld [vmem:[#allocation18 + $0x1c0] ss:$16 sps:$4 sm:$0xff]  }
 0x159   : > { %1054 = vmatprep.subr.bf16.mxu0 %v8856_v27  ;;  %8507 = vmatpush3.bf16.msra.mxu1 %v8875_v31  ;;  %v10469_v27 = vld [vmem:[#allocation18 + $0xa0] ss:$16 sps:$4 sm:$0xff]   ;;  %12322 = vst [vmem:[#allocation50_spill] sm:$0xff] %v10577_v0 }
 0x15a   : > { %8516 = vmatprep.subr.bf16.mxu1 %v12098_v40  ;;  %v10481_v31 = vld [vmem:[#allocation18 + $0xc0] ss:$16 sps:$4 sm:$0xff]  }
 0x15b   : > { %759 = vmatmul.mubr.bf16.vlgmr.msra.gmra.mrb[0].mxu0 %v8852_v15  ;;  %v10433_v15 = vld [vmem:[#allocation18 + $0x40] ss:$16 sps:$4 sm:$0xff]  }
 0x15c   : > { %1055 = vmatpush1.bf16.msra.mxu0 %v8854_v29  ;;  %768 = vmatprep.mubr.bf16.mxu0 %v12096_v5  ;;  %v10477_v29 = vld [vmem:[#allocation18 + $0xc4] ss:$16 sps:$4 sm:$0xff]  }
 0x15d   : > { %1056 = vmatprep.subr.bf16.mxu0 %v8860_v30  ;;  %8509 = vmatmul.mubr.bf16.vlgmr.msra.gmra.mrb[0].mxu1 %v8861_v34  ;;  %v10479_v30 = vld [vmem:[#allocation18 + $0xcc] ss:$16 sps:$4 sm:$0xff]  }
 0x15e   : > { %8517 = vmatpush3.bf16.msra.mxu1 %v8883_v41  ;;  %8512 = vmatprep.mubr.bf16.mxu1 %v8870_v39  ;;  %v10507_v41 = vld [vmem:[#allocation18 + $0x108] ss:$16 sps:$4 sm:$0xff]  }
 0x15f   : > { %8518 = vmatprep.subr.bf16.mxu1 %v12098_v40 }
 0x160   : > { %1057 = vmatpush1.bf16.msra.mxu0 %v8858_v32  ;;  %v10483_v32 = vld [vmem:[#allocation18 + $0xc8] ss:$16 sps:$4 sm:$0xff]  }
 0x161   : > { %1058 = vmatprep.subr.bf16.mxu0 %v8865_v33  ;;  %v10489_v33 = vld [vmem:[#allocation18 + $0xe4] ss:$16 sps:$4 sm:$0xff]  }
 0x162   : > { %8519 = vmatpush3.bf16.msra.mxu1 %v8887_v44  ;;  %v10517_v44 = vld [vmem:[#allocation18 + $0x128] ss:$16 sps:$4 sm:$0xff]  }
 0x163   : > { %769 = vmatmul.mubr.bf16.gmra.mrb[4].mxu0 %v8861_v34  ;;  %8520 = vmatprep.subr.bf16.mxu1 %v12098_v40  ;;  %v10491_v34 = vld [vmem:[#allocation18 + $0xec] ss:$16 sps:$4 sm:$0xff]   ;;  %12303 = vst [vmem:[#allocation31_spill] sm:$0xff] %v10517_v44 }
 0x164   : > { %1059 = vmatpush1.bf16.msra.mxu0 %v8863_v35  ;;  %778 = vmatprep.mubr.bf16.mxu0 %v12096_v5  ;;  %v10493_v35 = vld [vmem:[#allocation18 + $0xe0] ss:$16 sps:$4 sm:$0xff]  }
 0x165   : > { %1060 = vmatprep.subr.bf16.mxu0 %v8869_v37  ;;  %8513 = vmatmul.mubr.bf16.gmra.mrb[4].mxu1 %v8879_v50  ;;  %v10501_v37 = vld [vmem:[#allocation18 + $0x104] ss:$16 sps:$4 sm:$0xff]  }
 0x166   : > { %8521 = vmatpush3.bf16.msra.mxu1 %v8888_v49  ;;  %8532 = vmatprep.mubr.msk.bf16.mxu1 %vm9972_vm2, %v12098_v40  ;;  %v10531_v49 = vld [vmem:[#allocation18 + $0x148] ss:$16 sps:$4 sm:$0xff]  }
 0x167   : > { %8522 = vmatprep.subr.bf16.mxu1 %v12098_v40  ;;  %12307 = vst [vmem:[#allocation35_spill] sm:$0xff] %v10531_v49 }
 0x168   : > { %1061 = vmatpush1.bf16.msra.mxu0 %v8867_v38  ;;  %v10503_v38 = vld [vmem:[#allocation18 + $0x10c] ss:$16 sps:$4 sm:$0xff]  }
 0x169   : > { %1062 = vmatprep.subr.bf16.mxu0 %v8874_v43  ;;  %v10514_v43 = vld [vmem:[#allocation18 + $0x124] ss:$16 sps:$4 sm:$0xff]  }
 0x16a   : > { %8523 = vmatpush3.bf16.msra.mxu1 %v8889_v53  ;;  %v10543_v53 = vld [vmem:[#allocation18 + $0x168] ss:$16 sps:$4 sm:$0xff]  }
 0x16b   : > { %779 = vmatmul.mubr.bf16.gmra.mrb[8].mxu0 %v8870_v39  ;;  %8524 = vmatprep.subr.bf16.mxu1 %v12098_v40  ;;  %v10505_v39 = vld [vmem:[#allocation18 + $0x100] ss:$16 sps:$4 sm:$0xff]   ;;  %12311 = vst [vmem:[#allocation39_spill] sm:$0xff] %v10543_v53 }
 0x16c   : > { %1063 = vmatpush1.bf16.msra.mxu0 %v8872_v46  ;;  %788 = vmatprep.mubr.bf16.mxu0 %v12096_v5  ;;  %v10525_v46 = vld [vmem:[#allocation18 + $0x144] ss:$16 sps:$4 sm:$0xff]  }
 0x16d   : > { %1064 = vmatprep.subr.bf16.mxu0 %v8878_v48  ;;  %12304 = vst [vmem:[#allocation32_spill] sm:$0xff] %v10525_v46  ;;  %v10529_v48 = vld [vmem:[#allocation18 + $0x140] ss:$16 sps:$4 sm:$0xff]  }
 0x16e   : > { %8525 = vmatpush3.bf16.msra.mxu1 %v8890_v58  ;;  %12306 = vst [vmem:[#allocation34_spill] sm:$0xff] %v10529_v48  ;;  %v10561_v58 = vld [vmem:[#allocation18 + $0x1a4] ss:$16 sps:$4 sm:$0xff]  }
 0x16f   : > { %8526 = vmatprep.subr.bf16.mxu1 %v12098_v40  ;;  %12316 = vst [vmem:[#allocation44_spill] sm:$0xff] %v10561_v58 }
 0x170   : > { %1065 = vmatpush1.bf16.msra.mxu0 %v8876_v51  ;;  %v10539_v51 = vld [vmem:[#allocation18 + $0x16c] ss:$16 sps:$4 sm:$0xff]  }
 0x171   : > { %1066 = vmatprep.subr.bf16.mxu0 %v8882_v52  ;;  %12309 = vst [vmem:[#allocation37_spill] sm:$0xff] %v10539_v51  ;;  %v10541_v52 = vld [vmem:[#allocation18 + $0x160] ss:$16 sps:$4 sm:$0xff]  }
 0x172   : > { %8527 = vmatpush3.bf16.msra.mxu1 %v8891_v63  ;;  %12310 = vst [vmem:[#allocation38_spill] sm:$0xff] %v10541_v52  ;;  %v10575_v63 = vld [vmem:[#allocation18 + $0x1cc] ss:$16 sps:$4 sm:$0xff]  }
 0x173   : > { %789 = vmatmul.mubr.bf16.gmra.mrb[12].mxu0 %v8879_v50  ;;  %8528 = vmatprep.subr.bf16.mxu1 %v12098_v40  ;;  %v10537_v50 = vld [vmem:[#allocation18 + $0x164] ss:$16 sps:$4 sm:$0xff]   ;;  %12321 = vst [vmem:[#allocation49_spill] sm:$0xff] %v10575_v63 }
 0x174   : > { %1067 = vmatpush1.bf16.msra.mxu0 %v8880_v56  ;;  %1086 = vmatprep.mubr.bf16.mxu0 %v12096_v5  ;;  %12308 = vst [vmem:[#allocation36_spill] sm:$0xff] %v10537_v50  ;;  %v10553_v56 = vld [vmem:[#allocation18 + $0x180] ss:$16 sps:$4 sm:$0xff]  }
 0x175   : > { %1068 = vmatprep.subr.bf16.mxu0 %v8886_v57  ;;  %12314 = vst [vmem:[#allocation42_spill] sm:$0xff] %v10553_v56  ;;  %v10555_v57 = vld [vmem:[#allocation18 + $0x188] ss:$16 sps:$4 sm:$0xff]   ;;  %v10589_v5 = vld [vmem:[#allocation18 + $0x1e0] ss:$16 sps:$4 sm:$0xff]  }
 0x176   : > { %8529 = vmatpush3.bf16.msra.mxu1 %v8892_v2  ;;  %12315 = vst [vmem:[#allocation43_spill] sm:$0xff] %v10555_v57  ;;  %v10585_v2 = vld [vmem:[#allocation18 + $0x1e4] ss:$16 sps:$4 sm:$0xff]   ;;  %12326 = vst [vmem:[#allocation54_spill] sm:$0xff] %v10589_v5 }
 0x177   : > { %8530 = vmatprep.subr.bf16.mxu1 %v12098_v40  ;;  %12324 = vst [vmem:[#allocation52_spill] sm:$0xff] %v10585_v2  ;;  %v10591_v40 = vld [vmem:[#allocation18 + $0x1e8] ss:$16 sps:$4 sm:$0xff]  }
 0x178   : > { %1069 = vmatpush1.bf16.msra.mxu0 %v8884_v60  ;;  %v10565_v60 = vld [vmem:[#allocation18 + $0x1a0] ss:$16 sps:$4 sm:$0xff]   ;;  %12327 = vst [vmem:[#allocation55_spill] sm:$0xff] %v10591_v40 }
 0x179   : > { %1591 = vmatprep.subr.bf16.mxu0 %v10405_v4  ;;  %12318 = vst [vmem:[#allocation46_spill] sm:$0xff] %v10565_v60 }
 0x17a   : > { %8531 = vmatpush3.bf16.msra.mxu1 %v8893_v3  ;;  %v10587_v3 = vld [vmem:[#allocation18 + $0x1ec] ss:$16 sps:$4 sm:$0xff]  }
 0x17b   : > { %1087 = vmatmul.mubr.bf16.vlgmr.msra.gmra.mrb[16].mxu0 %v893_v1  ;;  %1632 = vmatprep.subr.bf16.mxu1 %v10407_v6  ;;  %12325 = vst [vmem:[#allocation53_spill] sm:$0xff] %v10587_v3 }
 0x17c   : > { %1592 = vmatpush1.bf16.msra.mxu0 %v10409_v7 }
 0x17d   : > { %8533 = vmatmul.mubr.bf16.vlgmr.msra.gmra.mrb[8].mxu1 %v893_v1  ;;  %1593 = vmatprep.subr.bf16.mxu0 %v10419_v10  ;;  %v10579_v1 = vld [vmem:[#allocation18 + $0x1c8] ss:$16 sps:$4 sm:$0xff]  }
 0x17e   : > { %1633 = vmatpush1.bf16.msra.mxu1 %v10411_v8  ;;  %12323 = vst [vmem:[#allocation51_spill] sm:$0xff] %v10579_v1 }
 0x17f   : > { %1634 = vmatprep.subr.bf16.mxu1 %v10423_v12 }
 0x180   : > { %1594 = vmatpush1.bf16.msra.mxu0 %v10417_v9 }
 0x181   : > { %1595 = vmatprep.subr.bf16.mxu0 %v10429_v13 }
 0x182   : > { %1635 = vmatpush1.bf16.msra.mxu1 %v10421_v11 }
 0x183   : > { %1636 = vmatprep.subr.bf16.mxu1 %v10431_v14 }
 0x184   : > { %1596 = vmatpush1.bf16.msra.mxu0 %v10433_v15 }
 0x185   : > { %1597 = vmatprep.subr.bf16.mxu0 %v10443_v18 }
 0x186   : > { %1637 = vmatpush1.bf16.msra.mxu1 %v10435_v16 }
 0x187   : > { %1638 = vmatprep.subr.bf16.mxu1 %v10447_v20 }
 0x188   : > { %1598 = vmatpush1.bf16.msra.mxu0 %v10441_v17 }
 0x189   : > { %1599 = vmatprep.subr.bf16.mxu0 %v10453_v21 }
 0x18a   : > { %1639 = vmatpush1.bf16.msra.mxu1 %v10445_v19 }
 0x18b   : > { %1640 = vmatprep.subr.bf16.mxu1 %v10455_v22 }
 0x18c   : > { %1600 = vmatpush1.bf16.msra.mxu0 %v10457_v23 }
 0x18d   : > { %1601 = vmatprep.subr.bf16.mxu0 %v10465_v25 }
 0x18e   : > { %1641 = vmatpush1.bf16.msra.mxu1 %v10459_v24 }
 0x18f   : > { %1642 = vmatprep.subr.bf16.mxu1 %v10467_v26 }
 0x190   : > { %1602 = vmatpush1.bf16.msra.mxu0 %v10469_v27 }
 0x191   : > { %1603 = vmatprep.subr.bf16.mxu0 %v10477_v29 }
 0x192   : > { %1643 = vmatpush1.bf16.msra.mxu1 %v10471_v28 }
 0x193   : > { %1644 = vmatprep.subr.bf16.mxu1 %v10479_v30 }
 0x194   : > { %1604 = vmatpush1.bf16.msra.mxu0 %v10481_v31 }
 0x195   : > { %1605 = vmatprep.subr.bf16.mxu0 %v10489_v33 }
 0x196   : > { %1645 = vmatpush1.bf16.msra.mxu1 %v10483_v32 }
 0x197   : > { %1646 = vmatprep.subr.bf16.mxu1 %v10491_v34 }
 0x198   : > { %1606 = vmatpush1.bf16.msra.mxu0 %v10493_v35 }
 0x199   : > { %1607 = vmatprep.subr.bf16.mxu0 %v10501_v37 }
 0x19a   : > { %1647 = vmatpush1.bf16.msra.mxu1 %v10495_v36 }
 0x19b   : > { %1648 = vmatprep.subr.bf16.mxu1 %v10503_v38 }
 0x19c   : > { %1608 = vmatpush1.bf16.msra.mxu0 %v10505_v39 }
 0x19d   : > { %1609 = vmatprep.subr.bf16.mxu0 %v10514_v43 }
 0x19e   : > { %1649 = vmatpush1.bf16.msra.mxu1 %v10507_v41 }
 0x19f   : > { %1650 = vmatprep.subr.bf16.mxu1 %v10519_v45 }
 0x1a0   : > { %1610 = vmatpush1.bf16.msra.mxu0 %v10512_v42 }
 0x1a1   : > { %1611 = vmatprep.subr.bf16.mxu0 %v10525_v46 }
 0x1a2   : > { %1651 = vmatpush1.bf16.msra.mxu1 %v10517_v44 }
 0x1a3   : > { %1652 = vmatprep.subr.bf16.mxu1 %v10527_v47 }
 0x1a4   : > { %1612 = vmatpush1.bf16.msra.mxu0 %v10529_v48 }
 0x1a5   : > { %1613 = vmatprep.subr.bf16.mxu0 %v10537_v50 }
 0x1a6   : > { %1653 = vmatpush1.bf16.msra.mxu1 %v10531_v49 }
 0x1a7   : > { %1654 = vmatprep.subr.bf16.mxu1 %v10539_v51 }
 0x1a8   : > { %1614 = vmatpush1.bf16.msra.mxu0 %v10541_v52 }
 0x1a9   : > { %1615 = vmatprep.subr.bf16.mxu0 %v10549_v54 }
 0x1aa   : > { %1655 = vmatpush1.bf16.msra.mxu1 %v10543_v53 }
 0x1ab   : > { %1656 = vmatprep.subr.bf16.mxu1 %v10551_v55 }
 0x1ac   : > { %1616 = vmatpush1.bf16.msra.mxu0 %v10553_v56 }
 0x1ad   : > { %1617 = vmatprep.subr.bf16.mxu0 %v10561_v58 }
 0x1ae   : > { %1657 = vmatpush1.bf16.msra.mxu1 %v10555_v57 }
 0x1af   : > { %1658 = vmatprep.subr.bf16.mxu1 %v10563_v59 }
 0x1b0   : > { %1618 = vmatpush1.bf16.msra.mxu0 %v10565_v60 }
 0x1b1   : > { %1619 = vmatprep.subr.bf16.mxu0 %v10573_v62  ;;  %v10596_v62 = vld [vmem:[#allocation22 + $0x8] sm:$0xff] }
 0x1b2   : > { %1659 = vmatpush1.bf16.msra.mxu1 %v10567_v61  ;;  %12328 = vst [vmem:[#allocation56_spill] sm:$0xff] %v10596_v62  ;;  %v559_v61 = vlaneseq }
 0x1b3   : > { %1660 = vmatprep.subr.bf16.mxu1 %v10575_v63  ;;  %v12329_v63 = vmov 0.0  }
 0x1b4   : > { %1620 = vmatpush1.bf16.msra.mxu0 %v10577_v0  ;;  %v9566_v0 = vld [vmem:[#allocation15 + $0x4] ss:$12 sps:$4 sm:$0xff]   ;;  %v10602_v60 = vshrl.u32 %v559_v61, 7 }
 0x1b5   : > { %1621 = vmatprep.subr.bf16.mxu0 %v10585_v2 }
 0x1b6   : > { %1661 = vmatpush1.bf16.msra.mxu1 %v10579_v1  ;;  %v8393_v1 = vpack.c.bf16 %v10596_v62, %v10596_v62  ;;  %12330 = vst [vmem:[#allocation57_spill] sm:$0xff] %v10602_v60  ;;  %v10608_v2 = vsub.s32 1, %v10602_v60  ;;  %v10615_v61 = vsub.s32 2, %v10602_v60 }
 0x1b7   : > { %1662 = vmatprep.subr.bf16.mxu1 %v10587_v3  ;;  %v10605_v3 = vsub.s32 0, %v10602_v60 }
 0x1b8   : > { %1622 = vmatpush1.bf16.msra.mxu0 %v10589_v5  ;;  %1623 = vmatprep.mubr.bf16.mxu0 %v8393_v1  ;;  %v557_v5 = vld [vmem:[#allocation14] sm:$0x7]  ;;  %12332 = vst [vmem:[#allocation59_spill] sm:$0xff] %v10608_v2  ;;  %12334 = vst [vmem:[#allocation61_spill] sm:$0xff] %v10615_v61 }
 0x1b9   : > { %1858 = vmatprep.subr.bf16.mxu0 %v9566_v0  ;;  %1664 = vmatprep.mubr.bf16.mxu1 %v8393_v1  ;;  %12331 = vst [vmem:[#allocation58_spill] sm:$0xff] %v10605_v3  ;;  %v562_v59 = vrot.slane %v557_v5, %v10605_v3  ;;  %v566_v0 = vrot.slane %v557_v5, %v10608_v2 }
 0x1ba   : > { %1663 = vmatpush1.bf16.msra.mxu1 %v10591_v40  ;;  %v10620_v55 = vrot.slane %v557_v5, %v10615_v61 }
 0x1bb   : > { %8536 = vmatprep.subr.bf16.mxu1 %v12329_v63 }
 0x22e   : > { %v760_v40 = vpop.f32.mrb[0].mxu0 }
 0x22f   : > { %v762_v62 = vpop.f32.mrb[1].mxu0 }
 0x230   : > { %v764_v58 = vpop.f32.mrb[2].mxu0  ;;  %v8510_v2 = vpop.f32.mrb[0].mxu1  ;;  %v763_v49 = vadd.f32 %v762_v62, %v566_v0 }
 0x231   : > { %v10612_v57 = vadd.f32 %v764_v58, %v562_v59  ;;  %v766_v1 = vpop.f32.mrb[3].mxu0  ;;  %v833_v60 = vpop.f32.mrb[1].mxu1 }
 0x232   : > { %v10617_v56 = vadd.f32 %v766_v1, %v566_v0 }
 0x233   : > { %12333 = vst [vmem:[#allocation60_spill] sm:$0xff] %v10612_v57  ;;  %v10629_v57 = vadd.f32 %v8510_v2, %v10620_v55 }
 0x234   : > { %12335 = vst [vmem:[#allocation62_spill] sm:$0xff] %v10617_v56  ;;  %v8511_v56 = vpop.f32.mrb[2].mxu1 }
 0x235   : > { %12339 = vst [vmem:[#allocation66_spill] sm:$0xff] %v10629_v57  ;;  %v10634_v5 = vadd.f32 %v8511_v56, %v10620_v55 }
 0x236   : > { %v770_v54 = vpop.f32.mrb[4].mxu0 }
 0x237   : > { %v10622_v53 = vadd.f32 %v770_v54, %v562_v59  ;;  %v772_v52 = vpop.f32.mrb[5].mxu0  ;;  %12341 = vst [vmem:[#allocation68_spill] sm:$0xff] %v10634_v5  ;;  %v836_v54 = vpop.f32.mrb[3].mxu1 }
 0x238   : > { %v10624_v3 = vadd.f32 %v772_v52, %v566_v0  ;;  %v774_v51 = vpop.f32.mrb[6].mxu0  ;;  %v8514_v2 = vpop.f32.mrb[4].mxu1 }
 0x239   : > { %12336 = vst [vmem:[#allocation63_spill] sm:$0xff] %v10622_v53  ;;  %v10626_v50 = vadd.f32 %v774_v51, %v562_v59  ;;  %v776_v58 = vpop.f32.mrb[7].mxu0  ;;  %v10637_v53 = vadd.f32 %v836_v54, %v10620_v55  ;;  %v849_v56 = vpop.f32.mrb[5].mxu1 }
 0x23a   : > { %12337 = vst [vmem:[#allocation64_spill] sm:$0xff] %v10624_v3  ;;  %v10631_v1 = vadd.f32 %v776_v58, %v566_v0  ;;  %v10651_v54 = vadd.f32 %v849_v56, %v10620_v55 }
 0x23b   : > { %12338 = vst [vmem:[#allocation65_spill] sm:$0xff] %v10626_v50  ;;  %12342 = vst [vmem:[#allocation69_spill] sm:$0xff] %v10637_v53  ;;  %v8515_v53 = vpop.f32.mrb[6].mxu1 }
 0x23c   : > { %12340 = vst [vmem:[#allocation67_spill] sm:$0xff] %v10631_v1  ;;  %v10646_v1 = vadd.f32 %v8514_v2, %v10620_v55  ;;  %12348 = vst [vmem:[#allocation75_spill] sm:$0xff] %v10651_v54  ;;  %v761_v54 = vadd.f32 %v760_v40, %v562_v59  ;;  %v10667_v40 = vld [vmem:[#allocation17] ss:$0 sm:$0xff] }
 0x23e   : > { %v780_v52 = vpop.f32.mrb[8].mxu0  ;;  %12346 = vst [vmem:[#allocation73_spill] sm:$0xff] %v10646_v1 }
 0x23f   : > { %v10639_v3 = vadd.f32 %v780_v52, %v562_v59  ;;  %v782_v51 = vpop.f32.mrb[9].mxu0  ;;  %v10654_v52 = vadd.f32 %v8515_v53, %v10620_v55 }
 0x240   : > { %v10641_v50 = vadd.f32 %v782_v51, %v566_v0  ;;  %v784_v61 = vpop.f32.mrb[10].mxu0  ;;  %v852_v51 = vpop.f32.mrb[7].mxu1 }
 0x241   : > { %12343 = vst [vmem:[#allocation70_spill] sm:$0xff] %v10639_v3  ;;  %v10643_v57 = vadd.f32 %v784_v61, %v562_v59  ;;  %v786_v58 = vpop.f32.mrb[11].mxu0  ;;  %12349 = vst [vmem:[#allocation76_spill] sm:$0xff] %v10654_v52 }
 0x242   : > { %12344 = vst [vmem:[#allocation71_spill] sm:$0xff] %v10641_v50  ;;  %v10648_v5 = vadd.f32 %v786_v58, %v566_v0  ;;  %v10657_v50 = vadd.f32 %v852_v51, %v10620_v55 }
 0x243   : > { %12345 = vst [vmem:[#allocation72_spill] sm:$0xff] %v10643_v57 }
 0x244   : > { %12347 = vst [vmem:[#allocation74_spill] sm:$0xff] %v10648_v5  ;;  %12350 = vst [vmem:[#allocation77_spill] sm:$0xff] %v10657_v50 }
 0x246   : > { %v790_v61 = vpop.f32.mrb[12].mxu0 }
 0x247   : > { %v10659_v57 = vadd.f32 %v790_v61, %v562_v59  ;;  %v792_v3 = vpop.f32.mrb[13].mxu0 }
 0x248   : > { %v10661_v2 = vadd.f32 %v792_v3, %v566_v0  ;;  %v794_v1 = vpop.f32.mrb[14].mxu0 }
 0x249   : > { %12351 = vst [vmem:[#allocation78_spill] sm:$0xff] %v10659_v57  ;;  %v10663_v58 = vadd.f32 %v794_v1, %v562_v59  ;;  %v796_v5 = vpop.f32.mrb[15].mxu0 }
 0x24a   : > { %12352 = vst [vmem:[#allocation79_spill] sm:$0xff] %v10661_v2  ;;  %v10665_v56 = vadd.f32 %v796_v5, %v566_v0 }
 0x24b   : > { %12353 = vst [vmem:[#allocation80_spill] sm:$0xff] %v10663_v58 }
 0x24c   : > { %12354 = vst [vmem:[#allocation81_spill] sm:$0xff] %v10665_v56  ;;  %v10966_v56 = vld [vmem:[#allocation18 + $0x120] ss:$16 sps:$4 sm:$0xff]  }
 0x24e   : > { %v1088_v53 = vpop.f32.mrb[16].mxu0 }
 0x24f   : > { %v1138_v52 = vadd.f32 %v1088_v53, %v761_v54  ;;  %v1090_v48 = vpop.f32.mrb[17].mxu0 }
 0x250   : > { %v1145_v47 = vadd.f32 %v1090_v48, %v763_v49  ;;  %v1092_v51 = vpop.f32.mrb[18].mxu0  ;;  %v1129_v57 = vpop.f32.mrb[8].mxu1  ;;  %v834_v49 = vadd.f32 %v833_v60, %v10620_v55  ;;  %v8990_v55 = vld [vmem:[#allocation15 + $0x8] ss:$12 sps:$4 sm:$0xff]  }
 0x251   : > { %v7600_v50 = vmul.f32 -1.442695, %v1138_v52  ;;  %v1093_v46 = vpop.f32.mrb[19].mxu0  ;;  %v8534_v3 = vpop.f32.mrb[9].mxu1  ;;  %v1159_v62 = vadd.f32 %v10667_v40, %v1129_v57  ;;  %v9568_v51 = vld [vmem:[#allocation15] ss:$12 sps:$4 sm:$0xff]  }
 0x252   : > { %v7601_v61 = vmul.f32 -1.442695, %v1145_v47  ;;  %v1132_v2 = vpop.f32.mrb[10].mxu1  ;;  %v9569_v3 = vld [vmem:[#allocation15 + $0x1c] ss:$12 sps:$4 sm:$0xff]  }
 0x253   : > { %9406 = vpow2.f32 %v7600_v50  ;;  %v8535_v1 = vpop.f32.mrb[11].mxu1  ;;  %v9567_v2 = vld [vmem:[#allocation22] sm:$0xff] }
 0x254   : > { %9408 = vpow2.f32 %v7601_v61  ;;  %v8991_v61 = vld [vmem:[#allocation15 + $0x20] ss:$12 sps:$4 sm:$0xff]   ;;  %v12355_v1 = vmov 0  }
 0x25d   : > { %v9407_v58 = vpop.eup %9406 }
 0x25e   : > { %v1142_v44 = vadd.f32 1.0, %v9407_v58  ;;  %v9409_v5 = vpop.eup %9408 }
 0x25f   : > { %v1149_v59 = vadd.f32 1.0, %v9409_v5  ;;  %v9570_v5 = vld [vmem:[#allocation15 + $0x18] ss:$12 sps:$4 sm:$0xff]  }
 0x260   : > { %9410 = vrcp.f32 %v1142_v44  ;;  %v10671_v44 = vpop.permute.xlu0 %1169 }
 0x261   : > { %9412 = vrcp.f32 %v1149_v59  ;;  %vm1171_vm5 = vcmp.eq.s32.totalorder %v10671_v44, 1  ;;  %v8992_v59 = vld [vmem:[#allocation15 + $0x38] ss:$12 sps:$4 sm:$0xff]  }
 0x26a   : > { %v9411_v48 = vpop.eup %9410 }
 0x26b   : > { %v1160_v46 = vmul.f32 %v9411_v48, %v1159_v62  ;;  %v9413_v50 = vpop.eup %9412  ;;  %v9571_v62 = vld [vmem:[#allocation15 + $0x34] ss:$12 sps:$4 sm:$0xff]   ;;  %v9572_v48 = vld [vmem:[#allocation15 + $0x30] ss:$12 sps:$4 sm:$0xff]  }
 0x26c   : > { %v1163_v0 = vsub.f32 1.0, %v9413_v50  ;;  %v1165_v58 = vmul.f32 %v9567_v2, %v9413_v50  ;;  %v8994_v50 = vld [vmem:[#allocation15 + $0x68] ss:$12 sps:$4 sm:$0xff]  }
 0x26d   : > { %v1161_v47 = vadd.f32 %v1160_v46, %v834_v49  ;;  %v8993_v49 = vld [vmem:[#allocation15 + $0x50] ss:$12 sps:$4 sm:$0xff]   ;;  %v9573_v46 = vld [vmem:[#allocation15 + $0x4c] ss:$12 sps:$4 sm:$0xff]  }
 0x26f   : > { %9414 = vtanh.f32 %v1161_v47  ;;  %v9574_v47 = vld [vmem:[#allocation15 + $0x48] ss:$12 sps:$4 sm:$0xff]  }
 0x279   : > { %v9415_v54 = vpop.eup %9414 }
 0x27a   : > { %v1164_v52 = vmul.f32 %v9415_v54, %v1163_v0  ;;  %v9575_v0 = vld [vmem:[#allocation15 + $0x64] ss:$12 sps:$4 sm:$0xff]   ;;  %v9576_v54 = vld [vmem:[#allocation15 + $0x60] ss:$12 sps:$4 sm:$0xff]  }
 0x27c   : > { %v1166_v53 = vadd.f32 %v1165_v58, %v1164_v52  ;;  %v8995_v52 = vld [vmem:[#allocation15 + $0x80] ss:$12 sps:$4 sm:$0xff]   ;;  %v9578_v58 = vld [vmem:[#allocation15 + $0x78] ss:$12 sps:$4 sm:$0xff]  }
 0x27e   : > { %v10676_v57 = vsel %vm1171_vm5, %v1166_v53, %v9567_v2  ;;  %v9577_v2 = vld [vmem:[#allocation15 + $0x7c] ss:$12 sps:$4 sm:$0xff]   ;;  %v8996_v53 = vld [vmem:[#allocation15 + $0x98] ss:$12 sps:$4 sm:$0xff]  }
 0x27f   : > { %v1173_v60 = vpack.c.bf16 %v10676_v57, %v10676_v57 }
 0x281   : > { %1624 = vmatmul.mubr.bf16.vlgmr.msra.gmra.mrb[20].mxu0 %v1173_v60  ;;  %1665 = vmatmul.mubr.bf16.vlgmr.msra.gmra.mrb[12].mxu1 %v1173_v60 }
 0x282   : > { %1859 = vmatpush1.bf16.msra.mxu0 %v9568_v51  ;;  %8537 = vmatpush3.bf16.msra.mxu1 %v8990_v55  ;;  %v9579_v55 = vld [vmem:[#allocation15 + $0x94] ss:$12 sps:$4 sm:$0xff]   ;;  %v9580_v51 = vld [vmem:[#allocation15 + $0x90] ss:$12 sps:$4 sm:$0xff]  }
 0x283   : > { %1860 = vmatprep.subr.bf16.mxu0 %v9569_v3  ;;  %8538 = vmatprep.subr.bf16.mxu1 %v12329_v63  ;;  %v9581_v3 = vld [vmem:[#allocation15 + $0xac] ss:$12 sps:$4 sm:$0xff]  }
 0x284   : > { %1890 = vmatprep.mubr.bf16.mxu0 %v12355_v1  ;;  %8552 = vmatprep.mubr.msk.bf16.mxu1 %vm9972_vm2, %v12329_v63 }
 0x286   : > { %1861 = vmatpush1.bf16.msra.mxu0 %v9570_v5  ;;  %8539 = vmatpush3.bf16.msra.mxu1 %v8991_v61  ;;  %v8997_v61 = vld [vmem:[#allocation15 + $0xb0] ss:$12 sps:$4 sm:$0xff]   ;;  %v9582_v5 = vld [vmem:[#allocation15 + $0xa8] ss:$12 sps:$4 sm:$0xff]  }
 0x287   : > { %1862 = vmatprep.subr.bf16.mxu0 %v9571_v62  ;;  %8540 = vmatprep.subr.bf16.mxu1 %v12329_v63 }
 0x28a   : > { %1863 = vmatpush1.bf16.msra.mxu0 %v9572_v48  ;;  %8541 = vmatpush3.bf16.msra.mxu1 %v8992_v59 }
 0x28b   : > { %1864 = vmatprep.subr.bf16.mxu0 %v9573_v46  ;;  %8542 = vmatprep.subr.bf16.mxu1 %v12329_v63 }
 0x28e   : > { %1865 = vmatpush1.bf16.msra.mxu0 %v9574_v47  ;;  %8543 = vmatpush3.bf16.msra.mxu1 %v8993_v49 }
 0x28f   : > { %1866 = vmatprep.subr.bf16.mxu0 %v9575_v0  ;;  %8544 = vmatprep.subr.bf16.mxu1 %v12329_v63 }
 0x292   : > { %1867 = vmatpush1.bf16.msra.mxu0 %v9576_v54  ;;  %8545 = vmatpush3.bf16.msra.mxu1 %v8994_v50 }
 0x293   : > { %1868 = vmatprep.subr.bf16.mxu0 %v9577_v2  ;;  %8546 = vmatprep.subr.bf16.mxu1 %v12329_v63 }
 0x296   : > { %1869 = vmatpush1.bf16.msra.mxu0 %v9578_v58  ;;  %8547 = vmatpush3.bf16.msra.mxu1 %v8995_v52 }
 0x297   : > { %1870 = vmatprep.subr.bf16.mxu0 %v9579_v55  ;;  %8548 = vmatprep.subr.bf16.mxu1 %v12329_v63 }
 0x29a   : > { %1871 = vmatpush1.bf16.msra.mxu0 %v9580_v51  ;;  %8549 = vmatpush3.bf16.msra.mxu1 %v8996_v53  ;;  %v12383_v51 = vld [vmem:[#allocation57_spill] sm:$0xff] }
 0x29b   : > { %1872 = vmatprep.subr.bf16.mxu0 %v9581_v3  ;;  %8550 = vmatprep.subr.bf16.mxu1 %v12329_v63 }
 0x29e   : > { %1873 = vmatpush1.bf16.msra.mxu0 %v9582_v5  ;;  %8551 = vmatpush3.bf16.msra.mxu1 %v8997_v61  ;;  %v10769_v61 = vsub.s32 3, %v12383_v51  ;;  %v10804_v51 = vld [vmem:[#allocation15 + $0x18] ss:$12 sps:$4 sm:$0xff]  }
 0x29f   : > { %2395 = vmatprep.subr.bf16.mxu0 %v10405_v4  ;;  %2436 = vmatprep.subr.bf16.mxu1 %v10407_v6  ;;  %v12356_v4 = vld [vmem:[#allocation31_spill] sm:$0xff]  ;;  %v12357_v6 = vld [vmem:[#allocation32_spill] sm:$0xff] }
 0x2a0   : > { %12384 = vst [vmem:[#allocation31_spill] sm:$0xff] %v10769_v61 }
 0x2a1   : > { %1891 = vmatmul.mubr.bf16.vlgmr.msra.gmra.mrb[24].mxu0 %v1173_v60  ;;  %8553 = vmatmul.mubr.bf16.vlgmr.msra.gmra.mrb[16].mxu1 %v1173_v60  ;;  %v12382_v60 = vld [vmem:[#allocation59_spill] sm:$0xff] }
 0x2a2   : > { %2396 = vmatpush1.bf16.msra.mxu0 %v10409_v7  ;;  %2437 = vmatpush1.bf16.msra.mxu1 %v10411_v8  ;;  %v12358_v7 = vld [vmem:[#allocation33_spill] sm:$0xff]  ;;  %v12359_v8 = vld [vmem:[#allocation34_spill] sm:$0xff] }
 0x2a3   : > { %2397 = vmatprep.subr.bf16.mxu0 %v10419_v10  ;;  %2438 = vmatprep.subr.bf16.mxu1 %v10423_v12  ;;  %v12361_v10 = vld [vmem:[#allocation36_spill] sm:$0xff]  ;;  %v12363_v12 = vld [vmem:[#allocation38_spill] sm:$0xff] }
 0x2a6   : > { %2398 = vmatpush1.bf16.msra.mxu0 %v10417_v9  ;;  %2439 = vmatpush1.bf16.msra.mxu1 %v10421_v11  ;;  %v12360_v9 = vld [vmem:[#allocation35_spill] sm:$0xff]  ;;  %v12362_v11 = vld [vmem:[#allocation37_spill] sm:$0xff] }
 0x2a7   : > { %2399 = vmatprep.subr.bf16.mxu0 %v10429_v13  ;;  %2440 = vmatprep.subr.bf16.mxu1 %v10431_v14  ;;  %v12364_v13 = vld [vmem:[#allocation39_spill] sm:$0xff]  ;;  %v12365_v14 = vld [vmem:[#allocation40_spill] sm:$0xff] }
 0x2aa   : > { %2400 = vmatpush1.bf16.msra.mxu0 %v10433_v15  ;;  %2441 = vmatpush1.bf16.msra.mxu1 %v10435_v16  ;;  %v12366_v15 = vld [vmem:[#allocation41_spill] sm:$0xff]  ;;  %v12367_v16 = vld [vmem:[#allocation42_spill] sm:$0xff] }
 0x2ab   : > { %2401 = vmatprep.subr.bf16.mxu0 %v10443_v18  ;;  %2442 = vmatprep.subr.bf16.mxu1 %v10447_v20  ;;  %v12369_v18 = vld [vmem:[#allocation44_spill] sm:$0xff]  ;;  %v12371_v20 = vld [vmem:[#allocation46_spill] sm:$0xff] }
 0x2ae   : > { %2402 = vmatpush1.bf16.msra.mxu0 %v10441_v17  ;;  %2443 = vmatpush1.bf16.msra.mxu1 %v10445_v19  ;;  %v12368_v17 = vld [vmem:[#allocation43_spill] sm:$0xff]  ;;  %v12370_v19 = vld [vmem:[#allocation45_spill] sm:$0xff] }
 0x2af   : > { %2403 = vmatprep.subr.bf16.mxu0 %v10453_v21  ;;  %2444 = vmatprep.subr.bf16.mxu1 %v10455_v22  ;;  %v12372_v21 = vld [vmem:[#allocation47_spill] sm:$0xff]  ;;  %v12373_v22 = vld [vmem:[#allocation48_spill] sm:$0xff] }
 0x2b2   : > { %2404 = vmatpush1.bf16.msra.mxu0 %v10457_v23  ;;  %2445 = vmatpush1.bf16.msra.mxu1 %v10459_v24  ;;  %v12374_v23 = vld [vmem:[#allocation49_spill] sm:$0xff]  ;;  %v12375_v24 = vld [vmem:[#allocation50_spill] sm:$0xff] }
 0x2b3   : > { %2405 = vmatprep.subr.bf16.mxu0 %v10465_v25  ;;  %2446 = vmatprep.subr.bf16.mxu1 %v10467_v26  ;;  %v12376_v25 = vld [vmem:[#allocation51_spill] sm:$0xff]  ;;  %v12377_v26 = vld [vmem:[#allocation52_spill] sm:$0xff]  ;;  %12408 = vst [vmem:[#allocation50_spill] sm:$0xff] %v10966_v56 }
 0x2b6   : > { %2406 = vmatpush1.bf16.msra.mxu0 %v10469_v27  ;;  %2447 = vmatpush1.bf16.msra.mxu1 %v10471_v28  ;;  %v12378_v27 = vld [vmem:[#allocation53_spill] sm:$0xff]  ;;  %v12379_v28 = vld [vmem:[#allocation54_spill] sm:$0xff] }
 0x2b7   : > { %2407 = vmatprep.subr.bf16.mxu0 %v10477_v29  ;;  %2448 = vmatprep.subr.bf16.mxu1 %v10479_v30  ;;  %v12380_v29 = vld [vmem:[#allocation55_spill] sm:$0xff]  ;;  %v10755_v30 = vld [vmem:[#allocation15 + $0x4] ss:$12 sps:$4 sm:$0xff]  }
 0x2ba   : > { %2408 = vmatpush1.bf16.msra.mxu0 %v10481_v31  ;;  %2449 = vmatpush1.bf16.msra.mxu1 %v10483_v32  ;;  %v2501_v31 = vstv %s2500_s0  ;;  %v3306_v32 = vstv %s3305_s16 }
 0x2bb   : > { %2409 = vmatprep.subr.bf16.mxu0 %v10489_v33  ;;  %2450 = vmatprep.subr.bf16.mxu1 %v10491_v34  ;;  %v9583_v33 = vld [vmem:[#allocation9] sm:$0xff] }
 0x2bc   : > { %vm2502_vm6 = vcmp.lt.s32.totalorder %v2501_v31, %v9583_v33  ;;  %vm3307_vm7 = vcmp.lt.s32.totalorder %v3306_v32, %v9583_v33  ;;  %v12388_v32 = vld [vmem:[#allocation56_spill] sm:$0xff] }
 0x2bd   : > { %v2776_v34 = vsel %vm2502_vm6, 1, %v12355_v1 }
 0x2be   : > { %2410 = vmatpush1.bf16.msra.mxu0 %v10493_v35  ;;  %2451 = vmatpush1.bf16.msra.mxu1 %v10495_v36  ;;  %v4916_v35 = vstv %s4915_s27  ;;  %v3581_v36 = vsel %vm3307_vm7, 1, %v12355_v1 }
 0x2bf   : > { %2411 = vmatprep.subr.bf16.mxu0 %v10501_v37  ;;  %2452 = vmatprep.subr.bf16.mxu1 %v10503_v38  ;;  %vm4917_vm8 = vcmp.lt.s32.totalorder %v4916_v35, %v9583_v33  ;;  %v1242_v37 = vld [vmem:[#allocation20] sm:$0xf]  ;;  %v6526_v38 = vstv %s6525_s6 }
 0x2c0   : > { %2778 = vperm.xlu1 %8825, %v2776_v34   ;;  %vm6527_vm9 = vcmp.lt.s32.totalorder %v6526_v38, %v9583_v33  ;;  %v1251_v59 = vrot.slane %v1242_v37, %v12382_v60  ;;  %v1259_v5 = vrot.slane %v1242_v37, %v10769_v61 }
 0x2c1   : > { %v6801_v62 = vsel %vm6527_vm9, 1, %v12355_v1 }
 0x2c2   : > { %2412 = vmatpush1.bf16.msra.mxu0 %v10505_v39  ;;  %2453 = vmatpush1.bf16.msra.mxu1 %v10507_v41  ;;  %v5191_v39 = vsel %vm4917_vm8, 1, %v12355_v1  ;;  %v12381_v41 = vld [vmem:[#allocation58_spill] sm:$0xff] }
 0x2c3   : > { %2413 = vmatprep.subr.bf16.mxu0 %v10514_v43  ;;  %2454 = vmatprep.subr.bf16.mxu1 %v10519_v45 }
 0x2c4   : > { %3583 = vperm.xlu1 %8825, %v3581_v36  }
 0x2c6   : > { %2414 = vmatpush1.bf16.msra.mxu0 %v10512_v42  ;;  %2455 = vmatpush1.bf16.msra.mxu1 %v12356_v4  ;;  %v1247_v42 = vrot.slane %v1242_v37, %v12381_v41  ;;  %v12385_v4 = vld [vmem:[#allocation61_spill] sm:$0xff] }
 0x2c7   : > { %2415 = vmatprep.subr.bf16.mxu0 %v12357_v6  ;;  %2456 = vmatprep.subr.bf16.mxu1 %v12358_v7  ;;  %v1255_v6 = vrot.slane %v1242_v37, %v12385_v4 }
 0x2c8   : > { %5193 = vperm.xlu1 %8825, %v5191_v39  }
 0x2ca   : > { %2416 = vmatpush1.bf16.msra.mxu0 %v12359_v8  ;;  %2457 = vmatpush1.bf16.msra.mxu1 %v12360_v9 }
 0x2cb   : > { %2417 = vmatprep.subr.bf16.mxu0 %v12361_v10  ;;  %2458 = vmatprep.subr.bf16.mxu1 %v12362_v11 }
 0x2cc   : > { %6803 = vperm.xlu1 %8825, %v6801_v62  }
 0x2ce   : > { %2418 = vmatpush1.bf16.msra.mxu0 %v12363_v12  ;;  %2459 = vmatpush1.bf16.msra.mxu1 %v12364_v13 }
 0x2cf   : > { %2419 = vmatprep.subr.bf16.mxu0 %v12365_v14  ;;  %2460 = vmatprep.subr.bf16.mxu1 %v12366_v15  ;;  %v12386_v15 = vld [vmem:[#allocation60_spill] sm:$0xff] }
 0x2d2   : > { %2420 = vmatpush1.bf16.msra.mxu0 %v12367_v16  ;;  %2461 = vmatpush1.bf16.msra.mxu1 %v12368_v17 }
 0x2d3   : > { %2421 = vmatprep.subr.bf16.mxu0 %v12369_v18  ;;  %2462 = vmatprep.subr.bf16.mxu1 %v12370_v19  ;;  %v12387_v19 = vld [vmem:[#allocation62_spill] sm:$0xff] }
 0x2d6   : > { %2422 = vmatpush1.bf16.msra.mxu0 %v12371_v20  ;;  %2463 = vmatpush1.bf16.msra.mxu1 %v12372_v21 }
 0x2d7   : > { %2423 = vmatprep.subr.bf16.mxu0 %v12373_v22  ;;  %2464 = vmatprep.subr.bf16.mxu1 %v12374_v23 }
 0x2da   : > { %2424 = vmatpush1.bf16.msra.mxu0 %v12375_v24  ;;  %2465 = vmatpush1.bf16.msra.mxu1 %v12376_v25 }
 0x2db   : > { %2425 = vmatprep.subr.bf16.mxu0 %v12377_v26  ;;  %2466 = vmatprep.subr.bf16.mxu1 %v12378_v27 }
 0x2de   : > { %2426 = vmatpush1.bf16.msra.mxu0 %v12379_v28  ;;  %2467 = vmatpush1.bf16.msra.mxu1 %v12380_v29 }
 0x2df   : > { %8556 = vmatprep.subr.bf16.mxu1 %v12329_v63  ;;  %2663 = vmatprep.subr.bf16.mxu0 %v10755_v30 }
 0x354   : > { %v1625_v43 = vpop.f32.mrb[20].mxu0  ;;  %v1666_v45 = vpop.f32.mrb[12].mxu1 }
 0x355   : > { %v1626_v48 = vadd.f32 %v1625_v43, %v1247_v42  ;;  %v1627_v49 = vpop.f32.mrb[21].mxu0  ;;  %v1668_v46 = vpop.f32.mrb[13].mxu1  ;;  %v1667_v10 = vadd.f32 %v1666_v45, %v1255_v6  ;;  %v9009_v6 = vld [vmem:[#allocation15 + $0x38] ss:$12 sps:$4 sm:$0xff]  }
 0x356   : > { %v1629_v47 = vpop.f32.mrb[22].mxu0  ;;  %v1670_v50 = vpop.f32.mrb[14].mxu1  ;;  %v1628_v2 = vadd.f32 %v1627_v49, %v1251_v59  ;;  %v1669_v8 = vadd.f32 %v1668_v46, %v1259_v5  ;;  %v10814_v5 = vld [vmem:[#allocation15 + $0x30] ss:$12 sps:$4 sm:$0xff]  }
 0x357   : > { %v7669_v0 = vmul.f32 -1.442695, %v1626_v48  ;;  %v1630_v54 = vpop.f32.mrb[23].mxu0  ;;  %v1671_v52 = vpop.f32.mrb[15].mxu1  ;;  %v12389_v48 = vld [vmem:[#allocation69_spill] sm:$0xff] }
 0x358   : > { %v7670_v58 = vmul.f32 -1.442695, %v1628_v2  ;;  %v10789_v54 = vpop.permute.xlu0 %1973  ;;  %v10792_v2 = vld [vmem:[#allocation15] ss:$12 sps:$4 sm:$0xff]  }
 0x359   : > { %9416 = vpow2.f32 %v7669_v0  ;;  %vm1975_vm10 = vcmp.eq.s32.totalorder %v10789_v54, 1 }
 0x35a   : > { %9418 = vpow2.f32 %v7670_v58  ;;  %v9001_v58 = vld [vmem:[#allocation15 + $0x8] ss:$12 sps:$4 sm:$0xff]  }
 0x363   : > { %v9417_v53 = vpop.eup %9416 }
 0x364   : > { %v1676_v55 = vadd.f32 1.0, %v9417_v53  ;;  %v9419_v3 = vpop.eup %9418 }
 0x365   : > { %v1682_v7 = vadd.f32 1.0, %v9419_v3  ;;  %v9005_v3 = vld [vmem:[#allocation15 + $0x20] ss:$12 sps:$4 sm:$0xff]  }
 0x366   : > { %9420 = vrcp.f32 %v1676_v55  ;;  %v10801_v55 = vld [vmem:[#allocation15 + $0x1c] ss:$12 sps:$4 sm:$0xff]  }
 0x367   : > { %9422 = vrcp.f32 %v1682_v7  ;;  %v10818_v7 = vld [vmem:[#allocation15 + $0x4c] ss:$12 sps:$4 sm:$0xff]  }
 0x370   : > { %v9421_v9 = vpop.eup %9420 }
 0x371   : > { %v1685_v11 = vmul.f32 %v9421_v9, %v1669_v8  ;;  %v9423_v26 = vpop.eup %9422  ;;  %v10821_v8 = vld [vmem:[#allocation15 + $0x48] ss:$12 sps:$4 sm:$0xff]   ;;  %v9013_v9 = vld [vmem:[#allocation15 + $0x50] ss:$12 sps:$4 sm:$0xff]  }
 0x372   : > { %v1688_v28 = vsub.f32 1.0, %v9423_v26  ;;  %v1690_v33 = vmul.f32 %v9423_v26, %v12388_v32  ;;  %v10866_v26 = vld [vmem:[#allocation18 + $0x24] ss:$16 sps:$4 sm:$0xff]  }
 0x373   : > { %v1686_v12 = vadd.f32 %v1685_v11, %v1667_v10  ;;  %v10825_v10 = vld [vmem:[#allocation15 + $0x64] ss:$12 sps:$4 sm:$0xff]   ;;  %v10828_v11 = vld [vmem:[#allocation15 + $0x60] ss:$12 sps:$4 sm:$0xff]  }
 0x374   : > { %v1892_v13 = vpop.f32.mrb[24].mxu0  ;;  %v1933_v14 = vpop.f32.mrb[16].mxu1 }
 0x375   : > { %9424 = vtanh.f32 %v1686_v12  ;;  %v1942_v16 = vadd.f32 %v1892_v13, %v12386_v15  ;;  %v1894_v17 = vpop.f32.mrb[25].mxu0  ;;  %v8554_v18 = vpop.f32.mrb[17].mxu1  ;;  %v1963_v45 = vadd.f32 %v10667_v40, %v1933_v14  ;;  %v9017_v12 = vld [vmem:[#allocation15 + $0x68] ss:$12 sps:$4 sm:$0xff]   ;;  %v10835_v14 = vld [vmem:[#allocation15 + $0x78] ss:$12 sps:$4 sm:$0xff]  }
 0x376   : > { %v1949_v20 = vadd.f32 %v1894_v17, %v12387_v19  ;;  %v1896_v21 = vpop.f32.mrb[26].mxu0  ;;  %v1936_v22 = vpop.f32.mrb[18].mxu1  ;;  %v10832_v13 = vld [vmem:[#allocation15 + $0x7c] ss:$12 sps:$4 sm:$0xff]   ;;  %v9021_v15 = vld [vmem:[#allocation15 + $0x80] ss:$12 sps:$4 sm:$0xff]  }
 0x377   : > { %v7695_v23 = vmul.f32 -1.442695, %v1942_v16  ;;  %v1897_v24 = vpop.f32.mrb[27].mxu0  ;;  %v8555_v25 = vpop.f32.mrb[19].mxu1  ;;  %v10839_v16 = vld [vmem:[#allocation15 + $0x94] ss:$12 sps:$4 sm:$0xff]  }
 0x378   : > { %v7696_v27 = vmul.f32 -1.442695, %v1949_v20  ;;  %v10842_v17 = vld [vmem:[#allocation15 + $0x90] ss:$12 sps:$4 sm:$0xff]   ;;  %v9025_v18 = vld [vmem:[#allocation15 + $0x98] ss:$12 sps:$4 sm:$0xff]  }
 0x379   : > { %9426 = vpow2.f32 %v7695_v23  ;;  %v10846_v19 = vld [vmem:[#allocation15 + $0xac] ss:$12 sps:$4 sm:$0xff]   ;;  %v10849_v20 = vld [vmem:[#allocation15 + $0xa8] ss:$12 sps:$4 sm:$0xff]   ;;  %v9029_v21 = vld [vmem:[#allocation15 + $0xb0] ss:$12 sps:$4 sm:$0xff]  }
 0x37a   : > { %9428 = vpow2.f32 %v7696_v27  ;;  %v10854_v22 = vld [vmem:[#allocation18 + $0x4] ss:$16 sps:$4 sm:$0xff]   ;;  %v10856_v23 = vld [vmem:[#allocation18 + $0xc] ss:$16 sps:$4 sm:$0xff]   ;;  %v10858_v24 = vld [vmem:[#allocation18] ss:$16 sps:$4 sm:$0xff]  }
 0x37b   : > { %v10860_v25 = vld [vmem:[#allocation18 + $0x8] ss:$16 sps:$4 sm:$0xff]   ;;  %v10868_v27 = vld [vmem:[#allocation18 + $0x2c] ss:$16 sps:$4 sm:$0xff]  }
 0x37f   : > { %v9425_v29 = vpop.eup %9424 }
 0x380   : > { %v1689_v31 = vmul.f32 %v9425_v29, %v1688_v28  ;;  %v10870_v28 = vld [vmem:[#allocation18 + $0x20] ss:$16 sps:$4 sm:$0xff]   ;;  %v10872_v29 = vld [vmem:[#allocation18 + $0x28] ss:$16 sps:$4 sm:$0xff]  }
 0x382   : > { %v1691_v34 = vadd.f32 %v1690_v33, %v1689_v31  ;;  %v10878_v31 = vld [vmem:[#allocation18 + $0x44] ss:$16 sps:$4 sm:$0xff]   ;;  %v10882_v33 = vld [vmem:[#allocation18 + $0x40] ss:$16 sps:$4 sm:$0xff]  }
 0x383   : > { %v9427_v35 = vpop.eup %9426 }
 0x384   : > { %v1946_v36 = vadd.f32 1.0, %v9427_v35  ;;  %v10779_v37 = vsel %vm1171_vm5, %v1691_v34, %v12388_v32  ;;  %v1693_v38 = vsel %vm1171_vm5, %v1691_v34, 0.0  ;;  %v9429_v42 = vpop.eup %9428  ;;  %v10880_v32 = vld [vmem:[#allocation18 + $0x4c] ss:$16 sps:$4 sm:$0xff]   ;;  %v10884_v34 = vld [vmem:[#allocation18 + $0x48] ss:$16 sps:$4 sm:$0xff]  }
 0x385   : > { %1694 = vst [vmem:[%s10356_s18] sm:$0xff] %v1693_v38  ;;  %v8395_v39 = vpack.c.bf16 %v10779_v37, %v10779_v37  ;;  %v1953_v43 = vadd.f32 1.0, %v9429_v42  ;;  %v10890_v35 = vld [vmem:[#allocation18 + $0x64] ss:$16 sps:$4 sm:$0xff]   ;;  %v10894_v38 = vld [vmem:[#allocation18 + $0x60] ss:$16 sps:$4 sm:$0xff]  }
 0x386   : > { %9430 = vrcp.f32 %v1946_v36  ;;  %v10892_v36 = vld [vmem:[#allocation18 + $0x6c] ss:$16 sps:$4 sm:$0xff]   ;;  %v10902_v42 = vld [vmem:[#allocation18 + $0x84] ss:$16 sps:$4 sm:$0xff]  }
 0x387   : > { %2427 = vmatprep.mubr.bf16.mxu0 %v8395_v39  ;;  %2468 = vmatprep.mubr.bf16.mxu1 %v8395_v39  ;;  %9432 = vrcp.f32 %v1953_v43  ;;  %v10896_v39 = vld [vmem:[#allocation18 + $0x68] ss:$16 sps:$4 sm:$0xff]   ;;  %v10904_v43 = vld [vmem:[#allocation18 + $0x8c] ss:$16 sps:$4 sm:$0xff]  }
 0x390   : > { %v9431_v59 = vpop.eup %9430 }
 0x391   : > { %v1964_v62 = vmul.f32 %v9431_v59, %v1963_v45  ;;  %v9433_v46 = vpop.eup %9432  ;;  %v10906_v45 = vld [vmem:[#allocation18 + $0x80] ss:$16 sps:$4 sm:$0xff]   ;;  %v10908_v59 = vld [vmem:[#allocation18 + $0x88] ss:$16 sps:$4 sm:$0xff]  }
 0x392   : > { %v1967_v44 = vsub.f32 1.0, %v9433_v46  ;;  %v1969_v50 = vmul.f32 %v9433_v46, %v10676_v57  ;;  %v10920_v46 = vld [vmem:[#allocation18 + $0xa8] ss:$16 sps:$4 sm:$0xff]  }
 0x393   : > { %v1965_v49 = vadd.f32 %v1964_v62, %v12389_v48  ;;  %v10914_v62 = vld [vmem:[#allocation18 + $0xa4] ss:$16 sps:$4 sm:$0xff]   ;;  %v10916_v48 = vld [vmem:[#allocation18 + $0xac] ss:$16 sps:$4 sm:$0xff]   ;;  %12393 = vst [vmem:[#allocation35_spill] sm:$0xff] %v10920_v46 }
 0x394   : > { %12390 = vst [vmem:[#allocation32_spill] sm:$0xff] %v10914_v62  ;;  %12391 = vst [vmem:[#allocation33_spill] sm:$0xff] %v10916_v48 }
 0x395   : > { %9434 = vtanh.f32 %v1965_v49  ;;  %v10918_v49 = vld [vmem:[#allocation18 + $0xa0] ss:$16 sps:$4 sm:$0xff]  }
 0x396   : > { %12392 = vst [vmem:[#allocation34_spill] sm:$0xff] %v10918_v49 }
 0x39f   : > { %v9435_v47 = vpop.eup %9434 }
 0x3a0   : > { %v1968_v0 = vmul.f32 %v9435_v47, %v1967_v44  ;;  %v10926_v44 = vld [vmem:[#allocation18 + $0xc4] ss:$16 sps:$4 sm:$0xff]   ;;  %v10928_v47 = vld [vmem:[#allocation18 + $0xcc] ss:$16 sps:$4 sm:$0xff]  }
 0x3a1   : > { %12394 = vst [vmem:[#allocation36_spill] sm:$0xff] %v10926_v44  ;;  %12395 = vst [vmem:[#allocation37_spill] sm:$0xff] %v10928_v47 }
 0x3a2   : > { %v1970_v52 = vadd.f32 %v1969_v50, %v1968_v0  ;;  %v10930_v50 = vld [vmem:[#allocation18 + $0xc0] ss:$16 sps:$4 sm:$0xff]   ;;  %v10932_v0 = vld [vmem:[#allocation18 + $0xc8] ss:$16 sps:$4 sm:$0xff]  }
 0x3a3   : > { %12396 = vst [vmem:[#allocation38_spill] sm:$0xff] %v10930_v50  ;;  %12397 = vst [vmem:[#allocation39_spill] sm:$0xff] %v10932_v0 }
 0x3a4   : > { %v10797_v40 = vsel %vm1975_vm10, %v1970_v52, %v10676_v57  ;;  %v10808_v57 = vld [vmem:[#allocation15 + $0x34] ss:$12 sps:$4 sm:$0xff]  }
 0x3a5   : > { %v1977_v53 = vpack.c.bf16 %v10797_v40, %v10797_v40  ;;  %v10938_v52 = vld [vmem:[#allocation18 + $0xe4] ss:$16 sps:$4 sm:$0xff]  }
 0x3a6   : > { %12398 = vst [vmem:[#allocation40_spill] sm:$0xff] %v10938_v52 }
 0x3a7   : > { %2428 = vmatmul.mubr.bf16.vlgmr.msra.gmra.mrb[28].mxu0 %v1977_v53  ;;  %2469 = vmatmul.mubr.bf16.vlgmr.msra.gmra.mrb[20].mxu1 %v1977_v53 }
 0x3a8   : > { %2664 = vmatpush1.bf16.msra.mxu0 %v10792_v2  ;;  %8557 = vmatpush3.bf16.msra.mxu1 %v9001_v58  ;;  %v10940_v58 = vld [vmem:[#allocation18 + $0xec] ss:$16 sps:$4 sm:$0xff]  }
 0x3a9   : > { %2665 = vmatprep.subr.bf16.mxu0 %v10801_v55  ;;  %8558 = vmatprep.subr.bf16.mxu1 %v12329_v63  ;;  %12399 = vst [vmem:[#allocation41_spill] sm:$0xff] %v10940_v58 }
 0x3aa   : > { %2695 = vmatprep.mubr.bf16.mxu0 %v12355_v1  ;;  %8572 = vmatprep.mubr.msk.bf16.mxu1 %vm9972_vm2, %v12329_v63 }
 0x3ac   : > { %2666 = vmatpush1.bf16.msra.mxu0 %v10804_v51  ;;  %8559 = vmatpush3.bf16.msra.mxu1 %v9005_v3  ;;  %v10944_v3 = vld [vmem:[#allocation18 + $0xe8] ss:$16 sps:$4 sm:$0xff]  }
 0x3ad   : > { %2667 = vmatprep.subr.bf16.mxu0 %v10808_v57  ;;  %8560 = vmatprep.subr.bf16.mxu1 %v12329_v63  ;;  %12401 = vst [vmem:[#allocation43_spill] sm:$0xff] %v10944_v3 }
 0x3b0   : > { %2668 = vmatpush1.bf16.msra.mxu0 %v10814_v5  ;;  %8561 = vmatpush3.bf16.msra.mxu1 %v9009_v6  ;;  %v10950_v6 = vld [vmem:[#allocation18 + $0x104] ss:$16 sps:$4 sm:$0xff]  }
 0x3b1   : > { %2669 = vmatprep.subr.bf16.mxu0 %v10818_v7  ;;  %8562 = vmatprep.subr.bf16.mxu1 %v12329_v63  ;;  %12402 = vst [vmem:[#allocation44_spill] sm:$0xff] %v10950_v6 }
 0x3b4   : > { %2670 = vmatpush1.bf16.msra.mxu0 %v10821_v8  ;;  %8563 = vmatpush3.bf16.msra.mxu1 %v9013_v9  ;;  %v10952_v9 = vld [vmem:[#allocation18 + $0x10c] ss:$16 sps:$4 sm:$0xff]  }
 0x3b5   : > { %2671 = vmatprep.subr.bf16.mxu0 %v10825_v10  ;;  %8564 = vmatprep.subr.bf16.mxu1 %v12329_v63  ;;  %12403 = vst [vmem:[#allocation45_spill] sm:$0xff] %v10952_v9 }
 0x3b8   : > { %2672 = vmatpush1.bf16.msra.mxu0 %v10828_v11  ;;  %8565 = vmatpush3.bf16.msra.mxu1 %v9017_v12  ;;  %v10954_v12 = vld [vmem:[#allocation18 + $0x100] ss:$16 sps:$4 sm:$0xff]  }
 0x3b9   : > { %2673 = vmatprep.subr.bf16.mxu0 %v10832_v13  ;;  %8566 = vmatprep.subr.bf16.mxu1 %v12329_v63  ;;  %12404 = vst [vmem:[#allocation46_spill] sm:$0xff] %v10954_v12 }
 0x3bc   : > { %2674 = vmatpush1.bf16.msra.mxu0 %v10835_v14  ;;  %8567 = vmatpush3.bf16.msra.mxu1 %v9021_v15  ;;  %v10956_v15 = vld [vmem:[#allocation18 + $0x108] ss:$16 sps:$4 sm:$0xff]  }
 0x3bd   : > { %2675 = vmatprep.subr.bf16.mxu0 %v10839_v16  ;;  %8568 = vmatprep.subr.bf16.mxu1 %v12329_v63  ;;  %12405 = vst [vmem:[#allocation47_spill] sm:$0xff] %v10956_v15 }
 0x3c0   : > { %2676 = vmatpush1.bf16.msra.mxu0 %v10842_v17  ;;  %8569 = vmatpush3.bf16.msra.mxu1 %v9025_v18  ;;  %v10962_v18 = vld [vmem:[#allocation18 + $0x124] ss:$16 sps:$4 sm:$0xff]  }
 0x3c1   : > { %2677 = vmatprep.subr.bf16.mxu0 %v10846_v19  ;;  %8570 = vmatprep.subr.bf16.mxu1 %v12329_v63  ;;  %12406 = vst [vmem:[#allocation48_spill] sm:$0xff] %v10962_v18 }
 0x3c4   : > { %2678 = vmatpush1.bf16.msra.mxu0 %v10849_v20  ;;  %8571 = vmatpush3.bf16.msra.mxu1 %v9029_v21  ;;  %v10964_v21 = vld [vmem:[#allocation18 + $0x12c] ss:$16 sps:$4 sm:$0xff]  }
 0x3c5   : > { %3200 = vmatprep.subr.bf16.mxu0 %v10854_v22  ;;  %3241 = vmatprep.subr.bf16.mxu1 %v10856_v23  ;;  %12407 = vst [vmem:[#allocation49_spill] sm:$0xff] %v10964_v21 }
 0x3c7   : > { %2696 = vmatmul.mubr.bf16.vlgmr.msra.gmra.mrb[32].mxu0 %v1977_v53  ;;  %8573 = vmatmul.mubr.bf16.vlgmr.msra.gmra.mrb[24].mxu1 %v1977_v53  ;;  %v10942_v53 = vld [vmem:[#allocation18 + $0xe0] ss:$16 sps:$4 sm:$0xff]  }
 0x3c8   : > { %3201 = vmatpush1.bf16.msra.mxu0 %v10858_v24  ;;  %3242 = vmatpush1.bf16.msra.mxu1 %v10860_v25  ;;  %12400 = vst [vmem:[#allocation42_spill] sm:$0xff] %v10942_v53 }
 0x3c9   : > { %3202 = vmatprep.subr.bf16.mxu0 %v10866_v26  ;;  %3243 = vmatprep.subr.bf16.mxu1 %v10868_v27 }
 0x3cc   : > { %3203 = vmatpush1.bf16.msra.mxu0 %v10870_v28  ;;  %3244 = vmatpush1.bf16.msra.mxu1 %v10872_v29 }
 0x3cd   : > { %3204 = vmatprep.subr.bf16.mxu0 %v10878_v31  ;;  %3245 = vmatprep.subr.bf16.mxu1 %v10880_v32 }
 0x3d0   : > { %3205 = vmatpush1.bf16.msra.mxu0 %v10882_v33  ;;  %3246 = vmatpush1.bf16.msra.mxu1 %v10884_v34 }
 0x3d1   : > { %3206 = vmatprep.subr.bf16.mxu0 %v10890_v35  ;;  %3247 = vmatprep.subr.bf16.mxu1 %v10892_v36 }
 0x3d4   : > { %3207 = vmatpush1.bf16.msra.mxu0 %v10894_v38  ;;  %3248 = vmatpush1.bf16.msra.mxu1 %v10896_v39 }
 0x3d5   : > { %3208 = vmatprep.subr.bf16.mxu0 %v10902_v42  ;;  %3249 = vmatprep.subr.bf16.mxu1 %v10904_v43 }
 0x3d8   : > { %3209 = vmatpush1.bf16.msra.mxu0 %v10906_v45  ;;  %3250 = vmatpush1.bf16.msra.mxu1 %v10908_v59 }
 0x3d9   : > { %3210 = vmatprep.subr.bf16.mxu0 %v10914_v62  ;;  %3251 = vmatprep.subr.bf16.mxu1 %v10916_v48 }
 0x3dc   : > { %3211 = vmatpush1.bf16.msra.mxu0 %v10918_v49  ;;  %3252 = vmatpush1.bf16.msra.mxu1 %v10920_v46 }
 0x3dd   : > { %3212 = vmatprep.subr.bf16.mxu0 %v10926_v44  ;;  %3253 = vmatprep.subr.bf16.mxu1 %v10928_v47 }
 0x3e0   : > { %3213 = vmatpush1.bf16.msra.mxu0 %v10930_v50  ;;  %3254 = vmatpush1.bf16.msra.mxu1 %v10932_v0 }
 0x3e1   : > { %3214 = vmatprep.subr.bf16.mxu0 %v10938_v52  ;;  %3255 = vmatprep.subr.bf16.mxu1 %v10940_v58 }
 0x3e4   : > { %3215 = vmatpush1.bf16.msra.mxu0 %v10942_v53  ;;  %3256 = vmatpush1.bf16.msra.mxu1 %v10944_v3  ;;  %v10968_v3 = vld [vmem:[#allocation18 + $0x128] ss:$16 sps:$4 sm:$0xff]  }
 0x3e5   : > { %3216 = vmatprep.subr.bf16.mxu0 %v10950_v6  ;;  %3257 = vmatprep.subr.bf16.mxu1 %v10952_v9  ;;  %12409 = vst [vmem:[#allocation51_spill] sm:$0xff] %v10968_v3  ;;  %v10974_v9 = vld [vmem:[#allocation18 + $0x144] ss:$16 sps:$4 sm:$0xff]   ;;  %v10980_v6 = vld [vmem:[#allocation18 + $0x148] ss:$16 sps:$4 sm:$0xff]  }
 0x3e6   : > { %12410 = vst [vmem:[#allocation52_spill] sm:$0xff] %v10974_v9  ;;  %12413 = vst [vmem:[#allocation55_spill] sm:$0xff] %v10980_v6 }
 0x3e8   : > { %3217 = vmatpush1.bf16.msra.mxu0 %v10954_v12  ;;  %3258 = vmatpush1.bf16.msra.mxu1 %v10956_v15  ;;  %v10976_v12 = vld [vmem:[#allocation18 + $0x14c] ss:$16 sps:$4 sm:$0xff]   ;;  %v10978_v15 = vld [vmem:[#allocation18 + $0x140] ss:$16 sps:$4 sm:$0xff]  }
 0x3e9   : > { %3218 = vmatprep.subr.bf16.mxu0 %v10962_v18  ;;  %3259 = vmatprep.subr.bf16.mxu1 %v10964_v21  ;;  %12411 = vst [vmem:[#allocation53_spill] sm:$0xff] %v10976_v12  ;;  %12412 = vst [vmem:[#allocation54_spill] sm:$0xff] %v10978_v15  ;;  %v10986_v21 = vld [vmem:[#allocation18 + $0x164] ss:$16 sps:$4 sm:$0xff]   ;;  %v10992_v18 = vld [vmem:[#allocation18 + $0x168] ss:$16 sps:$4 sm:$0xff]  }
 0x3ea   : > { %12414 = vst [vmem:[#allocation57_spill] sm:$0xff] %v10986_v21  ;;  %12417 = vst [vmem:[#allocation62_spill] sm:$0xff] %v10992_v18 }
 0x3ec   : > { %3219 = vmatpush1.bf16.msra.mxu0 %v10966_v56  ;;  %3260 = vmatpush1.bf16.msra.mxu1 %v10968_v3  ;;  %v10988_v56 = vld [vmem:[#allocation18 + $0x16c] ss:$16 sps:$4 sm:$0xff]   ;;  %v10990_v3 = vld [vmem:[#allocation18 + $0x160] ss:$16 sps:$4 sm:$0xff]  }
 0x3ed   : > { %3220 = vmatprep.subr.bf16.mxu0 %v10974_v9  ;;  %3261 = vmatprep.subr.bf16.mxu1 %v10976_v12  ;;  %12415 = vst [vmem:[#allocation61_spill] sm:$0xff] %v10988_v56  ;;  %12416 = vst [vmem:[#allocation60_spill] sm:$0xff] %v10990_v3  ;;  %v10998_v12 = vld [vmem:[#allocation18 + $0x184] ss:$16 sps:$4 sm:$0xff]   ;;  %v11004_v9 = vld [vmem:[#allocation18 + $0x188] ss:$16 sps:$4 sm:$0xff]  }
 0x3ee   : > { %12418 = vst [vmem:[#allocation56_spill] sm:$0xff] %v10998_v12  ;;  %12421 = vst [vmem:[#allocation83_spill] sm:$0xff] %v11004_v9 }
 0x3f0   : > { %3221 = vmatpush1.bf16.msra.mxu0 %v10978_v15  ;;  %3262 = vmatpush1.bf16.msra.mxu1 %v10980_v6  ;;  %v11000_v15 = vld [vmem:[#allocation18 + $0x18c] ss:$16 sps:$4 sm:$0xff]   ;;  %v11002_v6 = vld [vmem:[#allocation18 + $0x180] ss:$16 sps:$4 sm:$0xff]  }
 0x3f1   : > { %3222 = vmatprep.subr.bf16.mxu0 %v10986_v21  ;;  %3263 = vmatprep.subr.bf16.mxu1 %v10988_v56  ;;  %12419 = vst [vmem:[#allocation69_spill] sm:$0xff] %v11000_v15  ;;  %12420 = vst [vmem:[#allocation82_spill] sm:$0xff] %v11002_v6  ;;  %v11010_v56 = vld [vmem:[#allocation18 + $0x1a4] ss:$16 sps:$4 sm:$0xff]   ;;  %v11016_v21 = vld [vmem:[#allocation18 + $0x1a8] ss:$16 sps:$4 sm:$0xff]  }
 0x3f2   : > { %12422 = vst [vmem:[#allocation84_spill] sm:$0xff] %v11010_v56  ;;  %12425 = vst [vmem:[#allocation87_spill] sm:$0xff] %v11016_v21 }
 0x3f4   : > { %3223 = vmatpush1.bf16.msra.mxu0 %v10990_v3  ;;  %3264 = vmatpush1.bf16.msra.mxu1 %v10992_v18  ;;  %v11012_v3 = vld [vmem:[#allocation18 + $0x1ac] ss:$16 sps:$4 sm:$0xff]   ;;  %v11014_v18 = vld [vmem:[#allocation18 + $0x1a0] ss:$16 sps:$4 sm:$0xff]  }
 0x3f5   : > { %3224 = vmatprep.subr.bf16.mxu0 %v10998_v12  ;;  %3265 = vmatprep.subr.bf16.mxu1 %v11000_v15  ;;  %12423 = vst [vmem:[#allocation85_spill] sm:$0xff] %v11012_v3  ;;  %12424 = vst [vmem:[#allocation86_spill] sm:$0xff] %v11014_v18  ;;  %v11022_v15 = vld [vmem:[#allocation18 + $0x1c4] ss:$16 sps:$4 sm:$0xff]   ;;  %v11028_v12 = vld [vmem:[#allocation18 + $0x1c8] ss:$16 sps:$4 sm:$0xff]  }
 0x3f6   : > { %12426 = vst [vmem:[#allocation88_spill] sm:$0xff] %v11022_v15  ;;  %12429 = vst [vmem:[#allocation91_spill] sm:$0xff] %v11028_v12 }
 0x3f8   : > { %3225 = vmatpush1.bf16.msra.mxu0 %v11002_v6  ;;  %3266 = vmatpush1.bf16.msra.mxu1 %v11004_v9  ;;  %v11024_v6 = vld [vmem:[#allocation18 + $0x1cc] ss:$16 sps:$4 sm:$0xff]   ;;  %v11026_v9 = vld [vmem:[#allocation18 + $0x1c0] ss:$16 sps:$4 sm:$0xff]  }
 0x3f9   : > { %3226 = vmatprep.subr.bf16.mxu0 %v11010_v56  ;;  %3267 = vmatprep.subr.bf16.mxu1 %v11012_v3  ;;  %12427 = vst [vmem:[#allocation89_spill] sm:$0xff] %v11024_v6  ;;  %12428 = vst [vmem:[#allocation90_spill] sm:$0xff] %v11026_v9  ;;  %v11034_v3 = vld [vmem:[#allocation18 + $0x1e4] ss:$16 sps:$4 sm:$0xff]   ;;  %v11040_v56 = vld [vmem:[#allocation18 + $0x1e8] ss:$16 sps:$4 sm:$0xff]  }
 0x3fa   : > { %12430 = vst [vmem:[#allocation92_spill] sm:$0xff] %v11034_v3  ;;  %12433 = vst [vmem:[#allocation95_spill] sm:$0xff] %v11040_v56 }
 0x3fc   : > { %3227 = vmatpush1.bf16.msra.mxu0 %v11014_v18  ;;  %3268 = vmatpush1.bf16.msra.mxu1 %v11016_v21  ;;  %v11036_v18 = vld [vmem:[#allocation18 + $0x1ec] ss:$16 sps:$4 sm:$0xff]   ;;  %v11038_v21 = vld [vmem:[#allocation18 + $0x1e0] ss:$16 sps:$4 sm:$0xff]  }
 0x3fd   : > { %3228 = vmatprep.subr.bf16.mxu0 %v11022_v15  ;;  %3269 = vmatprep.subr.bf16.mxu1 %v11024_v6  ;;  %12431 = vst [vmem:[#allocation93_spill] sm:$0xff] %v11036_v18  ;;  %12432 = vst [vmem:[#allocation94_spill] sm:$0xff] %v11038_v21 }
 0x400   : > { %3229 = vmatpush1.bf16.msra.mxu0 %v11026_v9  ;;  %3270 = vmatpush1.bf16.msra.mxu1 %v11028_v12  ;;  %v2046_v12 = vld [vmem:[#allocation20] sm:$0xf] }
 0x401   : > { %3230 = vmatprep.subr.bf16.mxu0 %v11034_v3  ;;  %3271 = vmatprep.subr.bf16.mxu1 %v11036_v18  ;;  %v2051_v9 = vrot.slane %v2046_v12, %v12381_v41  ;;  %v2055_v53 = vrot.slane %v2046_v12, %v12382_v60  ;;  %v2063_v49 = vrot.slane %v2046_v12, %v10769_v61 }
 0x402   : > { %v2059_v60 = vrot.slane %v2046_v12, %v12385_v4 }
 0x404   : > { %3231 = vmatpush1.bf16.msra.mxu0 %v11038_v21  ;;  %3272 = vmatpush1.bf16.msra.mxu1 %v11040_v56 }
 0x405   : > { %3468 = vmatprep.subr.bf16.mxu0 %v10755_v30  ;;  %8576 = vmatprep.subr.bf16.mxu1 %v12329_v63 }
 0x47a   : > { %v2429_v6 = vpop.f32.mrb[28].mxu0  ;;  %v2470_v15 = vpop.f32.mrb[20].mxu1 }
 0x47b   : > { %v2430_v58 = vadd.f32 %v2429_v6, %v2051_v9  ;;  %v2431_v52 = vpop.f32.mrb[29].mxu0  ;;  %v2472_v3 = vpop.f32.mrb[21].mxu1 }
 0x47c   : > { %v2433_v0 = vpop.f32.mrb[30].mxu0  ;;  %v2474_v18 = vpop.f32.mrb[22].mxu1  ;;  %v2432_v56 = vadd.f32 %v2431_v52, %v2055_v53  ;;  %v2473_v9 = vadd.f32 %v2472_v3, %v2063_v49 }
 0x47d   : > { %v7764_v50 = vmul.f32 -1.442695, %v2430_v58  ;;  %v2434_v21 = vpop.f32.mrb[31].mxu0  ;;  %v2475_v47 = vpop.f32.mrb[23].mxu1  ;;  %v2471_v0 = vadd.f32 %v2470_v15, %v2059_v60 }
 0x47e   : > { %v7765_v30 = vmul.f32 -1.442695, %v2432_v56  ;;  %v12434_v56 = vld [vmem:[#allocation63_spill] sm:$0xff] }
 0x47f   : > { %9436 = vpow2.f32 %v7764_v50 }
 0x480   : > { %9438 = vpow2.f32 %v7765_v30 }
 0x489   : > { %v9437_v44 = vpop.eup %9436 }
 0x48a   : > { %v2480_v46 = vadd.f32 1.0, %v9437_v44  ;;  %v9439_v41 = vpop.eup %9438 }
 0x48b   : > { %v2486_v6 = vadd.f32 1.0, %v9439_v41 }
 0x48c   : > { %9440 = vrcp.f32 %v2480_v46  ;;  %v12435_v46 = vld [vmem:[#allocation64_spill] sm:$0xff] }
 0x48d   : > { %9442 = vrcp.f32 %v2486_v6 }
 0x496   : > { %v9441_v48 = vpop.eup %9440 }
 0x497   : > { %v2489_v58 = vmul.f32 %v9441_v48, %v2473_v9  ;;  %v9443_v60 = vpop.eup %9442 }
 0x498   : > { %v2492_v48 = vsub.f32 1.0, %v9443_v60  ;;  %v2494_v6 = vmul.f32 %v9443_v60, %v10779_v37 }
 0x499   : > { %v2490_v18 = vadd.f32 %v2489_v58, %v2471_v0 }
 0x49a   : > { %v2697_v47 = vpop.f32.mrb[32].mxu0  ;;  %v2738_v52 = vpop.f32.mrb[24].mxu1 }
 0x49b   : > { %9444 = vtanh.f32 %v2490_v18  ;;  %v2747_v50 = vadd.f32 %v2697_v47, %v12434_v56  ;;  %v2699_v53 = vpop.f32.mrb[33].mxu0  ;;  %v8574_v44 = vpop.f32.mrb[25].mxu1  ;;  %v11065_v56 = vld [vmem:[#allocation17] ss:$0 sm:$0xff] }
 0x49c   : > { %v2754_v21 = vadd.f32 %v2699_v53, %v12435_v46  ;;  %v2701_v30 = vpop.f32.mrb[34].mxu0  ;;  %v2741_v61 = vpop.f32.mrb[26].mxu1  ;;  %v2768_v53 = vadd.f32 %v11065_v56, %v2738_v52 }
 0x49d   : > { %v7791_v62 = vmul.f32 -1.442695, %v2747_v50  ;;  %v2702_v41 = vpop.f32.mrb[35].mxu0  ;;  %v8575_v49 = vpop.f32.mrb[27].mxu1 }
 0x49e   : > { %v7792_v3 = vmul.f32 -1.442695, %v2754_v21  ;;  %v11069_v49 = vpop.permute.xlu1 %2778 }
 0x49f   : > { %9446 = vpow2.f32 %v7791_v62  ;;  %vm2780_vm11 = vcmp.eq.s32.totalorder %v11069_v49, 1 }
 0x4a0   : > { %9448 = vpow2.f32 %v7792_v3 }
 0x4a5   : > { %v9445_v12 = vpop.eup %9444 }
 0x4a6   : > { %v2493_v15 = vmul.f32 %v9445_v12, %v2492_v48  ;;  %v9126_v12 = vld [vmem:[#allocation15 + $0x8] ss:$12 sps:$4 sm:$0xff]  }
 0x4a8   : > { %v2495_v9 = vadd.f32 %v2494_v6, %v2493_v15  ;;  %v9127_v6 = vld [vmem:[#allocation15 + $0x20] ss:$12 sps:$4 sm:$0xff]  }
 0x4a9   : > { %v9447_v0 = vpop.eup %9446 }
 0x4aa   : > { %v2751_v58 = vadd.f32 1.0, %v9447_v0  ;;  %v11058_v61 = vsel %vm1975_vm10, %v2495_v9, %v10779_v37  ;;  %v2497_v18 = vsel %vm1975_vm10, %v2495_v9, 0.0  ;;  %v9449_v47 = vpop.eup %9448  ;;  %v12436_v37 = vld [vmem:[#allocation66_spill] sm:$0xff]  ;;  %v12468_v0 = vld [vmem:[#allocation83_spill] sm:$0xff] }
 0x4ab   : > { %7766 = vst [vmem:[%s10356_s18 + $0x8] sm:$0xff] %v2497_v18  ;;  %v8397_v62 = vpack.c.bf16 %v11058_v61, %v11058_v61  ;;  %v2758_v50 = vadd.f32 1.0, %v9449_v47  ;;  %v12467_v9 = vld [vmem:[#allocation82_spill] sm:$0xff]  ;;  %v12470_v18 = vld [vmem:[#allocation85_spill] sm:$0xff]  ;;  %v12472_v47 = vld [vmem:[#allocation87_spill] sm:$0xff] }
 0x4ac   : > { %9450 = vrcp.f32 %v2751_v58  ;;  %v12469_v58 = vld [vmem:[#allocation84_spill] sm:$0xff] }
 0x4ad   : > { %3232 = vmatprep.mubr.bf16.mxu0 %v8397_v62  ;;  %3273 = vmatprep.mubr.bf16.mxu1 %v8397_v62  ;;  %9452 = vrcp.f32 %v2758_v50  ;;  %v12471_v62 = vld [vmem:[#allocation86_spill] sm:$0xff]  ;;  %v12473_v50 = vld [vmem:[#allocation88_spill] sm:$0xff] }
 0x4b6   : > { %v9451_v44 = vpop.eup %9450 }
 0x4b7   : > { %v2769_v46 = vmul.f32 %v9451_v44, %v2768_v53  ;;  %v9453_v54 = vpop.eup %9452  ;;  %v12474_v53 = vld [vmem:[#allocation89_spill] sm:$0xff]  ;;  %v12475_v44 = vld [vmem:[#allocation90_spill] sm:$0xff] }
 0x4b8   : > { %v2772_v30 = vsub.f32 1.0, %v9453_v54  ;;  %v2774_v3 = vmul.f32 %v9453_v54, %v10797_v40  ;;  %v12479_v54 = vld [vmem:[#allocation94_spill] sm:$0xff] }
 0x4b9   : > { %v2770_v21 = vadd.f32 %v2769_v46, %v12436_v37  ;;  %v12476_v46 = vld [vmem:[#allocation91_spill] sm:$0xff]  ;;  %v12477_v37 = vld [vmem:[#allocation92_spill] sm:$0xff] }
 0x4bb   : > { %9454 = vtanh.f32 %v2770_v21  ;;  %v12478_v21 = vld [vmem:[#allocation93_spill] sm:$0xff] }
 0x4c5   : > { %v9455_v41 = vpop.eup %9454 }
 0x4c6   : > { %v2773_v60 = vmul.f32 %v9455_v41, %v2772_v30  ;;  %v12480_v30 = vld [vmem:[#allocation95_spill] sm:$0xff]  ;;  %v11170_v41 = vld [vmem:[#allocation15 + $0x4] ss:$12 sps:$4 sm:$0xff]  }
 0x4c8   : > { %v2775_v48 = vadd.f32 %v2774_v3, %v2773_v60  ;;  %v2851_v60 = vld [vmem:[#allocation20] sm:$0xf]  ;;  %v12481_v3 = vld [vmem:[#allocation58_spill] sm:$0xff] }
 0x4ca   : > { %v11076_v52 = vsel %vm2780_vm11, %v2775_v48, %v10797_v40  ;;  %v9128_v40 = vld [vmem:[#allocation15 + $0x38] ss:$12 sps:$4 sm:$0xff]   ;;  %v2856_v48 = vrot.slane %v2851_v60, %v12481_v3 }
 0x4cb   : > { %v2782_v15 = vpack.c.bf16 %v11076_v52, %v11076_v52 }
 0x4cd   : > { %3233 = vmatmul.mubr.bf16.vlgmr.msra.gmra.mrb[36].mxu0 %v2782_v15  ;;  %3274 = vmatmul.mubr.bf16.vlgmr.msra.gmra.mrb[28].mxu1 %v2782_v15 }
 0x4ce   : > { %3469 = vmatpush1.bf16.msra.mxu0 %v10792_v2  ;;  %8577 = vmatpush3.bf16.msra.mxu1 %v9126_v12  ;;  %v9129_v2 = vld [vmem:[#allocation15 + $0x50] ss:$12 sps:$4 sm:$0xff]  }
 0x4cf   : > { %3470 = vmatprep.subr.bf16.mxu0 %v10801_v55  ;;  %8578 = vmatprep.subr.bf16.mxu1 %v12329_v63  ;;  %v9130_v55 = vld [vmem:[#allocation15 + $0x68] ss:$12 sps:$4 sm:$0xff]  }
 0x4d0   : > { %3500 = vmatprep.mubr.bf16.mxu0 %v12355_v1  ;;  %8592 = vmatprep.mubr.msk.bf16.mxu1 %vm9972_vm2, %v12329_v63 }
 0x4d2   : > { %3471 = vmatpush1.bf16.msra.mxu0 %v10804_v51  ;;  %8579 = vmatpush3.bf16.msra.mxu1 %v9127_v6  ;;  %v9131_v51 = vld [vmem:[#allocation15 + $0x80] ss:$12 sps:$4 sm:$0xff]   ;;  %v12482_v6 = vld [vmem:[#allocation59_spill] sm:$0xff] }
 0x4d3   : > { %3472 = vmatprep.subr.bf16.mxu0 %v10808_v57  ;;  %8580 = vmatprep.subr.bf16.mxu1 %v12329_v63  ;;  %v9132_v57 = vld [vmem:[#allocation15 + $0x98] ss:$12 sps:$4 sm:$0xff]  }
 0x4d6   : > { %3473 = vmatpush1.bf16.msra.mxu0 %v10814_v5  ;;  %8581 = vmatpush3.bf16.msra.mxu1 %v9128_v40  ;;  %v9133_v5 = vld [vmem:[#allocation15 + $0xb0] ss:$12 sps:$4 sm:$0xff]   ;;  %v2860_v40 = vrot.slane %v2851_v60, %v12482_v6 }
 0x4d7   : > { %3474 = vmatprep.subr.bf16.mxu0 %v10818_v7  ;;  %8582 = vmatprep.subr.bf16.mxu1 %v12329_v63  ;;  %v12437_v7 = vld [vmem:[#allocation32_spill] sm:$0xff] }
 0x4da   : > { %3475 = vmatpush1.bf16.msra.mxu0 %v10821_v8  ;;  %8583 = vmatpush3.bf16.msra.mxu1 %v9129_v2  ;;  %v12438_v8 = vld [vmem:[#allocation33_spill] sm:$0xff] }
 0x4db   : > { %3476 = vmatprep.subr.bf16.mxu0 %v10825_v10  ;;  %8584 = vmatprep.subr.bf16.mxu1 %v12329_v63  ;;  %v12439_v10 = vld [vmem:[#allocation34_spill] sm:$0xff] }
 0x4de   : > { %3477 = vmatpush1.bf16.msra.mxu0 %v10828_v11  ;;  %8585 = vmatpush3.bf16.msra.mxu1 %v9130_v55  ;;  %v12440_v11 = vld [vmem:[#allocation35_spill] sm:$0xff] }
 0x4df   : > { %3478 = vmatprep.subr.bf16.mxu0 %v10832_v13  ;;  %8586 = vmatprep.subr.bf16.mxu1 %v12329_v63  ;;  %v12441_v13 = vld [vmem:[#allocation36_spill] sm:$0xff] }
 0x4e2   : > { %3479 = vmatpush1.bf16.msra.mxu0 %v10835_v14  ;;  %8587 = vmatpush3.bf16.msra.mxu1 %v9131_v51  ;;  %v12442_v14 = vld [vmem:[#allocation37_spill] sm:$0xff] }
 0x4e3   : > { %3480 = vmatprep.subr.bf16.mxu0 %v10839_v16  ;;  %8588 = vmatprep.subr.bf16.mxu1 %v12329_v63  ;;  %v12443_v16 = vld [vmem:[#allocation38_spill] sm:$0xff] }
 0x4e6   : > { %3481 = vmatpush1.bf16.msra.mxu0 %v10842_v17  ;;  %8589 = vmatpush3.bf16.msra.mxu1 %v9132_v57  ;;  %v12444_v17 = vld [vmem:[#allocation39_spill] sm:$0xff] }
 0x4e7   : > { %3482 = vmatprep.subr.bf16.mxu0 %v10846_v19  ;;  %8590 = vmatprep.subr.bf16.mxu1 %v12329_v63  ;;  %v12445_v19 = vld [vmem:[#allocation40_spill] sm:$0xff] }
 0x4ea   : > { %3483 = vmatpush1.bf16.msra.mxu0 %v10849_v20  ;;  %8591 = vmatpush3.bf16.msra.mxu1 %v9133_v5  ;;  %v12446_v20 = vld [vmem:[#allocation41_spill] sm:$0xff] }
 0x4eb   : > { %4005 = vmatprep.subr.bf16.mxu0 %v10854_v22  ;;  %4046 = vmatprep.subr.bf16.mxu1 %v10856_v23  ;;  %v12447_v22 = vld [vmem:[#allocation42_spill] sm:$0xff]  ;;  %v12448_v23 = vld [vmem:[#allocation43_spill] sm:$0xff] }
 0x4ed   : > { %3501 = vmatmul.mubr.bf16.vlgmr.msra.gmra.mrb[40].mxu0 %v2782_v15  ;;  %8593 = vmatmul.mubr.bf16.vlgmr.msra.gmra.mrb[32].mxu1 %v2782_v15 }
 0x4ee   : > { %4006 = vmatpush1.bf16.msra.mxu0 %v10858_v24  ;;  %4047 = vmatpush1.bf16.msra.mxu1 %v10860_v25  ;;  %v12449_v24 = vld [vmem:[#allocation44_spill] sm:$0xff]  ;;  %v12450_v25 = vld [vmem:[#allocation45_spill] sm:$0xff] }
 0x4ef   : > { %4007 = vmatprep.subr.bf16.mxu0 %v10866_v26  ;;  %4048 = vmatprep.subr.bf16.mxu1 %v10868_v27  ;;  %v12451_v26 = vld [vmem:[#allocation46_spill] sm:$0xff]  ;;  %v12452_v27 = vld [vmem:[#allocation47_spill] sm:$0xff] }
 0x4f2   : > { %4008 = vmatpush1.bf16.msra.mxu0 %v10870_v28  ;;  %4049 = vmatpush1.bf16.msra.mxu1 %v10872_v29  ;;  %v12453_v28 = vld [vmem:[#allocation48_spill] sm:$0xff]  ;;  %v12454_v29 = vld [vmem:[#allocation49_spill] sm:$0xff] }
 0x4f3   : > { %4009 = vmatprep.subr.bf16.mxu0 %v10878_v31  ;;  %4050 = vmatprep.subr.bf16.mxu1 %v10880_v32  ;;  %v12455_v31 = vld [vmem:[#allocation50_spill] sm:$0xff]  ;;  %v12456_v32 = vld [vmem:[#allocation51_spill] sm:$0xff] }
 0x4f6   : > { %4010 = vmatpush1.bf16.msra.mxu0 %v10882_v33  ;;  %4051 = vmatpush1.bf16.msra.mxu1 %v10884_v34  ;;  %v12457_v33 = vld [vmem:[#allocation52_spill] sm:$0xff]  ;;  %v12458_v34 = vld [vmem:[#allocation53_spill] sm:$0xff] }
 0x4f7   : > { %4011 = vmatprep.subr.bf16.mxu0 %v10890_v35  ;;  %4052 = vmatprep.subr.bf16.mxu1 %v10892_v36  ;;  %v12459_v35 = vld [vmem:[#allocation54_spill] sm:$0xff]  ;;  %v12460_v36 = vld [vmem:[#allocation55_spill] sm:$0xff] }
 0x4fa   : > { %4012 = vmatpush1.bf16.msra.mxu0 %v10894_v38  ;;  %4053 = vmatpush1.bf16.msra.mxu1 %v10896_v39  ;;  %v12461_v38 = vld [vmem:[#allocation57_spill] sm:$0xff] }
 0x4fb   : > { %4013 = vmatprep.subr.bf16.mxu0 %v10902_v42  ;;  %4054 = vmatprep.subr.bf16.mxu1 %v10904_v43  ;;  %v12462_v39 = vld [vmem:[#allocation61_spill] sm:$0xff]  ;;  %v12463_v42 = vld [vmem:[#allocation60_spill] sm:$0xff]  ;;  %v12464_v43 = vld [vmem:[#allocation62_spill] sm:$0xff] }
 0x4fe   : > { %4014 = vmatpush1.bf16.msra.mxu0 %v10906_v45  ;;  %4055 = vmatpush1.bf16.msra.mxu1 %v10908_v59  ;;  %v12465_v45 = vld [vmem:[#allocation56_spill] sm:$0xff]  ;;  %v12466_v59 = vld [vmem:[#allocation69_spill] sm:$0xff] }
 0x4ff   : > { %4015 = vmatprep.subr.bf16.mxu0 %v12437_v7  ;;  %4056 = vmatprep.subr.bf16.mxu1 %v12438_v8 }
 0x502   : > { %4016 = vmatpush1.bf16.msra.mxu0 %v12439_v10  ;;  %4057 = vmatpush1.bf16.msra.mxu1 %v12440_v11 }
 0x503   : > { %4017 = vmatprep.subr.bf16.mxu0 %v12441_v13  ;;  %4058 = vmatprep.subr.bf16.mxu1 %v12442_v14 }
 0x506   : > { %4018 = vmatpush1.bf16.msra.mxu0 %v12443_v16  ;;  %4059 = vmatpush1.bf16.msra.mxu1 %v12444_v17 }
 0x507   : > { %4019 = vmatprep.subr.bf16.mxu0 %v12445_v19  ;;  %4060 = vmatprep.subr.bf16.mxu1 %v12446_v20  ;;  %v12483_v19 = vld [vmem:[#allocation31_spill] sm:$0xff] }
 0x508   : > { %v2868_v20 = vrot.slane %v2851_v60, %v12483_v19 }
 0x50a   : > { %4020 = vmatpush1.bf16.msra.mxu0 %v12447_v22  ;;  %4061 = vmatpush1.bf16.msra.mxu1 %v12448_v23  ;;  %v2864_v22 = vrot.slane %v2851_v60, %v12385_v4 }
 0x50b   : > { %4021 = vmatprep.subr.bf16.mxu0 %v12449_v24  ;;  %4062 = vmatprep.subr.bf16.mxu1 %v12450_v25 }
 0x50e   : > { %4022 = vmatpush1.bf16.msra.mxu0 %v12451_v26  ;;  %4063 = vmatpush1.bf16.msra.mxu1 %v12452_v27 }
 0x50f   : > { %4023 = vmatprep.subr.bf16.mxu0 %v12453_v28  ;;  %4064 = vmatprep.subr.bf16.mxu1 %v12454_v29 }
 0x512   : > { %4024 = vmatpush1.bf16.msra.mxu0 %v12455_v31  ;;  %4065 = vmatpush1.bf16.msra.mxu1 %v12456_v32  ;;  %v12484_v32 = vld [vmem:[#allocation65_spill] sm:$0xff] }
 0x513   : > { %4025 = vmatprep.subr.bf16.mxu0 %v12457_v33  ;;  %4066 = vmatprep.subr.bf16.mxu1 %v12458_v34 }
 0x516   : > { %4026 = vmatpush1.bf16.msra.mxu0 %v12459_v35  ;;  %4067 = vmatpush1.bf16.msra.mxu1 %v12460_v36  ;;  %v12485_v36 = vld [vmem:[#allocation67_spill] sm:$0xff] }
 0x517   : > { %4027 = vmatprep.subr.bf16.mxu0 %v12461_v38  ;;  %4068 = vmatprep.subr.bf16.mxu1 %v12462_v39 }
 0x51a   : > { %4028 = vmatpush1.bf16.msra.mxu0 %v12463_v42  ;;  %4069 = vmatpush1.bf16.msra.mxu1 %v12464_v43 }
 0x51b   : > { %4029 = vmatprep.subr.bf16.mxu0 %v12465_v45  ;;  %4070 = vmatprep.subr.bf16.mxu1 %v12466_v59 }
 0x51e   : > { %4030 = vmatpush1.bf16.msra.mxu0 %v12467_v9  ;;  %4071 = vmatpush1.bf16.msra.mxu1 %v12468_v0 }
 0x51f   : > { %4031 = vmatprep.subr.bf16.mxu0 %v12469_v58  ;;  %4072 = vmatprep.subr.bf16.mxu1 %v12470_v18 }
 0x522   : > { %4032 = vmatpush1.bf16.msra.mxu0 %v12471_v62  ;;  %4073 = vmatpush1.bf16.msra.mxu1 %v12472_v47 }
 0x523   : > { %4033 = vmatprep.subr.bf16.mxu0 %v12473_v50  ;;  %4074 = vmatprep.subr.bf16.mxu1 %v12474_v53 }
 0x526   : > { %4034 = vmatpush1.bf16.msra.mxu0 %v12475_v44  ;;  %4075 = vmatpush1.bf16.msra.mxu1 %v12476_v46 }
 0x527   : > { %4035 = vmatprep.subr.bf16.mxu0 %v12477_v37  ;;  %4076 = vmatprep.subr.bf16.mxu1 %v12478_v21 }
 0x52a   : > { %4036 = vmatpush1.bf16.msra.mxu0 %v12479_v54  ;;  %4077 = vmatpush1.bf16.msra.mxu1 %v12480_v30 }
 0x52b   : > { %8596 = vmatprep.subr.bf16.mxu1 %v12329_v63  ;;  %4273 = vmatprep.subr.bf16.mxu0 %v11170_v41 }
 0x5a0   : > { %v3234_v12 = vpop.f32.mrb[36].mxu0  ;;  %v3275_v15 = vpop.f32.mrb[28].mxu1 }
 0x5a1   : > { %v3235_v2 = vadd.f32 %v3234_v12, %v2856_v48  ;;  %v3236_v55 = vpop.f32.mrb[37].mxu0  ;;  %v3277_v51 = vpop.f32.mrb[29].mxu1  ;;  %v3276_v26 = vadd.f32 %v3275_v15, %v2864_v22  ;;  %v12486_v15 = vld [vmem:[#allocation68_spill] sm:$0xff]  ;;  %v11225_v22 = vld [vmem:[#allocation15 + $0x48] ss:$12 sps:$4 sm:$0xff]  }
 0x5a2   : > { %v3238_v57 = vpop.f32.mrb[38].mxu0  ;;  %v3279_v5 = vpop.f32.mrb[30].mxu1  ;;  %v3237_v11 = vadd.f32 %v3236_v55, %v2860_v40  ;;  %v3278_v24 = vadd.f32 %v3277_v51, %v2868_v20  ;;  %v11222_v20 = vld [vmem:[#allocation15 + $0x4c] ss:$12 sps:$4 sm:$0xff]  }
 0x5a3   : > { %v7860_v7 = vmul.f32 -1.442695, %v3235_v2  ;;  %v3239_v8 = vpop.f32.mrb[39].mxu0  ;;  %v3280_v10 = vpop.f32.mrb[31].mxu1 }
 0x5a4   : > { %v7861_v13 = vmul.f32 -1.442695, %v3237_v11  ;;  %v11193_v57 = vpop.permute.xlu1 %3583  ;;  %v9137_v8 = vld [vmem:[#allocation15 + $0x8] ss:$12 sps:$4 sm:$0xff]  }
 0x5a5   : > { %9456 = vpow2.f32 %v7860_v7  ;;  %vm3585_vm12 = vcmp.eq.s32.totalorder %v11193_v57, 1  ;;  %v11196_v7 = vld [vmem:[#allocation15] ss:$12 sps:$4 sm:$0xff]   ;;  %v11205_v11 = vld [vmem:[#allocation15 + $0x1c] ss:$12 sps:$4 sm:$0xff]  }
 0x5a6   : > { %9458 = vpow2.f32 %v7861_v13  ;;  %v11208_v13 = vld [vmem:[#allocation15 + $0x18] ss:$12 sps:$4 sm:$0xff]  }
 0x5af   : > { %v9457_v14 = vpop.eup %9456 }
 0x5b0   : > { %v3285_v16 = vadd.f32 1.0, %v9457_v14  ;;  %v9459_v17 = vpop.eup %9458  ;;  %v9141_v14 = vld [vmem:[#allocation15 + $0x20] ss:$12 sps:$4 sm:$0xff]  }
 0x5b1   : > { %v3291_v23 = vadd.f32 1.0, %v9459_v17  ;;  %v9145_v17 = vld [vmem:[#allocation15 + $0x38] ss:$12 sps:$4 sm:$0xff]  }
 0x5b2   : > { %9460 = vrcp.f32 %v3285_v16  ;;  %v11218_v16 = vld [vmem:[#allocation15 + $0x30] ss:$12 sps:$4 sm:$0xff]  }
 0x5b3   : > { %9462 = vrcp.f32 %v3291_v23  ;;  %v9149_v23 = vld [vmem:[#allocation15 + $0x50] ss:$12 sps:$4 sm:$0xff]  }
 0x5bc   : > { %v9461_v25 = vpop.eup %9460 }
 0x5bd   : > { %v3294_v27 = vmul.f32 %v9461_v25, %v3278_v24  ;;  %v9463_v9 = vpop.eup %9462  ;;  %v11229_v24 = vld [vmem:[#allocation15 + $0x64] ss:$12 sps:$4 sm:$0xff]   ;;  %v11232_v25 = vld [vmem:[#allocation15 + $0x60] ss:$12 sps:$4 sm:$0xff]  }
 0x5be   : > { %v3297_v58 = vsub.f32 1.0, %v9463_v9  ;;  %v3299_v47 = vmul.f32 %v9463_v9, %v11058_v61  ;;  %v11274_v9 = vld [vmem:[#allocation18 + $0x20] ss:$16 sps:$4 sm:$0xff]  }
 0x5bf   : > { %v3295_v28 = vadd.f32 %v3294_v27, %v3276_v26  ;;  %v9153_v26 = vld [vmem:[#allocation15 + $0x68] ss:$12 sps:$4 sm:$0xff]  }
 0x5c0   : > { %v3502_v29 = vpop.f32.mrb[40].mxu0  ;;  %v3543_v31 = vpop.f32.mrb[32].mxu1  ;;  %v11236_v27 = vld [vmem:[#allocation15 + $0x7c] ss:$12 sps:$4 sm:$0xff]  }
 0x5c1   : > { %9464 = vtanh.f32 %v3295_v28  ;;  %v3552_v33 = vadd.f32 %v3502_v29, %v12484_v32  ;;  %v3504_v34 = vpop.f32.mrb[41].mxu0  ;;  %v8594_v35 = vpop.f32.mrb[33].mxu1  ;;  %v3573_v60 = vadd.f32 %v11065_v56, %v3543_v31  ;;  %v11239_v28 = vld [vmem:[#allocation15 + $0x78] ss:$12 sps:$4 sm:$0xff]   ;;  %v9157_v29 = vld [vmem:[#allocation15 + $0x80] ss:$12 sps:$4 sm:$0xff]  }
 0x5c2   : > { %v3559_v38 = vadd.f32 %v3504_v34, %v12485_v36  ;;  %v3506_v39 = vpop.f32.mrb[42].mxu0  ;;  %v3546_v42 = vpop.f32.mrb[34].mxu1  ;;  %v11243_v31 = vld [vmem:[#allocation15 + $0x94] ss:$12 sps:$4 sm:$0xff]   ;;  %v11246_v32 = vld [vmem:[#allocation15 + $0x90] ss:$12 sps:$4 sm:$0xff]  }
 0x5c3   : > { %v7887_v43 = vmul.f32 -1.442695, %v3552_v33  ;;  %v3507_v45 = vpop.f32.mrb[43].mxu0  ;;  %v8595_v59 = vpop.f32.mrb[35].mxu1  ;;  %v9161_v33 = vld [vmem:[#allocation15 + $0x98] ss:$12 sps:$4 sm:$0xff]  }
 0x5c4   : > { %v7888_v0 = vmul.f32 -1.442695, %v3559_v38  ;;  %v11250_v34 = vld [vmem:[#allocation15 + $0xac] ss:$12 sps:$4 sm:$0xff]   ;;  %v11253_v35 = vld [vmem:[#allocation15 + $0xa8] ss:$12 sps:$4 sm:$0xff]  }
 0x5c5   : > { %9466 = vpow2.f32 %v7887_v43  ;;  %v9165_v36 = vld [vmem:[#allocation15 + $0xb0] ss:$12 sps:$4 sm:$0xff]   ;;  %v11258_v38 = vld [vmem:[#allocation18 + $0x4] ss:$16 sps:$4 sm:$0xff]  }
 0x5c6   : > { %9468 = vpow2.f32 %v7888_v0  ;;  %v11260_v39 = vld [vmem:[#allocation18 + $0xc] ss:$16 sps:$4 sm:$0xff]   ;;  %v11262_v42 = vld [vmem:[#allocation18] ss:$16 sps:$4 sm:$0xff]   ;;  %v11264_v43 = vld [vmem:[#allocation18 + $0x8] ss:$16 sps:$4 sm:$0xff]  }
 0x5c7   : > { %v11270_v45 = vld [vmem:[#allocation18 + $0x24] ss:$16 sps:$4 sm:$0xff]   ;;  %v11272_v59 = vld [vmem:[#allocation18 + $0x2c] ss:$16 sps:$4 sm:$0xff]   ;;  %v11276_v0 = vld [vmem:[#allocation18 + $0x28] ss:$16 sps:$4 sm:$0xff]  }
 0x5cb   : > { %v9465_v18 = vpop.eup %9464 }
 0x5cc   : > { %v3298_v62 = vmul.f32 %v9465_v18, %v3297_v58  ;;  %v11282_v58 = vld [vmem:[#allocation18 + $0x44] ss:$16 sps:$4 sm:$0xff]   ;;  %v11284_v18 = vld [vmem:[#allocation18 + $0x4c] ss:$16 sps:$4 sm:$0xff]  }
 0x5ce   : > { %v3300_v50 = vadd.f32 %v3299_v47, %v3298_v62  ;;  %v11286_v62 = vld [vmem:[#allocation18 + $0x40] ss:$16 sps:$4 sm:$0xff]   ;;  %v11288_v47 = vld [vmem:[#allocation18 + $0x48] ss:$16 sps:$4 sm:$0xff]  }
 0x5cf   : > { %v9467_v53 = vpop.eup %9466 }
 0x5d0   : > { %v3556_v44 = vadd.f32 1.0, %v9467_v53  ;;  %v11183_v46 = vsel %vm2780_vm11, %v3300_v50, %v11058_v61  ;;  %v3302_v37 = vsel %vm2780_vm11, %v3300_v50, 0.0  ;;  %v9469_v54 = vpop.eup %9468  ;;  %v11294_v50 = vld [vmem:[#allocation18 + $0x64] ss:$16 sps:$4 sm:$0xff]   ;;  %v11296_v53 = vld [vmem:[#allocation18 + $0x6c] ss:$16 sps:$4 sm:$0xff]  }
 0x5d1   : > { %7862 = vst [vmem:[%s10356_s18 + $0x10] sm:$0xff] %v3302_v37  ;;  %v8399_v21 = vpack.c.bf16 %v11183_v46, %v11183_v46  ;;  %v3563_v30 = vadd.f32 1.0, %v9469_v54  ;;  %v11300_v37 = vld [vmem:[#allocation18 + $0x68] ss:$16 sps:$4 sm:$0xff]   ;;  %v11308_v54 = vld [vmem:[#allocation18 + $0x8c] ss:$16 sps:$4 sm:$0xff]  }
 0x5d2   : > { %9470 = vrcp.f32 %v3556_v44  ;;  %v11298_v44 = vld [vmem:[#allocation18 + $0x60] ss:$16 sps:$4 sm:$0xff]  }
 0x5d3   : > { %4037 = vmatprep.mubr.bf16.mxu0 %v8399_v21  ;;  %4078 = vmatprep.mubr.bf16.mxu1 %v8399_v21  ;;  %9472 = vrcp.f32 %v3563_v30  ;;  %v11306_v21 = vld [vmem:[#allocation18 + $0x84] ss:$16 sps:$4 sm:$0xff]   ;;  %v11310_v30 = vld [vmem:[#allocation18 + $0x80] ss:$16 sps:$4 sm:$0xff]  }
 0x5dc   : > { %v9471_v48 = vpop.eup %9470 }
 0x5dd   : > { %v3574_v12 = vmul.f32 %v9471_v48, %v3573_v60  ;;  %v9473_v40 = vpop.eup %9472  ;;  %v11312_v60 = vld [vmem:[#allocation18 + $0x88] ss:$16 sps:$4 sm:$0xff]   ;;  %v11318_v48 = vld [vmem:[#allocation18 + $0xa4] ss:$16 sps:$4 sm:$0xff]  }
 0x5de   : > { %v3577_v49 = vsub.f32 1.0, %v9473_v40  ;;  %v3579_v55 = vmul.f32 %v9473_v40, %v11076_v52  ;;  %12487 = vst [vmem:[#allocation63_spill] sm:$0xff] %v11318_v48  ;;  %v11330_v40 = vld [vmem:[#allocation18 + $0xc4] ss:$16 sps:$4 sm:$0xff]  }
 0x5df   : > { %v3575_v61 = vadd.f32 %v3574_v12, %v12486_v15  ;;  %v11320_v12 = vld [vmem:[#allocation18 + $0xac] ss:$16 sps:$4 sm:$0xff]   ;;  %v11322_v15 = vld [vmem:[#allocation18 + $0xa0] ss:$16 sps:$4 sm:$0xff]   ;;  %12491 = vst [vmem:[#allocation33_spill] sm:$0xff] %v11330_v40 }
 0x5e0   : > { %12488 = vst [vmem:[#allocation64_spill] sm:$0xff] %v11320_v12  ;;  %12489 = vst [vmem:[#allocation66_spill] sm:$0xff] %v11322_v15 }
 0x5e1   : > { %9474 = vtanh.f32 %v3575_v61  ;;  %v11324_v61 = vld [vmem:[#allocation18 + $0xa8] ss:$16 sps:$4 sm:$0xff]  }
 0x5e2   : > { %12490 = vst [vmem:[#allocation32_spill] sm:$0xff] %v11324_v61 }
 0x5eb   : > { %v9475_v2 = vpop.eup %9474 }
 0x5ec   : > { %v3578_v51 = vmul.f32 %v9475_v2, %v3577_v49  ;;  %v11332_v49 = vld [vmem:[#allocation18 + $0xcc] ss:$16 sps:$4 sm:$0xff]   ;;  %v11334_v2 = vld [vmem:[#allocation18 + $0xc0] ss:$16 sps:$4 sm:$0xff]  }
 0x5ed   : > { %12492 = vst [vmem:[#allocation34_spill] sm:$0xff] %v11332_v49  ;;  %12493 = vst [vmem:[#allocation35_spill] sm:$0xff] %v11334_v2 }
 0x5ee   : > { %v3580_v5 = vadd.f32 %v3579_v55, %v3578_v51  ;;  %v11336_v55 = vld [vmem:[#allocation18 + $0xc8] ss:$16 sps:$4 sm:$0xff]   ;;  %v11342_v51 = vld [vmem:[#allocation18 + $0xe4] ss:$16 sps:$4 sm:$0xff]  }
 0x5ef   : > { %12494 = vst [vmem:[#allocation36_spill] sm:$0xff] %v11336_v55  ;;  %12495 = vst [vmem:[#allocation37_spill] sm:$0xff] %v11342_v51 }
 0x5f0   : > { %v11201_v56 = vsel %vm3585_vm12, %v3580_v5, %v11076_v52  ;;  %v11212_v52 = vld [vmem:[#allocation15 + $0x34] ss:$12 sps:$4 sm:$0xff]  }
 0x5f1   : > { %v3587_v10 = vpack.c.bf16 %v11201_v56, %v11201_v56  ;;  %v11344_v5 = vld [vmem:[#allocation18 + $0xec] ss:$16 sps:$4 sm:$0xff]  }
 0x5f2   : > { %12496 = vst [vmem:[#allocation38_spill] sm:$0xff] %v11344_v5 }
 0x5f3   : > { %4038 = vmatmul.mubr.bf16.vlgmr.msra.gmra.mrb[44].mxu0 %v3587_v10  ;;  %4079 = vmatmul.mubr.bf16.vlgmr.msra.gmra.mrb[36].mxu1 %v3587_v10 }
 0x5f4   : > { %4274 = vmatpush1.bf16.msra.mxu0 %v11196_v7  ;;  %8597 = vmatpush3.bf16.msra.mxu1 %v9137_v8  ;;  %v11346_v8 = vld [vmem:[#allocation18 + $0xe0] ss:$16 sps:$4 sm:$0xff]  }
 0x5f5   : > { %4275 = vmatprep.subr.bf16.mxu0 %v11205_v11  ;;  %8598 = vmatprep.subr.bf16.mxu1 %v12329_v63  ;;  %12497 = vst [vmem:[#allocation39_spill] sm:$0xff] %v11346_v8 }
 0x5f6   : > { %4305 = vmatprep.mubr.bf16.mxu0 %v12355_v1  ;;  %8612 = vmatprep.mubr.msk.bf16.mxu1 %vm9972_vm2, %v12329_v63 }
 0x5f8   : > { %4276 = vmatpush1.bf16.msra.mxu0 %v11208_v13  ;;  %8599 = vmatpush3.bf16.msra.mxu1 %v9141_v14  ;;  %v11354_v14 = vld [vmem:[#allocation18 + $0x104] ss:$16 sps:$4 sm:$0xff]  }
 0x5f9   : > { %4277 = vmatprep.subr.bf16.mxu0 %v11212_v52  ;;  %8600 = vmatprep.subr.bf16.mxu1 %v12329_v63  ;;  %12499 = vst [vmem:[#allocation41_spill] sm:$0xff] %v11354_v14 }
 0x5fc   : > { %4278 = vmatpush1.bf16.msra.mxu0 %v11218_v16  ;;  %8601 = vmatpush3.bf16.msra.mxu1 %v9145_v17  ;;  %v11356_v17 = vld [vmem:[#allocation18 + $0x10c] ss:$16 sps:$4 sm:$0xff]  }
 0x5fd   : > { %4279 = vmatprep.subr.bf16.mxu0 %v11222_v20  ;;  %8602 = vmatprep.subr.bf16.mxu1 %v12329_v63  ;;  %12500 = vst [vmem:[#allocation42_spill] sm:$0xff] %v11356_v17 }
 0x600   : > { %4280 = vmatpush1.bf16.msra.mxu0 %v11225_v22  ;;  %8603 = vmatpush3.bf16.msra.mxu1 %v9149_v23  ;;  %v11358_v23 = vld [vmem:[#allocation18 + $0x100] ss:$16 sps:$4 sm:$0xff]  }
 0x601   : > { %4281 = vmatprep.subr.bf16.mxu0 %v11229_v24  ;;  %8604 = vmatprep.subr.bf16.mxu1 %v12329_v63  ;;  %12501 = vst [vmem:[#allocation43_spill] sm:$0xff] %v11358_v23 }
 0x604   : > { %4282 = vmatpush1.bf16.msra.mxu0 %v11232_v25  ;;  %8605 = vmatpush3.bf16.msra.mxu1 %v9153_v26  ;;  %v11360_v26 = vld [vmem:[#allocation18 + $0x108] ss:$16 sps:$4 sm:$0xff]  }
 0x605   : > { %4283 = vmatprep.subr.bf16.mxu0 %v11236_v27  ;;  %8606 = vmatprep.subr.bf16.mxu1 %v12329_v63  ;;  %12502 = vst [vmem:[#allocation44_spill] sm:$0xff] %v11360_v26 }
 0x608   : > { %4284 = vmatpush1.bf16.msra.mxu0 %v11239_v28  ;;  %8607 = vmatpush3.bf16.msra.mxu1 %v9157_v29  ;;  %v11366_v29 = vld [vmem:[#allocation18 + $0x124] ss:$16 sps:$4 sm:$0xff]  }
 0x609   : > { %4285 = vmatprep.subr.bf16.mxu0 %v11243_v31  ;;  %8608 = vmatprep.subr.bf16.mxu1 %v12329_v63  ;;  %12503 = vst [vmem:[#allocation45_spill] sm:$0xff] %v11366_v29 }
 0x60c   : > { %4286 = vmatpush1.bf16.msra.mxu0 %v11246_v32  ;;  %8609 = vmatpush3.bf16.msra.mxu1 %v9161_v33  ;;  %v11368_v33 = vld [vmem:[#allocation18 + $0x12c] ss:$16 sps:$4 sm:$0xff]  }
 0x60d   : > { %4287 = vmatprep.subr.bf16.mxu0 %v11250_v34  ;;  %8610 = vmatprep.subr.bf16.mxu1 %v12329_v63  ;;  %12504 = vst [vmem:[#allocation46_spill] sm:$0xff] %v11368_v33 }
 0x610   : > { %4288 = vmatpush1.bf16.msra.mxu0 %v11253_v35  ;;  %8611 = vmatpush3.bf16.msra.mxu1 %v9165_v36  ;;  %v11370_v36 = vld [vmem:[#allocation18 + $0x120] ss:$16 sps:$4 sm:$0xff]  }
 0x611   : > { %4810 = vmatprep.subr.bf16.mxu0 %v11258_v38  ;;  %4851 = vmatprep.subr.bf16.mxu1 %v11260_v39  ;;  %12505 = vst [vmem:[#allocation47_spill] sm:$0xff] %v11370_v36 }
 0x613   : > { %4306 = vmatmul.mubr.bf16.vlgmr.msra.gmra.mrb[48].mxu0 %v3587_v10  ;;  %8613 = vmatmul.mubr.bf16.vlgmr.msra.gmra.mrb[40].mxu1 %v3587_v10  ;;  %v11348_v10 = vld [vmem:[#allocation18 + $0xe8] ss:$16 sps:$4 sm:$0xff]  }
 0x614   : > { %4811 = vmatpush1.bf16.msra.mxu0 %v11262_v42  ;;  %4852 = vmatpush1.bf16.msra.mxu1 %v11264_v43  ;;  %12498 = vst [vmem:[#allocation40_spill] sm:$0xff] %v11348_v10 }
 0x615   : > { %4812 = vmatprep.subr.bf16.mxu0 %v11270_v45  ;;  %4853 = vmatprep.subr.bf16.mxu1 %v11272_v59 }
 0x618   : > { %4813 = vmatpush1.bf16.msra.mxu0 %v11274_v9  ;;  %4854 = vmatpush1.bf16.msra.mxu1 %v11276_v0 }
 0x619   : > { %4814 = vmatprep.subr.bf16.mxu0 %v11282_v58  ;;  %4855 = vmatprep.subr.bf16.mxu1 %v11284_v18 }
 0x61c   : > { %4815 = vmatpush1.bf16.msra.mxu0 %v11286_v62  ;;  %4856 = vmatpush1.bf16.msra.mxu1 %v11288_v47 }
 0x61d   : > { %4816 = vmatprep.subr.bf16.mxu0 %v11294_v50  ;;  %4857 = vmatprep.subr.bf16.mxu1 %v11296_v53 }
 0x620   : > { %4817 = vmatpush1.bf16.msra.mxu0 %v11298_v44  ;;  %4858 = vmatpush1.bf16.msra.mxu1 %v11300_v37 }
 0x621   : > { %4818 = vmatprep.subr.bf16.mxu0 %v11306_v21  ;;  %4859 = vmatprep.subr.bf16.mxu1 %v11308_v54 }
 0x624   : > { %4819 = vmatpush1.bf16.msra.mxu0 %v11310_v30  ;;  %4860 = vmatpush1.bf16.msra.mxu1 %v11312_v60 }
 0x625   : > { %4820 = vmatprep.subr.bf16.mxu0 %v11318_v48  ;;  %4861 = vmatprep.subr.bf16.mxu1 %v11320_v12 }
 0x628   : > { %4821 = vmatpush1.bf16.msra.mxu0 %v11322_v15  ;;  %4862 = vmatpush1.bf16.msra.mxu1 %v11324_v61 }
 0x629   : > { %4822 = vmatprep.subr.bf16.mxu0 %v11330_v40  ;;  %4863 = vmatprep.subr.bf16.mxu1 %v11332_v49 }
 0x62c   : > { %4823 = vmatpush1.bf16.msra.mxu0 %v11334_v2  ;;  %4864 = vmatpush1.bf16.msra.mxu1 %v11336_v55 }
 0x62d   : > { %4824 = vmatprep.subr.bf16.mxu0 %v11342_v51  ;;  %4865 = vmatprep.subr.bf16.mxu1 %v11344_v5 }
 0x630   : > { %4825 = vmatpush1.bf16.msra.mxu0 %v11346_v8  ;;  %4866 = vmatpush1.bf16.msra.mxu1 %v11348_v10  ;;  %v11372_v10 = vld [vmem:[#allocation18 + $0x128] ss:$16 sps:$4 sm:$0xff]   ;;  %v11412_v8 = vld [vmem:[#allocation18 + $0x1a4] ss:$16 sps:$4 sm:$0xff]  }
 0x631   : > { %4826 = vmatprep.subr.bf16.mxu0 %v11354_v14  ;;  %4867 = vmatprep.subr.bf16.mxu1 %v11356_v17  ;;  %12506 = vst [vmem:[#allocation48_spill] sm:$0xff] %v11372_v10  ;;  %v11378_v17 = vld [vmem:[#allocation18 + $0x144] ss:$16 sps:$4 sm:$0xff]   ;;  %v11384_v14 = vld [vmem:[#allocation18 + $0x148] ss:$16 sps:$4 sm:$0xff]   ;;  %12519 = vst [vmem:[#allocation69_spill] sm:$0xff] %v11412_v8 }
 0x632   : > { %12507 = vst [vmem:[#allocation49_spill] sm:$0xff] %v11378_v17  ;;  %12510 = vst [vmem:[#allocation52_spill] sm:$0xff] %v11384_v14 }
 0x634   : > { %4827 = vmatpush1.bf16.msra.mxu0 %v11358_v23  ;;  %4868 = vmatpush1.bf16.msra.mxu1 %v11360_v26  ;;  %v11380_v23 = vld [vmem:[#allocation18 + $0x14c] ss:$16 sps:$4 sm:$0xff]   ;;  %v11382_v26 = vld [vmem:[#allocation18 + $0x140] ss:$16 sps:$4 sm:$0xff]  }
 0x635   : > { %4828 = vmatprep.subr.bf16.mxu0 %v11366_v29  ;;  %4869 = vmatprep.subr.bf16.mxu1 %v11368_v33  ;;  %12508 = vst [vmem:[#allocation50_spill] sm:$0xff] %v11380_v23  ;;  %12509 = vst [vmem:[#allocation51_spill] sm:$0xff] %v11382_v26  ;;  %v11390_v33 = vld [vmem:[#allocation18 + $0x164] ss:$16 sps:$4 sm:$0xff]   ;;  %v11396_v29 = vld [vmem:[#allocation18 + $0x168] ss:$16 sps:$4 sm:$0xff]  }
 0x636   : > { %12511 = vst [vmem:[#allocation53_spill] sm:$0xff] %v11390_v33  ;;  %12514 = vst [vmem:[#allocation57_spill] sm:$0xff] %v11396_v29 }
 0x638   : > { %4829 = vmatpush1.bf16.msra.mxu0 %v11370_v36  ;;  %4870 = vmatpush1.bf16.msra.mxu1 %v11372_v10  ;;  %v11392_v36 = vld [vmem:[#allocation18 + $0x16c] ss:$16 sps:$4 sm:$0xff]   ;;  %v11394_v10 = vld [vmem:[#allocation18 + $0x160] ss:$16 sps:$4 sm:$0xff]  }
 0x639   : > { %4830 = vmatprep.subr.bf16.mxu0 %v11378_v17  ;;  %4871 = vmatprep.subr.bf16.mxu1 %v11380_v23  ;;  %12512 = vst [vmem:[#allocation54_spill] sm:$0xff] %v11392_v36  ;;  %12513 = vst [vmem:[#allocation55_spill] sm:$0xff] %v11394_v10  ;;  %v11402_v23 = vld [vmem:[#allocation18 + $0x184] ss:$16 sps:$4 sm:$0xff]   ;;  %v11408_v17 = vld [vmem:[#allocation18 + $0x188] ss:$16 sps:$4 sm:$0xff]  }
 0x63a   : > { %12515 = vst [vmem:[#allocation61_spill] sm:$0xff] %v11402_v23  ;;  %12518 = vst [vmem:[#allocation56_spill] sm:$0xff] %v11408_v17 }
 0x63c   : > { %4831 = vmatpush1.bf16.msra.mxu0 %v11382_v26  ;;  %4872 = vmatpush1.bf16.msra.mxu1 %v11384_v14  ;;  %v11404_v26 = vld [vmem:[#allocation18 + $0x18c] ss:$16 sps:$4 sm:$0xff]   ;;  %v11406_v14 = vld [vmem:[#allocation18 + $0x180] ss:$16 sps:$4 sm:$0xff]  }
 0x63d   : > { %4832 = vmatprep.subr.bf16.mxu0 %v11390_v33  ;;  %4873 = vmatprep.subr.bf16.mxu1 %v11392_v36  ;;  %12516 = vst [vmem:[#allocation60_spill] sm:$0xff] %v11404_v26  ;;  %12517 = vst [vmem:[#allocation62_spill] sm:$0xff] %v11406_v14  ;;  %v11414_v33 = vld [vmem:[#allocation18 + $0x1ac] ss:$16 sps:$4 sm:$0xff]   ;;  %v11424_v36 = vld [vmem:[#allocation18 + $0x1c4] ss:$16 sps:$4 sm:$0xff]  }
 0x63e   : > { %12520 = vst [vmem:[#allocation82_spill] sm:$0xff] %v11414_v33  ;;  %12523 = vst [vmem:[#allocation85_spill] sm:$0xff] %v11424_v36 }
 0x640   : > { %4833 = vmatpush1.bf16.msra.mxu0 %v11394_v10  ;;  %4874 = vmatpush1.bf16.msra.mxu1 %v11396_v29  ;;  %v11418_v29 = vld [vmem:[#allocation18 + $0x1a0] ss:$16 sps:$4 sm:$0xff]   ;;  %v11420_v10 = vld [vmem:[#allocation18 + $0x1a8] ss:$16 sps:$4 sm:$0xff]  }
 0x641   : > { %4834 = vmatprep.subr.bf16.mxu0 %v11402_v23  ;;  %4875 = vmatprep.subr.bf16.mxu1 %v11404_v26  ;;  %12521 = vst [vmem:[#allocation83_spill] sm:$0xff] %v11418_v29  ;;  %12522 = vst [vmem:[#allocation84_spill] sm:$0xff] %v11420_v10  ;;  %v11426_v23 = vld [vmem:[#allocation18 + $0x1cc] ss:$16 sps:$4 sm:$0xff]   ;;  %v11430_v26 = vld [vmem:[#allocation18 + $0x1c0] ss:$16 sps:$4 sm:$0xff]  }
 0x642   : > { %12524 = vst [vmem:[#allocation86_spill] sm:$0xff] %v11426_v23  ;;  %12525 = vst [vmem:[#allocation87_spill] sm:$0xff] %v11430_v26 }
 0x644   : > { %4835 = vmatpush1.bf16.msra.mxu0 %v11406_v14  ;;  %4876 = vmatpush1.bf16.msra.mxu1 %v11408_v17  ;;  %v11432_v14 = vld [vmem:[#allocation18 + $0x1c8] ss:$16 sps:$4 sm:$0xff]   ;;  %v11436_v17 = vld [vmem:[#allocation18 + $0x1e4] ss:$16 sps:$4 sm:$0xff]  }
 0x645   : > { %4836 = vmatprep.subr.bf16.mxu0 %v11412_v8  ;;  %4877 = vmatprep.subr.bf16.mxu1 %v11414_v33  ;;  %12526 = vst [vmem:[#allocation88_spill] sm:$0xff] %v11432_v14  ;;  %12527 = vst [vmem:[#allocation89_spill] sm:$0xff] %v11436_v17  ;;  %v11438_v8 = vld [vmem:[#allocation18 + $0x1ec] ss:$16 sps:$4 sm:$0xff]   ;;  %v11442_v33 = vld [vmem:[#allocation18 + $0x1e0] ss:$16 sps:$4 sm:$0xff]  }
 0x646   : > { %12528 = vst [vmem:[#allocation90_spill] sm:$0xff] %v11438_v8  ;;  %12529 = vst [vmem:[#allocation91_spill] sm:$0xff] %v11442_v33 }
 0x648   : > { %4837 = vmatpush1.bf16.msra.mxu0 %v11418_v29  ;;  %4878 = vmatpush1.bf16.msra.mxu1 %v11420_v10  ;;  %v11444_v29 = vld [vmem:[#allocation18 + $0x1e8] ss:$16 sps:$4 sm:$0xff]  }
 0x649   : > { %4838 = vmatprep.subr.bf16.mxu0 %v11424_v36  ;;  %4879 = vmatprep.subr.bf16.mxu1 %v11426_v23  ;;  %12530 = vst [vmem:[#allocation92_spill] sm:$0xff] %v11444_v29  ;;  %v3656_v23 = vld [vmem:[#allocation20] sm:$0xf] }
 0x64a   : > { %v3665_v10 = vrot.slane %v3656_v23, %v12482_v6  ;;  %v3673_v15 = vrot.slane %v3656_v23, %v12483_v19  ;;  %v3669_v6 = vrot.slane %v3656_v23, %v12385_v4 }
 0x64c   : > { %4839 = vmatpush1.bf16.msra.mxu0 %v11430_v26  ;;  %4880 = vmatpush1.bf16.msra.mxu1 %v11432_v14  ;;  %v3661_v26 = vrot.slane %v3656_v23, %v12481_v3 }
 0x64d   : > { %4840 = vmatprep.subr.bf16.mxu0 %v11436_v17  ;;  %4881 = vmatprep.subr.bf16.mxu1 %v11438_v8 }
 0x650   : > { %4841 = vmatpush1.bf16.msra.mxu0 %v11442_v33  ;;  %4882 = vmatpush1.bf16.msra.mxu1 %v11444_v29 }
 0x651   : > { %5078 = vmatprep.subr.bf16.mxu0 %v11170_v41  ;;  %8616 = vmatprep.subr.bf16.mxu1 %v12329_v63 }
 0x6c6   : > { %v4039_v14 = vpop.f32.mrb[44].mxu0  ;;  %v4080_v36 = vpop.f32.mrb[36].mxu1 }
 0x6c7   : > { %v4040_v5 = vadd.f32 %v4039_v14, %v3661_v26  ;;  %v4041_v51 = vpop.f32.mrb[45].mxu0  ;;  %v4082_v17 = vpop.f32.mrb[37].mxu1 }
 0x6c8   : > { %v4043_v55 = vpop.f32.mrb[46].mxu0  ;;  %v4084_v8 = vpop.f32.mrb[38].mxu1  ;;  %v4042_v29 = vadd.f32 %v4041_v51, %v3665_v10  ;;  %v4083_v26 = vadd.f32 %v4082_v17, %v3673_v15 }
 0x6c9   : > { %v7956_v2 = vmul.f32 -1.442695, %v4040_v5  ;;  %v4044_v33 = vpop.f32.mrb[47].mxu0  ;;  %v4085_v49 = vpop.f32.mrb[39].mxu1  ;;  %v4081_v55 = vadd.f32 %v4080_v36, %v3669_v6 }
 0x6ca   : > { %v7957_v41 = vmul.f32 -1.442695, %v4042_v29 }
 0x6cb   : > { %9476 = vpow2.f32 %v7956_v2  ;;  %v12531_v2 = vld [vmem:[#allocation70_spill] sm:$0xff] }
 0x6cc   : > { %9478 = vpow2.f32 %v7957_v41 }
 0x6d5   : > { %v9477_v40 = vpop.eup %9476 }
 0x6d6   : > { %v4090_v61 = vadd.f32 1.0, %v9477_v40  ;;  %v9479_v3 = vpop.eup %9478 }
 0x6d7   : > { %v4096_v14 = vadd.f32 1.0, %v9479_v3 }
 0x6d8   : > { %9480 = vrcp.f32 %v4090_v61  ;;  %v12532_v61 = vld [vmem:[#allocation71_spill] sm:$0xff] }
 0x6d9   : > { %9482 = vrcp.f32 %v4096_v14 }
 0x6e2   : > { %v9481_v12 = vpop.eup %9480 }
 0x6e3   : > { %v4099_v5 = vmul.f32 %v9481_v12, %v4083_v26  ;;  %v9483_v6 = vpop.eup %9482 }
 0x6e4   : > { %v4102_v12 = vsub.f32 1.0, %v9483_v6  ;;  %v4104_v14 = vmul.f32 %v9483_v6, %v11183_v46 }
 0x6e5   : > { %v4100_v8 = vadd.f32 %v4099_v5, %v4081_v55 }
 0x6e6   : > { %v4307_v49 = vpop.f32.mrb[48].mxu0  ;;  %v4348_v51 = vpop.f32.mrb[40].mxu1 }
 0x6e7   : > { %9484 = vtanh.f32 %v4100_v8  ;;  %v4357_v10 = vadd.f32 %v4307_v49, %v12531_v2  ;;  %v4309_v29 = vpop.f32.mrb[49].mxu0  ;;  %v8614_v40 = vpop.f32.mrb[41].mxu1  ;;  %v11469_v2 = vld [vmem:[#allocation17] ss:$0 sm:$0xff] }
 0x6e8   : > { %v4364_v33 = vadd.f32 %v4309_v29, %v12532_v61  ;;  %v4311_v41 = vpop.f32.mrb[50].mxu0  ;;  %v4351_v19 = vpop.f32.mrb[42].mxu1  ;;  %v4378_v29 = vadd.f32 %v11469_v2, %v4348_v51 }
 0x6e9   : > { %v7983_v48 = vmul.f32 -1.442695, %v4357_v10  ;;  %v4312_v3 = vpop.f32.mrb[51].mxu0  ;;  %v8615_v15 = vpop.f32.mrb[43].mxu1 }
 0x6ea   : > { %v7984_v17 = vmul.f32 -1.442695, %v4364_v33 }
 0x6eb   : > { %9486 = vpow2.f32 %v7983_v48 }
 0x6ec   : > { %9488 = vpow2.f32 %v7984_v17  ;;  %v11474_v17 = vpop.permute.xlu0 %4388 }
 0x6ed   : > { %vm4390_vm13 = vcmp.eq.s32.totalorder %v11474_v17, 1 }
 0x6f1   : > { %v9485_v23 = vpop.eup %9484 }
 0x6f2   : > { %v4103_v36 = vmul.f32 %v9485_v23, %v4102_v12  ;;  %v9262_v23 = vld [vmem:[#allocation15 + $0x8] ss:$12 sps:$4 sm:$0xff]  }
 0x6f4   : > { %v4105_v26 = vadd.f32 %v4104_v14, %v4103_v36  ;;  %v9263_v14 = vld [vmem:[#allocation15 + $0x20] ss:$12 sps:$4 sm:$0xff]  }
 0x6f5   : > { %v9487_v55 = vpop.eup %9486 }
 0x6f6   : > { %v4361_v5 = vadd.f32 1.0, %v9487_v55  ;;  %v11462_v19 = vsel %vm3585_vm12, %v4105_v26, %v11183_v46  ;;  %v4107_v8 = vsel %vm3585_vm12, %v4105_v26, 0.0  ;;  %v9489_v49 = vpop.eup %9488  ;;  %v12533_v46 = vld [vmem:[#allocation75_spill] sm:$0xff]  ;;  %v12564_v26 = vld [vmem:[#allocation62_spill] sm:$0xff]  ;;  %v12565_v55 = vld [vmem:[#allocation56_spill] sm:$0xff] }
 0x6f7   : > { %7958 = vst [vmem:[%s10356_s18 + $0x18] sm:$0xff] %v4107_v8  ;;  %v8401_v48 = vpack.c.bf16 %v11462_v19, %v11462_v19  ;;  %v4368_v10 = vadd.f32 1.0, %v9489_v49  ;;  %v12567_v8 = vld [vmem:[#allocation82_spill] sm:$0xff]  ;;  %v12569_v49 = vld [vmem:[#allocation84_spill] sm:$0xff] }
 0x6f8   : > { %9490 = vrcp.f32 %v4361_v5  ;;  %v12566_v5 = vld [vmem:[#allocation69_spill] sm:$0xff] }
 0x6f9   : > { %4842 = vmatprep.mubr.bf16.mxu0 %v8401_v48  ;;  %4883 = vmatprep.mubr.bf16.mxu1 %v8401_v48  ;;  %9492 = vrcp.f32 %v4368_v10  ;;  %v12568_v48 = vld [vmem:[#allocation83_spill] sm:$0xff]  ;;  %v12570_v10 = vld [vmem:[#allocation85_spill] sm:$0xff] }
 0x702   : > { %v9491_v40 = vpop.eup %9490 }
 0x703   : > { %v4379_v61 = vmul.f32 %v9491_v40, %v4378_v29  ;;  %v9493_v57 = vpop.eup %9492  ;;  %v12571_v29 = vld [vmem:[#allocation86_spill] sm:$0xff]  ;;  %v12572_v40 = vld [vmem:[#allocation87_spill] sm:$0xff] }
 0x704   : > { %v4382_v41 = vsub.f32 1.0, %v9493_v57  ;;  %v4384_v15 = vmul.f32 %v9493_v57, %v11201_v56  ;;  %v12576_v57 = vld [vmem:[#allocation91_spill] sm:$0xff] }
 0x705   : > { %v4380_v33 = vadd.f32 %v4379_v61, %v12533_v46  ;;  %v12573_v61 = vld [vmem:[#allocation88_spill] sm:$0xff]  ;;  %v12574_v46 = vld [vmem:[#allocation89_spill] sm:$0xff] }
 0x707   : > { %9494 = vtanh.f32 %v4380_v33  ;;  %v12575_v33 = vld [vmem:[#allocation90_spill] sm:$0xff] }
 0x711   : > { %v9495_v3 = vpop.eup %9494 }
 0x712   : > { %v4383_v6 = vmul.f32 %v9495_v3, %v4382_v41  ;;  %v12577_v41 = vld [vmem:[#allocation92_spill] sm:$0xff] }
 0x713   : > { %v11574_v3 = vld [vmem:[#allocation15 + $0x4] ss:$12 sps:$4 sm:$0xff]  }
 0x714   : > { %v4385_v12 = vadd.f32 %v4384_v15, %v4383_v6  ;;  %v4461_v15 = vld [vmem:[#allocation20] sm:$0xf]  ;;  %v12578_v6 = vld [vmem:[#allocation58_spill] sm:$0xff] }
 0x716   : > { %v11480_v51 = vsel %vm4390_vm13, %v4385_v12, %v11201_v56  ;;  %v9264_v56 = vld [vmem:[#allocation15 + $0x38] ss:$12 sps:$4 sm:$0xff]   ;;  %v4466_v12 = vrot.slane %v4461_v15, %v12578_v6 }
 0x717   : > { %v4392_v36 = vpack.c.bf16 %v11480_v51, %v11480_v51 }
 0x719   : > { %4843 = vmatmul.mubr.bf16.vlgmr.msra.gmra.mrb[52].mxu0 %v4392_v36  ;;  %4884 = vmatmul.mubr.bf16.vlgmr.msra.gmra.mrb[44].mxu1 %v4392_v36 }
 0x71a   : > { %5079 = vmatpush1.bf16.msra.mxu0 %v11196_v7  ;;  %8617 = vmatpush3.bf16.msra.mxu1 %v9262_v23  ;;  %v9265_v7 = vld [vmem:[#allocation15 + $0x50] ss:$12 sps:$4 sm:$0xff]  }
 0x71b   : > { %5080 = vmatprep.subr.bf16.mxu0 %v11205_v11  ;;  %8618 = vmatprep.subr.bf16.mxu1 %v12329_v63  ;;  %v9266_v11 = vld [vmem:[#allocation15 + $0x68] ss:$12 sps:$4 sm:$0xff]  }
 0x71c   : > { %5110 = vmatprep.mubr.bf16.mxu0 %v12355_v1  ;;  %8632 = vmatprep.mubr.msk.bf16.mxu1 %vm9972_vm2, %v12329_v63 }
 0x71e   : > { %5081 = vmatpush1.bf16.msra.mxu0 %v11208_v13  ;;  %8619 = vmatpush3.bf16.msra.mxu1 %v9263_v14  ;;  %v9267_v13 = vld [vmem:[#allocation15 + $0x80] ss:$12 sps:$4 sm:$0xff]   ;;  %v12579_v14 = vld [vmem:[#allocation59_spill] sm:$0xff] }
 0x71f   : > { %5082 = vmatprep.subr.bf16.mxu0 %v11212_v52  ;;  %8620 = vmatprep.subr.bf16.mxu1 %v12329_v63  ;;  %v9268_v52 = vld [vmem:[#allocation15 + $0x98] ss:$12 sps:$4 sm:$0xff]  }
 0x722   : > { %5083 = vmatpush1.bf16.msra.mxu0 %v11218_v16  ;;  %8621 = vmatpush3.bf16.msra.mxu1 %v9264_v56  ;;  %v9269_v16 = vld [vmem:[#allocation15 + $0xb0] ss:$12 sps:$4 sm:$0xff]   ;;  %v4470_v56 = vrot.slane %v4461_v15, %v12579_v14 }
 0x723   : > { %5084 = vmatprep.subr.bf16.mxu0 %v11222_v20  ;;  %8622 = vmatprep.subr.bf16.mxu1 %v12329_v63  ;;  %v12534_v20 = vld [vmem:[#allocation63_spill] sm:$0xff] }
 0x726   : > { %5085 = vmatpush1.bf16.msra.mxu0 %v11225_v22  ;;  %8623 = vmatpush3.bf16.msra.mxu1 %v9265_v7  ;;  %v12535_v22 = vld [vmem:[#allocation64_spill] sm:$0xff] }
 0x727   : > { %5086 = vmatprep.subr.bf16.mxu0 %v11229_v24  ;;  %8624 = vmatprep.subr.bf16.mxu1 %v12329_v63  ;;  %v12536_v24 = vld [vmem:[#allocation66_spill] sm:$0xff] }
 0x72a   : > { %5087 = vmatpush1.bf16.msra.mxu0 %v11232_v25  ;;  %8625 = vmatpush3.bf16.msra.mxu1 %v9266_v11  ;;  %v12537_v25 = vld [vmem:[#allocation32_spill] sm:$0xff] }
 0x72b   : > { %5088 = vmatprep.subr.bf16.mxu0 %v11236_v27  ;;  %8626 = vmatprep.subr.bf16.mxu1 %v12329_v63  ;;  %v12538_v27 = vld [vmem:[#allocation33_spill] sm:$0xff] }
 0x72e   : > { %5089 = vmatpush1.bf16.msra.mxu0 %v11239_v28  ;;  %8627 = vmatpush3.bf16.msra.mxu1 %v9267_v13  ;;  %v12539_v28 = vld [vmem:[#allocation34_spill] sm:$0xff] }
 0x72f   : > { %5090 = vmatprep.subr.bf16.mxu0 %v11243_v31  ;;  %8628 = vmatprep.subr.bf16.mxu1 %v12329_v63  ;;  %v12540_v31 = vld [vmem:[#allocation35_spill] sm:$0xff] }
 0x732   : > { %5091 = vmatpush1.bf16.msra.mxu0 %v11246_v32  ;;  %8629 = vmatpush3.bf16.msra.mxu1 %v9268_v52  ;;  %v12541_v32 = vld [vmem:[#allocation36_spill] sm:$0xff] }
 0x733   : > { %5092 = vmatprep.subr.bf16.mxu0 %v11250_v34  ;;  %8630 = vmatprep.subr.bf16.mxu1 %v12329_v63  ;;  %v12542_v34 = vld [vmem:[#allocation37_spill] sm:$0xff] }
 0x736   : > { %5093 = vmatpush1.bf16.msra.mxu0 %v11253_v35  ;;  %8631 = vmatpush3.bf16.msra.mxu1 %v9269_v16  ;;  %v12543_v35 = vld [vmem:[#allocation38_spill] sm:$0xff] }
 0x737   : > { %5615 = vmatprep.subr.bf16.mxu0 %v11258_v38  ;;  %5656 = vmatprep.subr.bf16.mxu1 %v11260_v39  ;;  %v12544_v38 = vld [vmem:[#allocation39_spill] sm:$0xff]  ;;  %v12545_v39 = vld [vmem:[#allocation40_spill] sm:$0xff] }
 0x739   : > { %5111 = vmatmul.mubr.bf16.vlgmr.msra.gmra.mrb[56].mxu0 %v4392_v36  ;;  %8633 = vmatmul.mubr.bf16.vlgmr.msra.gmra.mrb[48].mxu1 %v4392_v36 }
 0x73a   : > { %5616 = vmatpush1.bf16.msra.mxu0 %v11262_v42  ;;  %5657 = vmatpush1.bf16.msra.mxu1 %v11264_v43  ;;  %v12546_v42 = vld [vmem:[#allocation41_spill] sm:$0xff]  ;;  %v12547_v43 = vld [vmem:[#allocation42_spill] sm:$0xff] }
 0x73b   : > { %5617 = vmatprep.subr.bf16.mxu0 %v11270_v45  ;;  %5658 = vmatprep.subr.bf16.mxu1 %v11272_v59  ;;  %v12548_v45 = vld [vmem:[#allocation43_spill] sm:$0xff]  ;;  %v12549_v59 = vld [vmem:[#allocation44_spill] sm:$0xff] }
 0x73e   : > { %5618 = vmatpush1.bf16.msra.mxu0 %v11274_v9  ;;  %5659 = vmatpush1.bf16.msra.mxu1 %v11276_v0  ;;  %v12550_v9 = vld [vmem:[#allocation45_spill] sm:$0xff]  ;;  %v12551_v0 = vld [vmem:[#allocation46_spill] sm:$0xff] }
 0x73f   : > { %5619 = vmatprep.subr.bf16.mxu0 %v11282_v58  ;;  %5660 = vmatprep.subr.bf16.mxu1 %v11284_v18  ;;  %v12552_v58 = vld [vmem:[#allocation47_spill] sm:$0xff]  ;;  %v12553_v18 = vld [vmem:[#allocation48_spill] sm:$0xff] }
 0x742   : > { %5620 = vmatpush1.bf16.msra.mxu0 %v11286_v62  ;;  %5661 = vmatpush1.bf16.msra.mxu1 %v11288_v47  ;;  %v12554_v62 = vld [vmem:[#allocation49_spill] sm:$0xff]  ;;  %v12555_v47 = vld [vmem:[#allocation50_spill] sm:$0xff] }
 0x743   : > { %5621 = vmatprep.subr.bf16.mxu0 %v11294_v50  ;;  %5662 = vmatprep.subr.bf16.mxu1 %v11296_v53  ;;  %v12556_v50 = vld [vmem:[#allocation51_spill] sm:$0xff]  ;;  %v12557_v53 = vld [vmem:[#allocation52_spill] sm:$0xff] }
 0x746   : > { %5622 = vmatpush1.bf16.msra.mxu0 %v11298_v44  ;;  %5663 = vmatpush1.bf16.msra.mxu1 %v11300_v37  ;;  %v12558_v44 = vld [vmem:[#allocation53_spill] sm:$0xff]  ;;  %v12559_v37 = vld [vmem:[#allocation54_spill] sm:$0xff] }
 0x747   : > { %5623 = vmatprep.subr.bf16.mxu0 %v11306_v21  ;;  %5664 = vmatprep.subr.bf16.mxu1 %v11308_v54  ;;  %v12560_v21 = vld [vmem:[#allocation55_spill] sm:$0xff]  ;;  %v12561_v54 = vld [vmem:[#allocation57_spill] sm:$0xff] }
 0x74a   : > { %5624 = vmatpush1.bf16.msra.mxu0 %v11310_v30  ;;  %5665 = vmatpush1.bf16.msra.mxu1 %v11312_v60  ;;  %v12562_v30 = vld [vmem:[#allocation61_spill] sm:$0xff]  ;;  %v12563_v60 = vld [vmem:[#allocation60_spill] sm:$0xff] }
 0x74b   : > { %5625 = vmatprep.subr.bf16.mxu0 %v12534_v20  ;;  %5666 = vmatprep.subr.bf16.mxu1 %v12535_v22 }
 0x74e   : > { %5626 = vmatpush1.bf16.msra.mxu0 %v12536_v24  ;;  %5667 = vmatpush1.bf16.msra.mxu1 %v12537_v25 }
 0x74f   : > { %5627 = vmatprep.subr.bf16.mxu0 %v12538_v27  ;;  %5668 = vmatprep.subr.bf16.mxu1 %v12539_v28 }
 0x752   : > { %5628 = vmatpush1.bf16.msra.mxu0 %v12540_v31  ;;  %5669 = vmatpush1.bf16.msra.mxu1 %v12541_v32 }
 0x753   : > { %5629 = vmatprep.subr.bf16.mxu0 %v12542_v34  ;;  %5670 = vmatprep.subr.bf16.mxu1 %v12543_v35  ;;  %v12580_v34 = vld [vmem:[#allocation31_spill] sm:$0xff] }
 0x754   : > { %v4478_v35 = vrot.slane %v4461_v15, %v12580_v34 }
 0x756   : > { %5630 = vmatpush1.bf16.msra.mxu0 %v12544_v38  ;;  %5671 = vmatpush1.bf16.msra.mxu1 %v12545_v39  ;;  %v4474_v38 = vrot.slane %v4461_v15, %v12385_v4 }
 0x757   : > { %5631 = vmatprep.subr.bf16.mxu0 %v12546_v42  ;;  %5672 = vmatprep.subr.bf16.mxu1 %v12547_v43 }
 0x75a   : > { %5632 = vmatpush1.bf16.msra.mxu0 %v12548_v45  ;;  %5673 = vmatpush1.bf16.msra.mxu1 %v12549_v59 }
 0x75b   : > { %5633 = vmatprep.subr.bf16.mxu0 %v12550_v9  ;;  %5674 = vmatprep.subr.bf16.mxu1 %v12551_v0 }
 0x75e   : > { %5634 = vmatpush1.bf16.msra.mxu0 %v12552_v58  ;;  %5675 = vmatpush1.bf16.msra.mxu1 %v12553_v18  ;;  %v12581_v18 = vld [vmem:[#allocation72_spill] sm:$0xff] }
 0x75f   : > { %5635 = vmatprep.subr.bf16.mxu0 %v12554_v62  ;;  %5676 = vmatprep.subr.bf16.mxu1 %v12555_v47 }
 0x762   : > { %5636 = vmatpush1.bf16.msra.mxu0 %v12556_v50  ;;  %5677 = vmatpush1.bf16.msra.mxu1 %v12557_v53  ;;  %v12582_v53 = vld [vmem:[#allocation74_spill] sm:$0xff] }
 0x763   : > { %5637 = vmatprep.subr.bf16.mxu0 %v12558_v44  ;;  %5678 = vmatprep.subr.bf16.mxu1 %v12559_v37 }
 0x766   : > { %5638 = vmatpush1.bf16.msra.mxu0 %v12560_v21  ;;  %5679 = vmatpush1.bf16.msra.mxu1 %v12561_v54 }
 0x767   : > { %5639 = vmatprep.subr.bf16.mxu0 %v12562_v30  ;;  %5680 = vmatprep.subr.bf16.mxu1 %v12563_v60 }
 0x76a   : > { %5640 = vmatpush1.bf16.msra.mxu0 %v12564_v26  ;;  %5681 = vmatpush1.bf16.msra.mxu1 %v12565_v55 }
 0x76b   : > { %5641 = vmatprep.subr.bf16.mxu0 %v12566_v5  ;;  %5682 = vmatprep.subr.bf16.mxu1 %v12567_v8 }
 0x76e   : > { %5642 = vmatpush1.bf16.msra.mxu0 %v12568_v48  ;;  %5683 = vmatpush1.bf16.msra.mxu1 %v12569_v49 }
 0x76f   : > { %5643 = vmatprep.subr.bf16.mxu0 %v12570_v10  ;;  %5684 = vmatprep.subr.bf16.mxu1 %v12571_v29 }
 0x772   : > { %5644 = vmatpush1.bf16.msra.mxu0 %v12572_v40  ;;  %5685 = vmatpush1.bf16.msra.mxu1 %v12573_v61 }
 0x773   : > { %5645 = vmatprep.subr.bf16.mxu0 %v12574_v46  ;;  %5686 = vmatprep.subr.bf16.mxu1 %v12575_v33 }
 0x776   : > { %5646 = vmatpush1.bf16.msra.mxu0 %v12576_v57  ;;  %5687 = vmatpush1.bf16.msra.mxu1 %v12577_v41 }
 0x777   : > { %8636 = vmatprep.subr.bf16.mxu1 %v12329_v63  ;;  %5883 = vmatprep.subr.bf16.mxu0 %v11574_v3 }
 0x7ec   : > { %v4844_v23 = vpop.f32.mrb[52].mxu0  ;;  %v4885_v36 = vpop.f32.mrb[44].mxu1 }
 0x7ed   : > { %v4845_v7 = vadd.f32 %v4844_v23, %v4466_v12  ;;  %v4846_v11 = vpop.f32.mrb[53].mxu0  ;;  %v4887_v13 = vpop.f32.mrb[45].mxu1  ;;  %v4886_v45 = vadd.f32 %v4885_v36, %v4474_v38  ;;  %v12583_v36 = vld [vmem:[#allocation77_spill] sm:$0xff] }
 0x7ee   : > { %v4848_v52 = vpop.f32.mrb[54].mxu0  ;;  %v4889_v16 = vpop.f32.mrb[46].mxu1  ;;  %v4847_v25 = vadd.f32 %v4846_v11, %v4470_v56  ;;  %v4888_v42 = vadd.f32 %v4887_v13, %v4478_v35  ;;  %v11626_v35 = vld [vmem:[#allocation15 + $0x4c] ss:$12 sps:$4 sm:$0xff]   ;;  %v11629_v38 = vld [vmem:[#allocation15 + $0x48] ss:$12 sps:$4 sm:$0xff]  }
 0x7ef   : > { %v8052_v20 = vmul.f32 -1.442695, %v4845_v7  ;;  %v4849_v22 = vpop.f32.mrb[55].mxu0  ;;  %v4890_v24 = vpop.f32.mrb[47].mxu1 }
 0x7f0   : > { %v8053_v27 = vmul.f32 -1.442695, %v4847_v25  ;;  %v11597_v52 = vpop.permute.xlu1 %5193  ;;  %v9273_v22 = vld [vmem:[#allocation15 + $0x8] ss:$12 sps:$4 sm:$0xff]  }
 0x7f1   : > { %9496 = vpow2.f32 %v8052_v20  ;;  %vm5195_vm14 = vcmp.eq.s32.totalorder %v11597_v52, 1  ;;  %v11600_v20 = vld [vmem:[#allocation15] ss:$12 sps:$4 sm:$0xff]   ;;  %v11609_v25 = vld [vmem:[#allocation15 + $0x1c] ss:$12 sps:$4 sm:$0xff]  }
 0x7f2   : > { %9498 = vpow2.f32 %v8053_v27  ;;  %v11612_v27 = vld [vmem:[#allocation15 + $0x18] ss:$12 sps:$4 sm:$0xff]  }
 0x7fb   : > { %v9497_v28 = vpop.eup %9496 }
 0x7fc   : > { %v4895_v31 = vadd.f32 1.0, %v9497_v28  ;;  %v9499_v32 = vpop.eup %9498  ;;  %v9277_v28 = vld [vmem:[#allocation15 + $0x20] ss:$12 sps:$4 sm:$0xff]  }
 0x7fd   : > { %v4901_v39 = vadd.f32 1.0, %v9499_v32  ;;  %v9281_v32 = vld [vmem:[#allocation15 + $0x38] ss:$12 sps:$4 sm:$0xff]  }
 0x7fe   : > { %9500 = vrcp.f32 %v4895_v31  ;;  %v11622_v31 = vld [vmem:[#allocation15 + $0x30] ss:$12 sps:$4 sm:$0xff]  }
 0x7ff   : > { %9502 = vrcp.f32 %v4901_v39  ;;  %v9285_v39 = vld [vmem:[#allocation15 + $0x50] ss:$12 sps:$4 sm:$0xff]  }
 0x808   : > { %v9501_v43 = vpop.eup %9500 }
 0x809   : > { %v4904_v59 = vmul.f32 %v9501_v43, %v4888_v42  ;;  %v9503_v26 = vpop.eup %9502  ;;  %v11633_v42 = vld [vmem:[#allocation15 + $0x64] ss:$12 sps:$4 sm:$0xff]   ;;  %v11636_v43 = vld [vmem:[#allocation15 + $0x60] ss:$12 sps:$4 sm:$0xff]  }
 0x80a   : > { %v4907_v5 = vsub.f32 1.0, %v9503_v26  ;;  %v4909_v49 = vmul.f32 %v9503_v26, %v11462_v19  ;;  %v11678_v26 = vld [vmem:[#allocation18 + $0x20] ss:$16 sps:$4 sm:$0xff]  }
 0x80b   : > { %v4905_v9 = vadd.f32 %v4904_v59, %v4886_v45  ;;  %v9289_v45 = vld [vmem:[#allocation15 + $0x68] ss:$12 sps:$4 sm:$0xff]  }
 0x80c   : > { %v5112_v0 = vpop.f32.mrb[56].mxu0  ;;  %v5153_v58 = vpop.f32.mrb[48].mxu1  ;;  %v11640_v59 = vld [vmem:[#allocation15 + $0x7c] ss:$12 sps:$4 sm:$0xff]  }
 0x80d   : > { %9504 = vtanh.f32 %v4905_v9  ;;  %v5162_v62 = vadd.f32 %v5112_v0, %v12581_v18  ;;  %v5114_v47 = vpop.f32.mrb[57].mxu0  ;;  %v8634_v50 = vpop.f32.mrb[49].mxu1  ;;  %v5183_v15 = vadd.f32 %v11469_v2, %v5153_v58  ;;  %v11643_v9 = vld [vmem:[#allocation15 + $0x78] ss:$12 sps:$4 sm:$0xff]   ;;  %v9293_v0 = vld [vmem:[#allocation15 + $0x80] ss:$12 sps:$4 sm:$0xff]  }
 0x80e   : > { %v5169_v44 = vadd.f32 %v5114_v47, %v12582_v53  ;;  %v5116_v37 = vpop.f32.mrb[58].mxu0  ;;  %v5156_v21 = vpop.f32.mrb[50].mxu1  ;;  %v11647_v58 = vld [vmem:[#allocation15 + $0x94] ss:$12 sps:$4 sm:$0xff]   ;;  %v11650_v18 = vld [vmem:[#allocation15 + $0x90] ss:$12 sps:$4 sm:$0xff]  }
 0x80f   : > { %v8079_v54 = vmul.f32 -1.442695, %v5162_v62  ;;  %v5117_v30 = vpop.f32.mrb[59].mxu0  ;;  %v8635_v60 = vpop.f32.mrb[51].mxu1  ;;  %v9297_v62 = vld [vmem:[#allocation15 + $0x98] ss:$12 sps:$4 sm:$0xff]  }
 0x810   : > { %v8080_v55 = vmul.f32 -1.442695, %v5169_v44  ;;  %v11654_v47 = vld [vmem:[#allocation15 + $0xac] ss:$12 sps:$4 sm:$0xff]   ;;  %v11657_v50 = vld [vmem:[#allocation15 + $0xa8] ss:$12 sps:$4 sm:$0xff]  }
 0x811   : > { %9506 = vpow2.f32 %v8079_v54  ;;  %v9301_v53 = vld [vmem:[#allocation15 + $0xb0] ss:$12 sps:$4 sm:$0xff]   ;;  %v11662_v44 = vld [vmem:[#allocation18 + $0x4] ss:$16 sps:$4 sm:$0xff]  }
 0x812   : > { %9508 = vpow2.f32 %v8080_v55  ;;  %v11664_v37 = vld [vmem:[#allocation18 + $0xc] ss:$16 sps:$4 sm:$0xff]   ;;  %v11666_v21 = vld [vmem:[#allocation18] ss:$16 sps:$4 sm:$0xff]   ;;  %v11668_v54 = vld [vmem:[#allocation18 + $0x8] ss:$16 sps:$4 sm:$0xff]  }
 0x813   : > { %v11674_v30 = vld [vmem:[#allocation18 + $0x24] ss:$16 sps:$4 sm:$0xff]   ;;  %v11676_v60 = vld [vmem:[#allocation18 + $0x2c] ss:$16 sps:$4 sm:$0xff]   ;;  %v11680_v55 = vld [vmem:[#allocation18 + $0x28] ss:$16 sps:$4 sm:$0xff]  }
 0x817   : > { %v9505_v8 = vpop.eup %9504 }
 0x818   : > { %v4908_v48 = vmul.f32 %v9505_v8, %v4907_v5  ;;  %v11686_v5 = vld [vmem:[#allocation18 + $0x44] ss:$16 sps:$4 sm:$0xff]   ;;  %v11688_v8 = vld [vmem:[#allocation18 + $0x4c] ss:$16 sps:$4 sm:$0xff]  }
 0x81a   : > { %v4910_v10 = vadd.f32 %v4909_v49, %v4908_v48  ;;  %v11690_v48 = vld [vmem:[#allocation18 + $0x40] ss:$16 sps:$4 sm:$0xff]   ;;  %v11692_v49 = vld [vmem:[#allocation18 + $0x48] ss:$16 sps:$4 sm:$0xff]  }
 0x81b   : > { %v9507_v29 = vpop.eup %9506 }
 0x81c   : > { %v5166_v40 = vadd.f32 1.0, %v9507_v29  ;;  %v11587_v61 = vsel %vm4390_vm13, %v4910_v10, %v11462_v19  ;;  %v4912_v46 = vsel %vm4390_vm13, %v4910_v10, 0.0  ;;  %v9509_v57 = vpop.eup %9508  ;;  %v11698_v10 = vld [vmem:[#allocation18 + $0x64] ss:$16 sps:$4 sm:$0xff]   ;;  %v11700_v29 = vld [vmem:[#allocation18 + $0x6c] ss:$16 sps:$4 sm:$0xff]  }
 0x81d   : > { %8054 = vst [vmem:[%s10356_s18 + $0x20] sm:$0xff] %v4912_v46  ;;  %v8403_v33 = vpack.c.bf16 %v11587_v61, %v11587_v61  ;;  %v5173_v41 = vadd.f32 1.0, %v9509_v57  ;;  %v11704_v46 = vld [vmem:[#allocation18 + $0x68] ss:$16 sps:$4 sm:$0xff]   ;;  %v11712_v57 = vld [vmem:[#allocation18 + $0x8c] ss:$16 sps:$4 sm:$0xff]  }
 0x81e   : > { %9510 = vrcp.f32 %v5166_v40  ;;  %v11702_v40 = vld [vmem:[#allocation18 + $0x60] ss:$16 sps:$4 sm:$0xff]  }
 0x81f   : > { %5647 = vmatprep.mubr.bf16.mxu0 %v8403_v33  ;;  %5688 = vmatprep.mubr.bf16.mxu1 %v8403_v33  ;;  %9512 = vrcp.f32 %v5173_v41  ;;  %v11710_v33 = vld [vmem:[#allocation18 + $0x84] ss:$16 sps:$4 sm:$0xff]   ;;  %v11714_v41 = vld [vmem:[#allocation18 + $0x80] ss:$16 sps:$4 sm:$0xff]  }
 0x828   : > { %v9511_v12 = vpop.eup %9510 }
 0x829   : > { %v5184_v23 = vmul.f32 %v9511_v12, %v5183_v15  ;;  %v9513_v56 = vpop.eup %9512  ;;  %v11716_v15 = vld [vmem:[#allocation18 + $0x88] ss:$16 sps:$4 sm:$0xff]   ;;  %v11722_v12 = vld [vmem:[#allocation18 + $0xa4] ss:$16 sps:$4 sm:$0xff]  }
 0x82a   : > { %v5187_v17 = vsub.f32 1.0, %v9513_v56  ;;  %v5189_v11 = vmul.f32 %v9513_v56, %v11480_v51  ;;  %12584 = vst [vmem:[#allocation93_spill] sm:$0xff] %v11722_v12  ;;  %v11734_v56 = vld [vmem:[#allocation18 + $0xc4] ss:$16 sps:$4 sm:$0xff]  }
 0x82b   : > { %v5185_v19 = vadd.f32 %v5184_v23, %v12583_v36  ;;  %v11724_v23 = vld [vmem:[#allocation18 + $0xac] ss:$16 sps:$4 sm:$0xff]   ;;  %v11726_v36 = vld [vmem:[#allocation18 + $0xa0] ss:$16 sps:$4 sm:$0xff]   ;;  %12588 = vst [vmem:[#allocation67_spill] sm:$0xff] %v11734_v56 }
 0x82c   : > { %12585 = vst [vmem:[#allocation94_spill] sm:$0xff] %v11724_v23  ;;  %12586 = vst [vmem:[#allocation95_spill] sm:$0xff] %v11726_v36 }
 0x82d   : > { %9514 = vtanh.f32 %v5185_v19  ;;  %v11728_v19 = vld [vmem:[#allocation18 + $0xa8] ss:$16 sps:$4 sm:$0xff]  }
 0x82e   : > { %12587 = vst [vmem:[#allocation65_spill] sm:$0xff] %v11728_v19 }
 0x837   : > { %v9515_v7 = vpop.eup %9514 }
 0x838   : > { %v5188_v13 = vmul.f32 %v9515_v7, %v5187_v17  ;;  %v11736_v17 = vld [vmem:[#allocation18 + $0xcc] ss:$16 sps:$4 sm:$0xff]   ;;  %v11738_v7 = vld [vmem:[#allocation18 + $0xc0] ss:$16 sps:$4 sm:$0xff]  }
 0x839   : > { %12589 = vst [vmem:[#allocation68_spill] sm:$0xff] %v11736_v17  ;;  %12590 = vst [vmem:[#allocation70_spill] sm:$0xff] %v11738_v7 }
 0x83a   : > { %v5190_v16 = vadd.f32 %v5189_v11, %v5188_v13  ;;  %v11740_v11 = vld [vmem:[#allocation18 + $0xc8] ss:$16 sps:$4 sm:$0xff]   ;;  %v11746_v13 = vld [vmem:[#allocation18 + $0xe4] ss:$16 sps:$4 sm:$0xff]  }
 0x83b   : > { %12591 = vst [vmem:[#allocation71_spill] sm:$0xff] %v11740_v11  ;;  %12592 = vst [vmem:[#allocation75_spill] sm:$0xff] %v11746_v13 }
 0x83c   : > { %v11605_v2 = vsel %vm5195_vm14, %v5190_v16, %v11480_v51  ;;  %v11616_v51 = vld [vmem:[#allocation15 + $0x34] ss:$12 sps:$4 sm:$0xff]  }
 0x83d   : > { %v5197_v24 = vpack.c.bf16 %v11605_v2, %v11605_v2  ;;  %v11748_v16 = vld [vmem:[#allocation18 + $0xec] ss:$16 sps:$4 sm:$0xff]  }
 0x83e   : > { %12593 = vst [vmem:[#allocation63_spill] sm:$0xff] %v11748_v16 }
 0x83f   : > { %5648 = vmatmul.mubr.bf16.vlgmr.msra.gmra.mrb[60].mxu0 %v5197_v24  ;;  %5689 = vmatmul.mubr.bf16.vlgmr.msra.gmra.mrb[52].mxu1 %v5197_v24 }
 0x840   : > { %5884 = vmatpush1.bf16.msra.mxu0 %v11600_v20  ;;  %8637 = vmatpush3.bf16.msra.mxu1 %v9273_v22  ;;  %v11750_v22 = vld [vmem:[#allocation18 + $0xe0] ss:$16 sps:$4 sm:$0xff]  }
 0x841   : > { %5885 = vmatprep.subr.bf16.mxu0 %v11609_v25  ;;  %8638 = vmatprep.subr.bf16.mxu1 %v12329_v63  ;;  %12594 = vst [vmem:[#allocation64_spill] sm:$0xff] %v11750_v22 }
 0x842   : > { %5915 = vmatprep.mubr.bf16.mxu0 %v12355_v1  ;;  %8652 = vmatprep.mubr.msk.bf16.mxu1 %vm9972_vm2, %v12329_v63 }
 0x844   : > { %5886 = vmatpush1.bf16.msra.mxu0 %v11612_v27  ;;  %8639 = vmatpush3.bf16.msra.mxu1 %v9277_v28  ;;  %v11758_v28 = vld [vmem:[#allocation18 + $0x104] ss:$16 sps:$4 sm:$0xff]  }
 0x845   : > { %5887 = vmatprep.subr.bf16.mxu0 %v11616_v51  ;;  %8640 = vmatprep.subr.bf16.mxu1 %v12329_v63  ;;  %12596 = vst [vmem:[#allocation32_spill] sm:$0xff] %v11758_v28 }
 0x848   : > { %5888 = vmatpush1.bf16.msra.mxu0 %v11622_v31  ;;  %8641 = vmatpush3.bf16.msra.mxu1 %v9281_v32  ;;  %v11760_v32 = vld [vmem:[#allocation18 + $0x10c] ss:$16 sps:$4 sm:$0xff]  }
 0x849   : > { %5889 = vmatprep.subr.bf16.mxu0 %v11626_v35  ;;  %8642 = vmatprep.subr.bf16.mxu1 %v12329_v63  ;;  %12597 = vst [vmem:[#allocation33_spill] sm:$0xff] %v11760_v32 }
 0x84c   : > { %5890 = vmatpush1.bf16.msra.mxu0 %v11629_v38  ;;  %8643 = vmatpush3.bf16.msra.mxu1 %v9285_v39  ;;  %v11762_v39 = vld [vmem:[#allocation18 + $0x100] ss:$16 sps:$4 sm:$0xff]  }
 0x84d   : > { %5891 = vmatprep.subr.bf16.mxu0 %v11633_v42  ;;  %8644 = vmatprep.subr.bf16.mxu1 %v12329_v63  ;;  %12598 = vst [vmem:[#allocation34_spill] sm:$0xff] %v11762_v39 }
 0x850   : > { %5892 = vmatpush1.bf16.msra.mxu0 %v11636_v43  ;;  %8645 = vmatpush3.bf16.msra.mxu1 %v9289_v45  ;;  %v11764_v45 = vld [vmem:[#allocation18 + $0x108] ss:$16 sps:$4 sm:$0xff]  }
 0x851   : > { %5893 = vmatprep.subr.bf16.mxu0 %v11640_v59  ;;  %8646 = vmatprep.subr.bf16.mxu1 %v12329_v63  ;;  %12599 = vst [vmem:[#allocation35_spill] sm:$0xff] %v11764_v45 }
 0x854   : > { %5894 = vmatpush1.bf16.msra.mxu0 %v11643_v9  ;;  %8647 = vmatpush3.bf16.msra.mxu1 %v9293_v0  ;;  %v11770_v0 = vld [vmem:[#allocation18 + $0x124] ss:$16 sps:$4 sm:$0xff]  }
 0x855   : > { %5895 = vmatprep.subr.bf16.mxu0 %v11647_v58  ;;  %8648 = vmatprep.subr.bf16.mxu1 %v12329_v63  ;;  %12600 = vst [vmem:[#allocation36_spill] sm:$0xff] %v11770_v0 }
 0x858   : > { %5896 = vmatpush1.bf16.msra.mxu0 %v11650_v18  ;;  %8649 = vmatpush3.bf16.msra.mxu1 %v9297_v62  ;;  %v11772_v62 = vld [vmem:[#allocation18 + $0x12c] ss:$16 sps:$4 sm:$0xff]  }
 0x859   : > { %5897 = vmatprep.subr.bf16.mxu0 %v11654_v47  ;;  %8650 = vmatprep.subr.bf16.mxu1 %v12329_v63  ;;  %12601 = vst [vmem:[#allocation37_spill] sm:$0xff] %v11772_v62 }
 0x85c   : > { %5898 = vmatpush1.bf16.msra.mxu0 %v11657_v50  ;;  %8651 = vmatpush3.bf16.msra.mxu1 %v9301_v53  ;;  %v11774_v53 = vld [vmem:[#allocation18 + $0x120] ss:$16 sps:$4 sm:$0xff]  }
 0x85d   : > { %6420 = vmatprep.subr.bf16.mxu0 %v11662_v44  ;;  %6461 = vmatprep.subr.bf16.mxu1 %v11664_v37  ;;  %12602 = vst [vmem:[#allocation38_spill] sm:$0xff] %v11774_v53 }
 0x85f   : > { %5916 = vmatmul.mubr.bf16.vlgmr.msra.gmra.mrb[64].mxu0 %v5197_v24  ;;  %8653 = vmatmul.mubr.bf16.vlgmr.msra.gmra.mrb[56].mxu1 %v5197_v24  ;;  %v11752_v24 = vld [vmem:[#allocation18 + $0xe8] ss:$16 sps:$4 sm:$0xff]  }
 0x860   : > { %6421 = vmatpush1.bf16.msra.mxu0 %v11666_v21  ;;  %6462 = vmatpush1.bf16.msra.mxu1 %v11668_v54  ;;  %12595 = vst [vmem:[#allocation66_spill] sm:$0xff] %v11752_v24 }
 0x861   : > { %6422 = vmatprep.subr.bf16.mxu0 %v11674_v30  ;;  %6463 = vmatprep.subr.bf16.mxu1 %v11676_v60 }
 0x864   : > { %6423 = vmatpush1.bf16.msra.mxu0 %v11678_v26  ;;  %6464 = vmatpush1.bf16.msra.mxu1 %v11680_v55 }
 0x865   : > { %6424 = vmatprep.subr.bf16.mxu0 %v11686_v5  ;;  %6465 = vmatprep.subr.bf16.mxu1 %v11688_v8 }
 0x868   : > { %6425 = vmatpush1.bf16.msra.mxu0 %v11690_v48  ;;  %6466 = vmatpush1.bf16.msra.mxu1 %v11692_v49 }
 0x869   : > { %6426 = vmatprep.subr.bf16.mxu0 %v11698_v10  ;;  %6467 = vmatprep.subr.bf16.mxu1 %v11700_v29 }
 0x86c   : > { %6427 = vmatpush1.bf16.msra.mxu0 %v11702_v40  ;;  %6468 = vmatpush1.bf16.msra.mxu1 %v11704_v46 }
 0x86d   : > { %6428 = vmatprep.subr.bf16.mxu0 %v11710_v33  ;;  %6469 = vmatprep.subr.bf16.mxu1 %v11712_v57 }
 0x870   : > { %6429 = vmatpush1.bf16.msra.mxu0 %v11714_v41  ;;  %6470 = vmatpush1.bf16.msra.mxu1 %v11716_v15 }
 0x871   : > { %6430 = vmatprep.subr.bf16.mxu0 %v11722_v12  ;;  %6471 = vmatprep.subr.bf16.mxu1 %v11724_v23 }
 0x874   : > { %6431 = vmatpush1.bf16.msra.mxu0 %v11726_v36  ;;  %6472 = vmatpush1.bf16.msra.mxu1 %v11728_v19 }
 0x875   : > { %6432 = vmatprep.subr.bf16.mxu0 %v11734_v56  ;;  %6473 = vmatprep.subr.bf16.mxu1 %v11736_v17 }
 0x878   : > { %6433 = vmatpush1.bf16.msra.mxu0 %v11738_v7  ;;  %6474 = vmatpush1.bf16.msra.mxu1 %v11740_v11 }
 0x879   : > { %6434 = vmatprep.subr.bf16.mxu0 %v11746_v13  ;;  %6475 = vmatprep.subr.bf16.mxu1 %v11748_v16 }
 0x87c   : > { %6435 = vmatpush1.bf16.msra.mxu0 %v11750_v22  ;;  %6476 = vmatpush1.bf16.msra.mxu1 %v11752_v24  ;;  %v11776_v24 = vld [vmem:[#allocation18 + $0x128] ss:$16 sps:$4 sm:$0xff]   ;;  %v11816_v22 = vld [vmem:[#allocation18 + $0x1a4] ss:$16 sps:$4 sm:$0xff]  }
 0x87d   : > { %6436 = vmatprep.subr.bf16.mxu0 %v11758_v28  ;;  %6477 = vmatprep.subr.bf16.mxu1 %v11760_v32  ;;  %12603 = vst [vmem:[#allocation39_spill] sm:$0xff] %v11776_v24  ;;  %v11782_v32 = vld [vmem:[#allocation18 + $0x144] ss:$16 sps:$4 sm:$0xff]   ;;  %v11788_v28 = vld [vmem:[#allocation18 + $0x148] ss:$16 sps:$4 sm:$0xff]   ;;  %12616 = vst [vmem:[#allocation52_spill] sm:$0xff] %v11816_v22 }
 0x87e   : > { %12604 = vst [vmem:[#allocation40_spill] sm:$0xff] %v11782_v32  ;;  %12607 = vst [vmem:[#allocation43_spill] sm:$0xff] %v11788_v28 }
 0x880   : > { %6437 = vmatpush1.bf16.msra.mxu0 %v11762_v39  ;;  %6478 = vmatpush1.bf16.msra.mxu1 %v11764_v45  ;;  %v11784_v39 = vld [vmem:[#allocation18 + $0x14c] ss:$16 sps:$4 sm:$0xff]   ;;  %v11786_v45 = vld [vmem:[#allocation18 + $0x140] ss:$16 sps:$4 sm:$0xff]  }
 0x881   : > { %6438 = vmatprep.subr.bf16.mxu0 %v11770_v0  ;;  %6479 = vmatprep.subr.bf16.mxu1 %v11772_v62  ;;  %12605 = vst [vmem:[#allocation41_spill] sm:$0xff] %v11784_v39  ;;  %12606 = vst [vmem:[#allocation42_spill] sm:$0xff] %v11786_v45  ;;  %v11794_v62 = vld [vmem:[#allocation18 + $0x164] ss:$16 sps:$4 sm:$0xff]   ;;  %v11800_v0 = vld [vmem:[#allocation18 + $0x168] ss:$16 sps:$4 sm:$0xff]  }
 0x882   : > { %12608 = vst [vmem:[#allocation44_spill] sm:$0xff] %v11794_v62  ;;  %12611 = vst [vmem:[#allocation47_spill] sm:$0xff] %v11800_v0 }
 0x884   : > { %6439 = vmatpush1.bf16.msra.mxu0 %v11774_v53  ;;  %6480 = vmatpush1.bf16.msra.mxu1 %v11776_v24  ;;  %v11796_v53 = vld [vmem:[#allocation18 + $0x16c] ss:$16 sps:$4 sm:$0xff]   ;;  %v11798_v24 = vld [vmem:[#allocation18 + $0x160] ss:$16 sps:$4 sm:$0xff]  }
 0x885   : > { %6440 = vmatprep.subr.bf16.mxu0 %v11782_v32  ;;  %6481 = vmatprep.subr.bf16.mxu1 %v11784_v39  ;;  %12609 = vst [vmem:[#allocation45_spill] sm:$0xff] %v11796_v53  ;;  %12610 = vst [vmem:[#allocation46_spill] sm:$0xff] %v11798_v24  ;;  %v11806_v39 = vld [vmem:[#allocation18 + $0x184] ss:$16 sps:$4 sm:$0xff]   ;;  %v11812_v32 = vld [vmem:[#allocation18 + $0x188] ss:$16 sps:$4 sm:$0xff]  }
 0x886   : > { %12612 = vst [vmem:[#allocation48_spill] sm:$0xff] %v11806_v39  ;;  %12615 = vst [vmem:[#allocation51_spill] sm:$0xff] %v11812_v32 }
 0x888   : > { %6441 = vmatpush1.bf16.msra.mxu0 %v11786_v45  ;;  %6482 = vmatpush1.bf16.msra.mxu1 %v11788_v28  ;;  %v11808_v45 = vld [vmem:[#allocation18 + $0x18c] ss:$16 sps:$4 sm:$0xff]   ;;  %v11810_v28 = vld [vmem:[#allocation18 + $0x180] ss:$16 sps:$4 sm:$0xff]  }
 0x889   : > { %6442 = vmatprep.subr.bf16.mxu0 %v11794_v62  ;;  %6483 = vmatprep.subr.bf16.mxu1 %v11796_v53  ;;  %12613 = vst [vmem:[#allocation49_spill] sm:$0xff] %v11808_v45  ;;  %12614 = vst [vmem:[#allocation50_spill] sm:$0xff] %v11810_v28  ;;  %v11818_v62 = vld [vmem:[#allocation18 + $0x1ac] ss:$16 sps:$4 sm:$0xff]   ;;  %v11828_v53 = vld [vmem:[#allocation18 + $0x1c4] ss:$16 sps:$4 sm:$0xff]  }
 0x88a   : > { %12617 = vst [vmem:[#allocation53_spill] sm:$0xff] %v11818_v62  ;;  %12620 = vst [vmem:[#allocation57_spill] sm:$0xff] %v11828_v53 }
 0x88c   : > { %6443 = vmatpush1.bf16.msra.mxu0 %v11798_v24  ;;  %6484 = vmatpush1.bf16.msra.mxu1 %v11800_v0  ;;  %v11822_v0 = vld [vmem:[#allocation18 + $0x1a0] ss:$16 sps:$4 sm:$0xff]   ;;  %v11824_v24 = vld [vmem:[#allocation18 + $0x1a8] ss:$16 sps:$4 sm:$0xff]  }
 0x88d   : > { %6444 = vmatprep.subr.bf16.mxu0 %v11806_v39  ;;  %6485 = vmatprep.subr.bf16.mxu1 %v11808_v45  ;;  %12618 = vst [vmem:[#allocation54_spill] sm:$0xff] %v11822_v0  ;;  %12619 = vst [vmem:[#allocation55_spill] sm:$0xff] %v11824_v24  ;;  %v11830_v39 = vld [vmem:[#allocation18 + $0x1cc] ss:$16 sps:$4 sm:$0xff]   ;;  %v11834_v45 = vld [vmem:[#allocation18 + $0x1c0] ss:$16 sps:$4 sm:$0xff]  }
 0x88e   : > { %12621 = vst [vmem:[#allocation61_spill] sm:$0xff] %v11830_v39  ;;  %12622 = vst [vmem:[#allocation60_spill] sm:$0xff] %v11834_v45 }
 0x890   : > { %6445 = vmatpush1.bf16.msra.mxu0 %v11810_v28  ;;  %6486 = vmatpush1.bf16.msra.mxu1 %v11812_v32  ;;  %v11836_v28 = vld [vmem:[#allocation18 + $0x1c8] ss:$16 sps:$4 sm:$0xff]   ;;  %v11840_v32 = vld [vmem:[#allocation18 + $0x1e4] ss:$16 sps:$4 sm:$0xff]  }
 0x891   : > { %6446 = vmatprep.subr.bf16.mxu0 %v11816_v22  ;;  %6487 = vmatprep.subr.bf16.mxu1 %v11818_v62  ;;  %12623 = vst [vmem:[#allocation62_spill] sm:$0xff] %v11836_v28  ;;  %12624 = vst [vmem:[#allocation56_spill] sm:$0xff] %v11840_v32  ;;  %v11842_v22 = vld [vmem:[#allocation18 + $0x1ec] ss:$16 sps:$4 sm:$0xff]   ;;  %v11846_v62 = vld [vmem:[#allocation18 + $0x1e0] ss:$16 sps:$4 sm:$0xff]  }
 0x892   : > { %12625 = vst [vmem:[#allocation69_spill] sm:$0xff] %v11842_v22  ;;  %12626 = vst [vmem:[#allocation82_spill] sm:$0xff] %v11846_v62 }
 0x894   : > { %6447 = vmatpush1.bf16.msra.mxu0 %v11822_v0  ;;  %6488 = vmatpush1.bf16.msra.mxu1 %v11824_v24  ;;  %v11848_v0 = vld [vmem:[#allocation18 + $0x1e8] ss:$16 sps:$4 sm:$0xff]  }
 0x895   : > { %6448 = vmatprep.subr.bf16.mxu0 %v11828_v53  ;;  %6489 = vmatprep.subr.bf16.mxu1 %v11830_v39  ;;  %12627 = vst [vmem:[#allocation83_spill] sm:$0xff] %v11848_v0  ;;  %v5266_v39 = vld [vmem:[#allocation20] sm:$0xf] }
 0x896   : > { %v5275_v24 = vrot.slane %v5266_v39, %v12579_v14  ;;  %v5283_v36 = vrot.slane %v5266_v39, %v12580_v34  ;;  %v5279_v14 = vrot.slane %v5266_v39, %v12385_v4 }
 0x898   : > { %6449 = vmatpush1.bf16.msra.mxu0 %v11834_v45  ;;  %6490 = vmatpush1.bf16.msra.mxu1 %v11836_v28  ;;  %v5271_v45 = vrot.slane %v5266_v39, %v12578_v6 }
 0x899   : > { %6450 = vmatprep.subr.bf16.mxu0 %v11840_v32  ;;  %6491 = vmatprep.subr.bf16.mxu1 %v11842_v22 }
 0x89c   : > { %6451 = vmatpush1.bf16.msra.mxu0 %v11846_v62  ;;  %6492 = vmatpush1.bf16.msra.mxu1 %v11848_v0 }
 0x89d   : > { %6688 = vmatprep.subr.bf16.mxu0 %v11574_v3  ;;  %8656 = vmatprep.subr.bf16.mxu1 %v12329_v63 }
 0x912   : > { %v5649_v28 = vpop.f32.mrb[60].mxu0  ;;  %v5690_v53 = vpop.f32.mrb[52].mxu1 }
 0x913   : > { %v5650_v16 = vadd.f32 %v5649_v28, %v5271_v45  ;;  %v5651_v13 = vpop.f32.mrb[61].mxu0  ;;  %v5692_v32 = vpop.f32.mrb[53].mxu1 }
 0x914   : > { %v5653_v11 = vpop.f32.mrb[62].mxu0  ;;  %v5694_v22 = vpop.f32.mrb[54].mxu1  ;;  %v5652_v0 = vadd.f32 %v5651_v13, %v5275_v24  ;;  %v5693_v45 = vadd.f32 %v5692_v32, %v5283_v36 }
 0x915   : > { %v8148_v7 = vmul.f32 -1.442695, %v5650_v16  ;;  %v5654_v62 = vpop.f32.mrb[63].mxu0  ;;  %v5695_v17 = vpop.f32.mrb[55].mxu1  ;;  %v5691_v11 = vadd.f32 %v5690_v53, %v5279_v14 }
 0x916   : > { %v8149_v3 = vmul.f32 -1.442695, %v5652_v0 }
 0x917   : > { %9516 = vpow2.f32 %v8148_v7  ;;  %v12628_v7 = vld [vmem:[#allocation78_spill] sm:$0xff] }
 0x918   : > { %9518 = vpow2.f32 %v8149_v3 }
 0x921   : > { %v9517_v56 = vpop.eup %9516 }
 0x922   : > { %v5700_v19 = vadd.f32 1.0, %v9517_v56  ;;  %v9519_v6 = vpop.eup %9518 }
 0x923   : > { %v5706_v28 = vadd.f32 1.0, %v9519_v6 }
 0x924   : > { %9520 = vrcp.f32 %v5700_v19  ;;  %v12629_v19 = vld [vmem:[#allocation79_spill] sm:$0xff] }
 0x925   : > { %9522 = vrcp.f32 %v5706_v28 }
 0x92e   : > { %v9521_v23 = vpop.eup %9520 }
 0x92f   : > { %v5709_v16 = vmul.f32 %v9521_v23, %v5693_v45  ;;  %v9523_v14 = vpop.eup %9522 }
 0x930   : > { %v5712_v23 = vsub.f32 1.0, %v9523_v14  ;;  %v5714_v28 = vmul.f32 %v9523_v14, %v11587_v61 }
 0x931   : > { %v5710_v22 = vadd.f32 %v5709_v16, %v5691_v11 }
 0x932   : > { %v5917_v17 = vpop.f32.mrb[64].mxu0  ;;  %v5958_v13 = vpop.f32.mrb[56].mxu1 }
 0x933   : > { %9524 = vtanh.f32 %v5710_v22  ;;  %v5967_v24 = vadd.f32 %v5917_v17, %v12628_v7  ;;  %v5919_v0 = vpop.f32.mrb[65].mxu0  ;;  %v8654_v56 = vpop.f32.mrb[57].mxu1  ;;  %v11873_v7 = vld [vmem:[#allocation17] ss:$0 sm:$0xff] }
 0x934   : > { %v5974_v62 = vadd.f32 %v5919_v0, %v12629_v19  ;;  %v5921_v3 = vpop.f32.mrb[66].mxu0  ;;  %v5961_v34 = vpop.f32.mrb[58].mxu1  ;;  %v5988_v0 = vadd.f32 %v11873_v7, %v5958_v13 }
 0x935   : > { %v8175_v12 = vmul.f32 -1.442695, %v5967_v24  ;;  %v5922_v6 = vpop.f32.mrb[67].mxu0  ;;  %v8655_v36 = vpop.f32.mrb[59].mxu1 }
 0x936   : > { %v8176_v32 = vmul.f32 -1.442695, %v5974_v62  ;;  %v11877_v36 = vpop.permute.xlu0 %5998 }
 0x937   : > { %9526 = vpow2.f32 %v8175_v12  ;;  %vm6000_vm15 = vcmp.eq.s32.totalorder %v11877_v36, 1 }
 0x938   : > { %9528 = vpow2.f32 %v8176_v32 }
 0x93d   : > { %v9525_v39 = vpop.eup %9524 }
 0x93e   : > { %v5713_v53 = vmul.f32 %v9525_v39, %v5712_v23  ;;  %v9398_v39 = vld [vmem:[#allocation15 + $0x8] ss:$12 sps:$4 sm:$0xff]  }
 0x940   : > { %v5715_v45 = vadd.f32 %v5714_v28, %v5713_v53  ;;  %v9399_v28 = vld [vmem:[#allocation15 + $0x20] ss:$12 sps:$4 sm:$0xff]  }
 0x941   : > { %v9527_v11 = vpop.eup %9526 }
 0x942   : > { %v5971_v16 = vadd.f32 1.0, %v9527_v11  ;;  %v11866_v34 = vsel %vm5195_vm14, %v5715_v45, %v11587_v61  ;;  %v5717_v22 = vsel %vm5195_vm14, %v5715_v45, 0.0  ;;  %v9529_v17 = vpop.eup %9528  ;;  %v12630_v61 = vld [vmem:[#allocation73_spill] sm:$0xff]  ;;  %v12663_v45 = vld [vmem:[#allocation52_spill] sm:$0xff] }
 0x943   : > { %8150 = vst [vmem:[%s10356_s18 + $0x28] sm:$0xff] %v5717_v22  ;;  %v8405_v12 = vpack.c.bf16 %v11866_v34, %v11866_v34  ;;  %v5978_v24 = vadd.f32 1.0, %v9529_v17  ;;  %v12664_v11 = vld [vmem:[#allocation53_spill] sm:$0xff]  ;;  %v12666_v22 = vld [vmem:[#allocation55_spill] sm:$0xff] }
 0x944   : > { %9530 = vrcp.f32 %v5971_v16  ;;  %v12665_v16 = vld [vmem:[#allocation54_spill] sm:$0xff]  ;;  %v12668_v17 = vld [vmem:[#allocation61_spill] sm:$0xff] }
 0x945   : > { %6452 = vmatprep.mubr.bf16.mxu0 %v8405_v12  ;;  %6493 = vmatprep.mubr.bf16.mxu1 %v8405_v12  ;;  %9532 = vrcp.f32 %v5978_v24  ;;  %v12667_v12 = vld [vmem:[#allocation57_spill] sm:$0xff]  ;;  %v12669_v24 = vld [vmem:[#allocation60_spill] sm:$0xff] }
 0x94e   : > { %v9531_v56 = vpop.eup %9530 }
 0x94f   : > { %v5989_v19 = vmul.f32 %v9531_v56, %v5988_v0  ;;  %v9533_v52 = vpop.eup %9532  ;;  %v12670_v0 = vld [vmem:[#allocation62_spill] sm:$0xff]  ;;  %v12671_v56 = vld [vmem:[#allocation56_spill] sm:$0xff] }
 0x950   : > { %v5992_v3 = vsub.f32 1.0, %v9533_v52  ;;  %v5994_v14 = vmul.f32 %v9533_v52, %v11605_v2  ;;  %v6071_v52 = vld [vmem:[#allocation20] sm:$0xf] }
 0x951   : > { %v5990_v62 = vadd.f32 %v5989_v19, %v12630_v61  ;;  %v12672_v19 = vld [vmem:[#allocation69_spill] sm:$0xff]  ;;  %v12673_v61 = vld [vmem:[#allocation82_spill] sm:$0xff] }
 0x953   : > { %9534 = vtanh.f32 %v5990_v62  ;;  %v12674_v62 = vld [vmem:[#allocation83_spill] sm:$0xff] }
 0x95d   : > { %v9535_v6 = vpop.eup %9534 }
 0x95e   : > { %v5993_v32 = vmul.f32 %v9535_v6, %v5992_v3  ;;  %v12675_v3 = vld [vmem:[#allocation58_spill] sm:$0xff] }
 0x95f   : > { %v6076_v6 = vrot.slane %v6071_v52, %v12675_v3 }
 0x960   : > { %v5995_v23 = vadd.f32 %v5994_v14, %v5993_v32 }
 0x962   : > { %v11884_v13 = vsel %vm6000_vm15, %v5995_v23, %v11605_v2  ;;  %v9400_v2 = vld [vmem:[#allocation15 + $0x38] ss:$12 sps:$4 sm:$0xff]  }
 0x963   : > { %v6002_v53 = vpack.c.bf16 %v11884_v13, %v11884_v13  ;;  %v12676_v23 = vld [vmem:[#allocation59_spill] sm:$0xff] }
 0x965   : > { %6453 = vmatmul.mubr.bf16.vlgmr.msra.gmra.mrb[68].mxu0 %v6002_v53  ;;  %6494 = vmatmul.mubr.bf16.vlgmr.msra.gmra.mrb[60].mxu1 %v6002_v53 }
 0x966   : > { %6689 = vmatpush1.bf16.msra.mxu0 %v11600_v20  ;;  %8657 = vmatpush3.bf16.msra.mxu1 %v9398_v39  ;;  %v9401_v20 = vld [vmem:[#allocation15 + $0x50] ss:$12 sps:$4 sm:$0xff]   ;;  %v6080_v39 = vrot.slane %v6071_v52, %v12676_v23 }
 0x967   : > { %6690 = vmatprep.subr.bf16.mxu0 %v11609_v25  ;;  %8658 = vmatprep.subr.bf16.mxu1 %v12329_v63  ;;  %v9403_v25 = vld [vmem:[#allocation15 + $0x80] ss:$12 sps:$4 sm:$0xff]  }
 0x968   : > { %6720 = vmatprep.mubr.bf16.mxu0 %v12355_v1  ;;  %8672 = vmatprep.mubr.msk.bf16.mxu1 %vm9972_vm2, %v12329_v63  ;;  %v9402_v1 = vld [vmem:[#allocation15 + $0x68] ss:$12 sps:$4 sm:$0xff]  }
 0x96a   : > { %6691 = vmatpush1.bf16.msra.mxu0 %v11612_v27  ;;  %8659 = vmatpush3.bf16.msra.mxu1 %v9399_v28  ;;  %v9404_v27 = vld [vmem:[#allocation15 + $0x98] ss:$12 sps:$4 sm:$0xff]  }
 0x96b   : > { %6692 = vmatprep.subr.bf16.mxu0 %v11616_v51  ;;  %8660 = vmatprep.subr.bf16.mxu1 %v12329_v63  ;;  %v9405_v51 = vld [vmem:[#allocation15 + $0xb0] ss:$12 sps:$4 sm:$0xff]  }
 0x96e   : > { %6693 = vmatpush1.bf16.msra.mxu0 %v11622_v31  ;;  %8661 = vmatpush3.bf16.msra.mxu1 %v9400_v2  ;;  %v12632_v31 = vld [vmem:[#allocation94_spill] sm:$0xff] }
 0x96f   : > { %6694 = vmatprep.subr.bf16.mxu0 %v11626_v35  ;;  %8662 = vmatprep.subr.bf16.mxu1 %v12329_v63  ;;  %v12633_v35 = vld [vmem:[#allocation95_spill] sm:$0xff] }
 0x972   : > { %6695 = vmatpush1.bf16.msra.mxu0 %v11629_v38  ;;  %8663 = vmatpush3.bf16.msra.mxu1 %v9401_v20  ;;  %v12634_v38 = vld [vmem:[#allocation65_spill] sm:$0xff] }
 0x973   : > { %6696 = vmatprep.subr.bf16.mxu0 %v11633_v42  ;;  %8664 = vmatprep.subr.bf16.mxu1 %v12329_v63  ;;  %v12635_v42 = vld [vmem:[#allocation67_spill] sm:$0xff] }
 0x976   : > { %6697 = vmatpush1.bf16.msra.mxu0 %v11636_v43  ;;  %8665 = vmatpush3.bf16.msra.mxu1 %v9402_v1  ;;  %v12636_v43 = vld [vmem:[#allocation68_spill] sm:$0xff] }
 0x977   : > { %6698 = vmatprep.subr.bf16.mxu0 %v11640_v59  ;;  %8666 = vmatprep.subr.bf16.mxu1 %v12329_v63  ;;  %v12637_v59 = vld [vmem:[#allocation70_spill] sm:$0xff] }
 0x97a   : > { %6699 = vmatpush1.bf16.msra.mxu0 %v11643_v9  ;;  %8667 = vmatpush3.bf16.msra.mxu1 %v9403_v25  ;;  %v12638_v9 = vld [vmem:[#allocation71_spill] sm:$0xff] }
 0x97b   : > { %6700 = vmatprep.subr.bf16.mxu0 %v11647_v58  ;;  %8668 = vmatprep.subr.bf16.mxu1 %v12329_v63  ;;  %v12639_v58 = vld [vmem:[#allocation75_spill] sm:$0xff] }
 0x97e   : > { %6701 = vmatpush1.bf16.msra.mxu0 %v11650_v18  ;;  %8669 = vmatpush3.bf16.msra.mxu1 %v9404_v27  ;;  %v12640_v18 = vld [vmem:[#allocation63_spill] sm:$0xff] }
 0x97f   : > { %6702 = vmatprep.subr.bf16.mxu0 %v11654_v47  ;;  %8670 = vmatprep.subr.bf16.mxu1 %v12329_v63  ;;  %v12631_v63 = vld [vmem:[#allocation93_spill] sm:$0xff]  ;;  %v12641_v47 = vld [vmem:[#allocation64_spill] sm:$0xff] }
 0x982   : > { %6703 = vmatpush1.bf16.msra.mxu0 %v11657_v50  ;;  %8671 = vmatpush3.bf16.msra.mxu1 %v9405_v51  ;;  %v12642_v50 = vld [vmem:[#allocation66_spill] sm:$0xff] }
 0x983   : > { %7225 = vmatprep.subr.bf16.mxu0 %v11662_v44  ;;  %7266 = vmatprep.subr.bf16.mxu1 %v11664_v37  ;;  %v12643_v44 = vld [vmem:[#allocation32_spill] sm:$0xff]  ;;  %v12644_v37 = vld [vmem:[#allocation33_spill] sm:$0xff] }
 0x985   : > { %6721 = vmatmul.mubr.bf16.vlgmr.msra.gmra.mrb[72].mxu0 %v6002_v53  ;;  %8673 = vmatmul.mubr.bf16.vlgmr.msra.gmra.mrb[64].mxu1 %v6002_v53 }
 0x986   : > { %7226 = vmatpush1.bf16.msra.mxu0 %v11666_v21  ;;  %7267 = vmatpush1.bf16.msra.mxu1 %v11668_v54  ;;  %v12645_v21 = vld [vmem:[#allocation34_spill] sm:$0xff]  ;;  %v12646_v54 = vld [vmem:[#allocation35_spill] sm:$0xff] }
 0x987   : > { %7227 = vmatprep.subr.bf16.mxu0 %v11674_v30  ;;  %7268 = vmatprep.subr.bf16.mxu1 %v11676_v60  ;;  %v12647_v30 = vld [vmem:[#allocation36_spill] sm:$0xff]  ;;  %v12648_v60 = vld [vmem:[#allocation37_spill] sm:$0xff] }
 0x98a   : > { %7228 = vmatpush1.bf16.msra.mxu0 %v11678_v26  ;;  %7269 = vmatpush1.bf16.msra.mxu1 %v11680_v55  ;;  %v12649_v26 = vld [vmem:[#allocation38_spill] sm:$0xff]  ;;  %v12650_v55 = vld [vmem:[#allocation39_spill] sm:$0xff] }
 0x98b   : > { %7229 = vmatprep.subr.bf16.mxu0 %v11686_v5  ;;  %7270 = vmatprep.subr.bf16.mxu1 %v11688_v8  ;;  %v12651_v5 = vld [vmem:[#allocation40_spill] sm:$0xff]  ;;  %v12652_v8 = vld [vmem:[#allocation41_spill] sm:$0xff] }
 0x98e   : > { %7230 = vmatpush1.bf16.msra.mxu0 %v11690_v48  ;;  %7271 = vmatpush1.bf16.msra.mxu1 %v11692_v49  ;;  %v12653_v48 = vld [vmem:[#allocation42_spill] sm:$0xff]  ;;  %v12654_v49 = vld [vmem:[#allocation43_spill] sm:$0xff] }
 0x98f   : > { %7231 = vmatprep.subr.bf16.mxu0 %v11698_v10  ;;  %7272 = vmatprep.subr.bf16.mxu1 %v11700_v29  ;;  %v12655_v10 = vld [vmem:[#allocation44_spill] sm:$0xff]  ;;  %v12656_v29 = vld [vmem:[#allocation45_spill] sm:$0xff] }
 0x992   : > { %7232 = vmatpush1.bf16.msra.mxu0 %v11702_v40  ;;  %7273 = vmatpush1.bf16.msra.mxu1 %v11704_v46  ;;  %v12657_v40 = vld [vmem:[#allocation46_spill] sm:$0xff]  ;;  %v12658_v46 = vld [vmem:[#allocation47_spill] sm:$0xff] }
 0x993   : > { %7233 = vmatprep.subr.bf16.mxu0 %v11710_v33  ;;  %7274 = vmatprep.subr.bf16.mxu1 %v11712_v57  ;;  %v12659_v33 = vld [vmem:[#allocation48_spill] sm:$0xff]  ;;  %v12660_v57 = vld [vmem:[#allocation49_spill] sm:$0xff] }
 0x996   : > { %7234 = vmatpush1.bf16.msra.mxu0 %v11714_v41  ;;  %7275 = vmatpush1.bf16.msra.mxu1 %v11716_v15  ;;  %v12661_v41 = vld [vmem:[#allocation50_spill] sm:$0xff]  ;;  %v12662_v15 = vld [vmem:[#allocation51_spill] sm:$0xff] }
 0x997   : > { %7235 = vmatprep.subr.bf16.mxu0 %v12631_v63  ;;  %7276 = vmatprep.subr.bf16.mxu1 %v12632_v31 }
 0x99a   : > { %7236 = vmatpush1.bf16.msra.mxu0 %v12633_v35  ;;  %7277 = vmatpush1.bf16.msra.mxu1 %v12634_v38 }
 0x99b   : > { %7237 = vmatprep.subr.bf16.mxu0 %v12635_v42  ;;  %7278 = vmatprep.subr.bf16.mxu1 %v12636_v43  ;;  %v12677_v43 = vld [vmem:[#allocation31_spill] sm:$0xff] }
 0x99e   : > { %7238 = vmatpush1.bf16.msra.mxu0 %v12637_v59  ;;  %7279 = vmatpush1.bf16.msra.mxu1 %v12638_v9  ;;  %v6088_v59 = vrot.slane %v6071_v52, %v12677_v43  ;;  %v6084_v9 = vrot.slane %v6071_v52, %v12385_v4  ;;  %v12680_v52 = vld [vmem:[#allocation76_spill] sm:$0xff] }
 0x99f   : > { %7239 = vmatprep.subr.bf16.mxu0 %v12639_v58  ;;  %7280 = vmatprep.subr.bf16.mxu1 %v12640_v18 }
 0x9a2   : > { %7240 = vmatpush1.bf16.msra.mxu0 %v12641_v47  ;;  %7281 = vmatpush1.bf16.msra.mxu1 %v12642_v50 }
 0x9a3   : > { %7241 = vmatprep.subr.bf16.mxu0 %v12643_v44  ;;  %7282 = vmatprep.subr.bf16.mxu1 %v12644_v37 }
 0x9a6   : > { %7242 = vmatpush1.bf16.msra.mxu0 %v12645_v21  ;;  %7283 = vmatpush1.bf16.msra.mxu1 %v12646_v54 }
 0x9a7   : > { %7243 = vmatprep.subr.bf16.mxu0 %v12647_v30  ;;  %7284 = vmatprep.subr.bf16.mxu1 %v12648_v60  ;;  %v12678_v30 = vld [vmem:[#allocation80_spill] sm:$0xff] }
 0x9aa   : > { %7244 = vmatpush1.bf16.msra.mxu0 %v12649_v26  ;;  %7285 = vmatpush1.bf16.msra.mxu1 %v12650_v55 }
 0x9ab   : > { %7245 = vmatprep.subr.bf16.mxu0 %v12651_v5  ;;  %7286 = vmatprep.subr.bf16.mxu1 %v12652_v8  ;;  %v12679_v5 = vld [vmem:[#allocation81_spill] sm:$0xff] }
 0x9ae   : > { %7246 = vmatpush1.bf16.msra.mxu0 %v12653_v48  ;;  %7287 = vmatpush1.bf16.msra.mxu1 %v12654_v49 }
 0x9af   : > { %7247 = vmatprep.subr.bf16.mxu0 %v12655_v10  ;;  %7288 = vmatprep.subr.bf16.mxu1 %v12656_v29 }
 0x9b2   : > { %7248 = vmatpush1.bf16.msra.mxu0 %v12657_v40  ;;  %7289 = vmatpush1.bf16.msra.mxu1 %v12658_v46 }
 0x9b3   : > { %7249 = vmatprep.subr.bf16.mxu0 %v12659_v33  ;;  %7290 = vmatprep.subr.bf16.mxu1 %v12660_v57 }
 0x9b6   : > { %7250 = vmatpush1.bf16.msra.mxu0 %v12661_v41  ;;  %7291 = vmatpush1.bf16.msra.mxu1 %v12662_v15 }
 0x9b7   : > { %7251 = vmatprep.subr.bf16.mxu0 %v12663_v45  ;;  %7292 = vmatprep.subr.bf16.mxu1 %v12664_v11 }
 0x9ba   : > { %7252 = vmatpush1.bf16.msra.mxu0 %v12665_v16  ;;  %7293 = vmatpush1.bf16.msra.mxu1 %v12666_v22 }
 0x9bb   : > { %7253 = vmatprep.subr.bf16.mxu0 %v12667_v12  ;;  %7294 = vmatprep.subr.bf16.mxu1 %v12668_v17 }
 0x9be   : > { %7254 = vmatpush1.bf16.msra.mxu0 %v12669_v24  ;;  %7295 = vmatpush1.bf16.msra.mxu1 %v12670_v0 }
 0x9bf   : > { %7255 = vmatprep.subr.bf16.mxu0 %v12671_v56  ;;  %7296 = vmatprep.subr.bf16.mxu1 %v12672_v19 }
 0x9c2   : > { %7256 = vmatpush1.bf16.msra.mxu0 %v12673_v61  ;;  %7297 = vmatpush1.bf16.msra.mxu1 %v12674_v62 }
 0xa38   : > { %v6454_v14 = vpop.f32.mrb[68].mxu0  ;;  %v6495_v32 = vpop.f32.mrb[60].mxu1 }
 0xa39   : > { %v6455_v53 = vadd.f32 %v6454_v14, %v6076_v6  ;;  %v6456_v28 = vpop.f32.mrb[69].mxu0  ;;  %v6497_v2 = vpop.f32.mrb[61].mxu1  ;;  %v6496_v50 = vadd.f32 %v6495_v32, %v6084_v9 }
 0xa3a   : > { %v6458_v20 = vpop.f32.mrb[70].mxu0  ;;  %v6499_v1 = vpop.f32.mrb[62].mxu1  ;;  %v6457_v63 = vadd.f32 %v6456_v28, %v6080_v39  ;;  %v6498_v18 = vadd.f32 %v6497_v2, %v6088_v59 }
 0xa3b   : > { %v8244_v25 = vmul.f32 -1.442695, %v6455_v53  ;;  %v6459_v27 = vpop.f32.mrb[71].mxu0  ;;  %v6500_v51 = vpop.f32.mrb[63].mxu1 }
 0xa3c   : > { %v8245_v31 = vmul.f32 -1.442695, %v6457_v63  ;;  %v6804_v32 = vpop.permute.xlu1 %6803 }
 0xa3d   : > { %9536 = vpow2.f32 %v8244_v25  ;;  %vm6805_vm0 = vcmp.eq.s32.totalorder %v6804_v32, 1 }
 0xa3e   : > { %9538 = vpow2.f32 %v8245_v31 }
 0xa47   : > { %v9537_v35 = vpop.eup %9536 }
 0xa48   : > { %v6505_v38 = vadd.f32 1.0, %v9537_v35  ;;  %v9539_v42 = vpop.eup %9538 }
 0xa49   : > { %v6511_v58 = vadd.f32 1.0, %v9539_v42 }
 0xa4a   : > { %9540 = vrcp.f32 %v6505_v38 }
 0xa4b   : > { %9542 = vrcp.f32 %v6511_v58 }
 0xa54   : > { %v9541_v47 = vpop.eup %9540 }
 0xa55   : > { %v6514_v44 = vmul.f32 %v9541_v47, %v6498_v18  ;;  %v9543_v46 = vpop.eup %9542 }
 0xa56   : > { %v6517_v57 = vsub.f32 1.0, %v9543_v46  ;;  %v6519_v45 = vmul.f32 %v9543_v46, %v11866_v34 }
 0xa57   : > { %v6515_v37 = vadd.f32 %v6514_v44, %v6496_v50 }
 0xa58   : > { %v6722_v21 = vpop.f32.mrb[72].mxu0  ;;  %v6763_v54 = vpop.f32.mrb[64].mxu1 }
 0xa59   : > { %9544 = vtanh.f32 %v6515_v37  ;;  %v6772_v60 = vadd.f32 %v6722_v21, %v12678_v30  ;;  %v6724_v26 = vpop.f32.mrb[73].mxu0  ;;  %v8674_v55 = vpop.f32.mrb[65].mxu1  ;;  %v6793_v19 = vadd.f32 %v11873_v7, %v6763_v54  ;;  %v6876_v7 = vld [vmem:[#allocation20] sm:$0xf] }
 0xa5a   : > { %v6779_v8 = vadd.f32 %v6724_v26, %v12679_v5  ;;  %v6726_v48 = vpop.f32.mrb[74].mxu0  ;;  %v6766_v49 = vpop.f32.mrb[66].mxu1  ;;  %v6881_v1 = vrot.slane %v6876_v7, %v12675_v3  ;;  %v6885_v51 = vrot.slane %v6876_v7, %v12676_v23  ;;  %v6893_v44 = vrot.slane %v6876_v7, %v12677_v43 }
 0xa5b   : > { %v8271_v10 = vmul.f32 -1.442695, %v6772_v60  ;;  %v6727_v29 = vpop.f32.mrb[75].mxu0  ;;  %v8675_v40 = vpop.f32.mrb[67].mxu1  ;;  %v6889_v23 = vrot.slane %v6876_v7, %v12385_v4 }
 0xa5c   : > { %v8272_v33 = vmul.f32 -1.442695, %v6779_v8 }
 0xa5d   : > { %9546 = vpow2.f32 %v8271_v10 }
 0xa5e   : > { %9548 = vpow2.f32 %v8272_v33 }
 0xa63   : > { %v9545_v41 = vpop.eup %9544 }
 0xa64   : > { %v6518_v15 = vmul.f32 %v9545_v41, %v6517_v57 }
 0xa66   : > { %v6520_v11 = vadd.f32 %v6519_v45, %v6518_v15 }
 0xa67   : > { %v9547_v16 = vpop.eup %9546 }
 0xa68   : > { %v6776_v22 = vadd.f32 1.0, %v9547_v16  ;;  %v11987_v12 = vsel %vm6000_vm15, %v6520_v11, %v11866_v34  ;;  %v6522_v17 = vsel %vm6000_vm15, %v6520_v11, 0.0  ;;  %v9549_v0 = vpop.eup %9548 }
 0xa69   : > { %8246 = vst [vmem:[%s10356_s18 + $0x30] sm:$0xff] %v6522_v17  ;;  %v8407_v24 = vpack.c.bf16 %v11987_v12, %v11987_v12  ;;  %v6783_v56 = vadd.f32 1.0, %v9549_v0 }
 0xa6a   : > { %9550 = vrcp.f32 %v6776_v22 }
 0xa6b   : > { %7257 = vmatprep.mubr.bf16.mxu0 %v8407_v24  ;;  %7298 = vmatprep.mubr.bf16.mxu1 %v8407_v24  ;;  %9552 = vrcp.f32 %v6783_v56 }
 0xa74   : > { %v9551_v61 = vpop.eup %9550 }
 0xa75   : > { %v6794_v62 = vmul.f32 %v9551_v61, %v6793_v19  ;;  %v9553_v6 = vpop.eup %9552 }
 0xa76   : > { %v6797_v36 = vsub.f32 1.0, %v9553_v6  ;;  %v6799_v53 = vmul.f32 %v9553_v6, %v11884_v13 }
 0xa77   : > { %v6795_v34 = vadd.f32 %v6794_v62, %v12680_v52 }
 0xa79   : > { %9554 = vtanh.f32 %v6795_v34 }
 0xa83   : > { %v9555_v14 = vpop.eup %9554 }
 0xa84   : > { %v6798_v39 = vmul.f32 %v9555_v14, %v6797_v36 }
 0xa86   : > { %v6800_v28 = vadd.f32 %v6799_v53, %v6798_v39 }
 0xa88   : > { %v6806_v2 = vsel %vm6805_vm0, %v6800_v28, %v11884_v13 }
 0xa89   : > { %v8406_v20 = vpack.c.bf16 %v6806_v2, %v6806_v2  ;;  %7330 = vst [vmem:[#allocation22] sm:$0xff] %v6806_v2 }
 0xa8b   : > { %7258 = vmatmul.mubr.bf16.vlgmr.msra.gmra.mrb[76].mxu0 %v8406_v20  ;;  %7299 = vmatmul.mubr.bf16.vlgmr.msra.gmra.mrb[68].mxu1 %v8406_v20 }
 0xb5e   : > { %v7259_v25 = vpop.f32.mrb[76].mxu0  ;;  %v7300_v27 = vpop.f32.mrb[68].mxu1 }
 0xb5f   : > { %v7260_v63 = vadd.f32 %v7259_v25, %v6881_v1  ;;  %v7261_v31 = vpop.f32.mrb[77].mxu0  ;;  %v7302_v35 = vpop.f32.mrb[69].mxu1  ;;  %v7301_v30 = vadd.f32 %v7300_v27, %v6889_v23 }
 0xb60   : > { %v7263_v38 = vpop.f32.mrb[78].mxu0  ;;  %v7304_v42 = vpop.f32.mrb[70].mxu1  ;;  %v7262_v13 = vadd.f32 %v7261_v31, %v6885_v51  ;;  %v7303_v21 = vadd.f32 %v7302_v35, %v6893_v44 }
 0xb61   : > { %v8340_v59 = vmul.f32 -1.442695, %v7260_v63  ;;  %v7264_v9 = vpop.f32.mrb[79].mxu0  ;;  %v7305_v58 = vpop.f32.mrb[71].mxu1 }
 0xb62   : > { %v8341_v18 = vmul.f32 -1.442695, %v7262_v13 }
 0xb63   : > { %9556 = vpow2.f32 %v8340_v59 }
 0xb64   : > { %9558 = vpow2.f32 %v8341_v18 }
 0xb6d   : > { %v9557_v47 = vpop.eup %9556 }
 0xb6e   : > { %v7310_v50 = vadd.f32 1.0, %v9557_v47  ;;  %v9559_v3 = vpop.eup %9558 }
 0xb6f   : > { %v7316_v37 = vadd.f32 1.0, %v9559_v3 }
 0xb70   : > { %9560 = vrcp.f32 %v7310_v50 }
 0xb71   : > { %9562 = vrcp.f32 %v7316_v37 }
 0xb7a   : > { %v9561_v54 = vpop.eup %9560 }
 0xb7b   : > { %v7319_v60 = vmul.f32 %v9561_v54, %v7303_v21  ;;  %v9563_v55 = vpop.eup %9562 }
 0xb7c   : > { %v7322_v5 = vsub.f32 1.0, %v9563_v55  ;;  %v7324_v48 = vmul.f32 %v9563_v55, %v11987_v12 }
 0xb7d   : > { %v7320_v26 = vadd.f32 %v7319_v60, %v7301_v30 }
 0xb7f   : > { %9564 = vtanh.f32 %v7320_v26 }
 0xb89   : > { %v9565_v8 = vpop.eup %9564 }
 0xb8a   : > { %v7323_v49 = vmul.f32 %v9565_v8, %v7322_v5 }
 0xb8c   : > { %v7325_v10 = vadd.f32 %v7324_v48, %v7323_v49 }
 0xb8e   : > { %v7326_v43 = vsel %vm6805_vm0, %v7325_v10, %v11987_v12  ;;  %v7327_v4 = vsel %vm6805_vm0, %v7325_v10, 0.0 }
 0xb8f   : > { %8342 = vst [vmem:[%s10356_s18 + $0x38] sm:$0xff] %v7327_v4  ;;  %7331 = vst [vmem:[#allocation22 + $0x8] sm:$0xff] %v7326_v43 }
 0xb90 PF: > { %s8351_s8 = sshll.u32 %s10061_s24, 10  ;;  %s7346_s14 = sshll.u32 %s10356_s18, 4  ;;  %s12015_s14 = int_to_ptr.vmem [resolvable:$true] %s7346_s14 }
 0xb91   : > { %s12012_s25 = scalar_lea.hbm %s12090_s10, %s8351_s8  ;;  %s7333_s26 = scalar_lea.sflag [#allocation8], %s10326_s15 }
 0xb92   : > { %s9838_s23 = scalar_lea.vmem %s12015_s14, 1024  ;;  %p12681_p4 = scmp.ne.s32.totalorder %s12290_s12, 0 }
 0xb93   : > { %p9839_p1 = scmp.ne.s32.totalorder %s12015_s14, %s9838_s23  ;;  %s9973_s28 = smov [#allocation21]  }
 0xb94   : > { %s9842_s13 = sshll.u32 %s9973_s28, 4  ;;  %s9843_s13 = int_to_ptr.vmem [resolvable:$false] %s9842_s13 }
 0xb95   : > { %p9840_p10 = pnand %p9839_p1, %p12681_p4  ;;  %s9844_s0 = scalar_lea.vmem %s9843_s13, 2048 }
 0xb96   : > { %p9845_p0 = scmp.lt.s32.totalorder %s12015_s14, %s9843_s13  ;;  %p9846_p2 = scmp.lt.s32.totalorder %s9844_s0, %s9838_s23 }
 0xb97   : > { %p9841_p13 = pneg %p9840_p10 }
 0xb98   : > { %p9847_p8 = por %p9846_p2, %p9845_p0 }
 0xb9a   : > { %p9848_p9 = pnand %p9847_p8, %p9841_p13 }
 0xb9c   : > { %9851 = shalt.err (!%p9848_p9)
}
 0xb9d   : > { %s9852_s18 = scalar_lea.hbm %s12012_s25, 1024  ;;  %s9856_s6 = scalar_lea.hbm %s12090_s10, 3072 }
 0xb9e   : > { %p9853_p11 = scmp.ne.s32.totalorder %s12012_s25, %s9852_s18  ;;  %p9857_p5 = scmp.lt.u32.totalorder %s12012_s25, %s12090_s10 }
 0xb9f   : > { %p9858_p7 = scmp.lt.u32.totalorder %s9856_s6, %s9852_s18  ;;  %p9860_p1 = scmp.lt.u32.totalorder %s9852_s18, %s12012_s25 }
 0xba0   : > { %p9854_p6 = pnand %p9853_p11, %p12681_p4 }
 0xba1   : > { %p9859_p3 = por %p9858_p7, %p9857_p5 }
 0xba2   : > { %p9855_p12 = pneg %p9854_p6 }
 0xba3   : > { %p9861_p10 = por %p9860_p1, %p9859_p3 }
 0xba5   : > { %p9862_p13 = pnand %p9861_p10, %p9855_p12 }
 0xba7   : > { %9865 = shalt.err (!%p9862_p13)
}
 0xba8   : > { %s9974_s29 = smov 128   ;;  %s9975_s23 = smov 8  }
 0xba9   : > { %8710 = dma.vmem_to_hbm [thread:$0]  (%p12681_p4), %s12015_s14, 1024, %s12012_s25, %s7333_s26, %s9974_s29, %s9974_s29, %s9975_s23  }
 0xbaa   : > { %s9976_s28 = smov [#allocation22]   ;;  %p12682_p2 = scmp.eq.s32.totalorder %s10061_s24, 2 }
 0xbab   : > { %s7359_s13 = sshll.u32 %s9976_s28, 4  ;;  %s7360_s13 = int_to_ptr.vmem [resolvable:$true] %s7359_s13 }
 0xbac   : > { %s9866_s0 = scalar_lea.vmem %s7360_s13, 256  ;;  %p9873_p11 = scmp.lt.s32.totalorder %s7360_s13, %s7360_s13 }
 0xbad   : > { %p9867_p0 = scmp.ne.s32.totalorder %s7360_s13, %s9866_s0  ;;  %p9874_p6 = scmp.lt.s32.totalorder %s9866_s0, %s9866_s0 }
 0xbaf   : > { %p9868_p8 = pnand %p9867_p0, %p12682_p2  ;;  %p9875_p12 = por %p9874_p6, %p9873_p11 }
 0xbb1   : > { %p9869_p9 = pneg %p9868_p8 }
 0xbb3   : > { %p9876_p5 = pnand %p9875_p12, %p9869_p9 }
 0xbb5   : > { %9879 = shalt.err (!%p9876_p5)
}
 0xbb6   : > { %s9880_s12 = scalar_lea.hbm %s12091_s11, 256  ;;  %p12683_p7 = pmov %p12682_p2 }
 0xbb7   : > { %p9881_p4 = scmp.ne.s32.totalorder %s12091_s11, %s9880_s12  ;;  %p9886_p10 = scmp.lt.u32.totalorder %s9880_s12, %s12091_s11 }
 0xbb9   : > { %p9882_p3 = pnand %p9881_p4, %p12683_p7 }
 0xbbb   : > { %p9883_p1 = pneg %p9882_p3 }
 0xbbd   : > { %p9888_p13 = pnand %p9886_p10, %p9883_p1 }
 0xbbf   : > { %9891 = shalt.err (!%p9888_p13)
}
 0xbc0   : > { %p12684_p0 = pmov %p12682_p2 }
 0xbc2   : > { %8712 = dma.vmem_to_hbm [thread:$0]  (%p12684_p0), %s7360_s13, 256, %s12091_s11, [#allocation23], %s9974_s29, %s9974_s29, %s9975_s23  }
 0xbc3   : > { %p12685_p2 = pmov %p12684_p0 }
 0xbc4   : > { %p12686_p8 = pmov %p12684_p0 }
 0xbc5   : > { %9929 = dma.done.wait (%p12685_p2), [#allocation23], 256  }
 0xbc6   : > { %9931 = vsyncadd (%p12686_p8), [#allocation23], 4294967040 }
 0xbc7 PF: > { %p8768_p9 = scmp.ge.s32.totalorder %s9950_s22, 2  ;;  %s7378_s8 = sand.u32 1, %s9938_s19  }
 0xbc8   : > { %p12687_p11 = scmp.ne.s32.totalorder %s12291_s4, 0  ;;  %s7379_s2 = scalar_lea.sflag [#allocation8], %s7378_s8 }
 0xbca   : > { %p8746_p6 = pnand %p8768_p9, %p12687_p11 }
 0xbcc   : > { %9933 = dma.done.wait (!%p8746_p6), %s7379_s2, 1024  }
 0xbcd   : > { %9935 = vsyncadd (!%p8746_p6), %s7379_s2, 4294966272  ;;  %p31_p12 = scmp.ge.s32.totalorder %s10245_s17, 5   ;;  %s12688_s19 = smov %s9942_s20 }
 0xbce   : > { %s12689_s20 = smov %s9946_s21  ;;  %s12690_s21 = smov %s10256_s30 }
 0xbcf   : > { %s12691_s22 = smov %s10245_s17  ;;  %33 = sbr.rel (!%p31_p12) target bundleno = 16 (0x10), region = 161 }
 0xbd6   :  { %7384 = vsyncpa [#allocation7], 1 }
 0xbd7   :  { %7386 = vsyncpa [#allocation7 + $0x1], 1 }
 0xbd8   :  { %7387 = vsyncpa [#allocation10], 1 }
 0xbd9   :  { %7388 = vsyncpa [#allocation13], 1 }
 0xbda   :  { %7389 = vsyncpa [#allocation16], 1 }
 0xbdb   :  { %7390 = vsyncpa [#allocation19], 1 }
 0xbdc   :  { %7391 = vsyncpa [#allocation8], 1 }
 0xbdd   :  { %7393 = vsyncpa [#allocation8 + $0x1], 1 }
 0xbde   :  { %7394 = vsyncpa [#allocation23], 1 }

</bundles_post_ra>
